<compile_context>
chip_gen: v5e
topology: v5e:2x2
jax: 0.10.0
libtpu: 0.0.40
codegen_flags: <defaults>
</compile_context>

<pallas_src>
import math
import numpy as np
import jax
import jax.numpy as jnp
from jax.experimental import pallas as pl
from jax.experimental.pallas import tpu as pltpu

# ----- hyper-parameters (scaled-down but same structure as the reference) ---
d_model = 128
n_heads = 4
d_k = d_v = 32          # d_model == n_heads * d_k
d_ff = 256
n_layers = 2
src_vocab_size = 16
tgt_vocab_size = 16
LN_EPS = 1e-5
LANE = 128              # TPU lane width; attn / logits outputs padded to this
V_PAD = 128             # padded vocab width for lane-dense logits store
SCALE = 1.0 / math.sqrt(d_k)


# ======================= in-kernel helper functions =========================

def _layer_norm(y):
    mean = jnp.mean(y, axis=-1, keepdims=True)
    c = y - mean
    var = jnp.mean(c * c, axis=-1, keepdims=True)
    return c * jax.lax.rsqrt(var + LN_EPS)


def _pad_eye(n):
    """(n, LANE) f32 matrix with 1 on the diagonal: pads attn to 128 lanes."""
    r = jax.lax.broadcasted_iota(jnp.int32, (n, LANE), 0)
    c = jax.lax.broadcasted_iota(jnp.int32, (n, LANE), 1)
    return (r == c).astype(jnp.float32)


def _mha_block(x_q, x_kv, mask_add, wq, wk, wv, wo, eye_pad):
    """MultiHeadAttention + residual + LayerNorm (batched over heads).

    x_q:      (Lq, D)  f32
    x_kv:     (Lk, D)  f32
    mask_add: (Lq, Lk) f32  additive (0 / -1e9)
    wq, wk:   (H, D, d_k)  bf16
    wv:       (H, D, d_v)  bf16
    wo:       (H, d_v, D)  bf16
    eye_pad:  (Lk, LANE)   f32
    returns:  (Lq, D) f32,  (H, Lq, LANE) f32 attention (cols >= Lk are 0)
    """
    Lq = x_q.shape[0]
    Lk = x_kv.shape[0]

    xq = jnp.broadcast_to(x_q.astype(jnp.bfloat16)[None], (n_heads, Lq, d_model))
    xk = jnp.broadcast_to(x_kv.astype(jnp.bfloat16)[None], (n_heads, Lk, d_model))

    Q = jnp.einsum('hqd,hdk->hqk', xq, wq, preferred_element_type=jnp.float32)
    K = jnp.einsum('hkd,hdc->hkc', xk, wk, preferred_element_type=jnp.float32)
    V = jnp.einsum('hkd,hdc->hkc', xk, wv, preferred_element_type=jnp.float32)

    scores = jnp.einsum('hqc,hkc->hqk',
                        Q.astype(jnp.bfloat16), K.astype(jnp.bfloat16),
                        preferred_element_type=jnp.float32) * SCALE
    scores = scores + mask_add[None, :, :]              # broadcast over heads

    m = jnp.max(scores, axis=-1, keepdims=True)
    e = jnp.exp(scores - m)
    denom = jnp.sum(e, axis=-1, keepdims=True)
    attn = e * pl.reciprocal(denom, approx=True)        # (H, Lq, Lk) f32

    ctx = jnp.einsum('hqk,hkc->hqc',
                     attn.astype(jnp.bfloat16), V.astype(jnp.bfloat16),
                     preferred_element_type=jnp.float32)        # (H, Lq, d_v)
    out_h = jnp.einsum('hqc,hcd->hqd', ctx.astype(jnp.bfloat16), wo,
                       preferred_element_type=jnp.float32)      # (H, Lq, D)
    out = jnp.sum(out_h, axis=0) + x_q                  # merge heads + residual
    y = _layer_norm(out)

    # Lane-dense attention slab: pad Lk -> LANE via identity projection (exact).
    eye_b = jnp.broadcast_to(eye_pad[None], (n_heads, Lk, LANE))
    attn_pad = jnp.einsum('hqk,hkm->hqm', attn, eye_b,
                          preferred_element_type=jnp.float32)   # (H, Lq, LANE)
    return y, attn_pad


def _ffn_block(x, w1, w2):
    """Position-wise FFN + residual + LayerNorm.  w1: (D, d_ff), w2: (d_ff, D) bf16."""
    h = jnp.dot(x.astype(jnp.bfloat16), w1, preferred_element_type=jnp.float32)
    h = jnp.maximum(h, 0.0)
    y = jnp.dot(h.astype(jnp.bfloat16), w2, preferred_element_type=jnp.float32) + x
    return _layer_norm(y)


# ============================ fused Pallas kernel ============================

def transformer_kernel(
        x_enc_ref, x_dec_ref, enc_mask_ref, self_mask_ref, cross_mask_ref,
        e_wq_ref, e_wk_ref, e_wv_ref, e_wo_ref, e_w1_ref, e_w2_ref,
        s_wq_ref, s_wk_ref, s_wv_ref, s_wo_ref,
        c_wq_ref, c_wk_ref, c_wv_ref, c_wo_ref,
        proj_ref,
        logits_ref, enc_attn_ref, dec_self_attn_ref, dec_cross_attn_ref):
    """Whole Transformer forward for one batch element (grid axis = batch)."""
    Ls = x_enc_ref.shape[1]
    Lt = x_dec_ref.shape[1]
    eye_s = _pad_eye(Ls)
    eye_t = _pad_eye(Lt)

    # ------------------------------ Encoder ---------------------------------
    x = x_enc_ref[0]                                   # (Ls, D) f32
    enc_mask = enc_mask_ref[0]                         # (Ls, Ls) f32 additive
    for l in range(n_layers):
        x, a = _mha_block(x, x, enc_mask,
                          e_wq_ref[l], e_wk_ref[l], e_wv_ref[l], e_wo_ref[l],
                          eye_s)
        x = _ffn_block(x, e_w1_ref[l], e_w2_ref[l])
        enc_attn_ref[0, l] = a                         # full (H, Ls, LANE) store
    enc_out = x

    # ---------------- Decoder (reference skips pos_ffn) ---------------------
    y = x_dec_ref[0]                                   # (Lt, D) f32
    self_mask = self_mask_ref[0]                       # (Lt, Lt)
    cross_mask = cross_mask_ref[0]                     # (Lt, Ls)
    for l in range(n_layers):
        y, sa = _mha_block(y, y, self_mask,
                           s_wq_ref[l], s_wk_ref[l], s_wv_ref[l], s_wo_ref[l],
                           eye_t)
        dec_self_attn_ref[0, l] = sa
        y, ca = _mha_block(y, enc_out, cross_mask,
                           c_wq_ref[l], c_wk_ref[l], c_wv_ref[l], c_wo_ref[l],
                           eye_s)
        dec_cross_attn_ref[0, l] = ca

    # ----------------- Projection (vocab padded to 128 lanes) ---------------
    logits_ref[0] = jnp.dot(y.astype(jnp.bfloat16), proj_ref[...],
                            preferred_element_type=jnp.float32)


# ============================ glue (plain JAX) ==============================

def get_sinusoid_encoding_table(n_position, dm):
    pos = np.arange(n_position)[:, None]
    hid = np.arange(dm)[None, :]
    angle = pos / np.power(10000, 2 * (hid // 2) / dm)
    table = np.zeros((n_position, dm), dtype=np.float64)
    table[:, 0::2] = np.sin(angle[:, 0::2])
    table[:, 1::2] = np.cos(angle[:, 1::2])
    return jnp.asarray(table, dtype=jnp.float32)


def get_attn_pad_mask(seq_q, seq_k):
    B, Lq = seq_q.shape
    Lk = seq_k.shape[1]
    pad = (seq_k == 0)[:, None, :]                       # (B, 1, Lk) bool
    return jnp.broadcast_to(pad, (B, Lq, Lk))


def get_attn_subsequence_mask(seq):
    B, L = seq.shape
    sub = jnp.triu(jnp.ones((L, L), dtype=jnp.int32), k=1)
    return jnp.broadcast_to(sub[None], (B, L, L))


def _additive(mask_bool):
    return jnp.where(mask_bool, jnp.float32(-1e9), jnp.float32(0.0)).astype(jnp.float32)


def init_params(key):
    def linear(k, fan_in, fan_out):
        bound = 1.0 / math.sqrt(fan_in)
        return jax.random.uniform(k, (fan_in, fan_out), jnp.float32,
                                  minval=-bound, maxval=bound)

    keys = iter(jax.random.split(key, 256))

    def qkv_stack():   # (n_layers, H, D, d_k) bf16, weights stored (in, out)
        ws = [linear(next(keys), d_model, n_heads * d_k) for _ in range(n_layers)]
        return jnp.stack([jnp.transpose(w.reshape(d_model, n_heads, d_k), (1, 0, 2))
                          for w in ws]).astype(jnp.bfloat16)

    def out_stack():   # (n_layers, H, d_v, D) bf16
        ws = [linear(next(keys), n_heads * d_v, d_model) for _ in range(n_layers)]
        return jnp.stack([w.reshape(n_heads, d_v, d_model) for w in ws]).astype(jnp.bfloat16)

    def plain_stack(fan_in, fan_out):
        ws = [linear(next(keys), fan_in, fan_out) for _ in range(n_layers)]
        return jnp.stack(ws).astype(jnp.bfloat16)

    proj = linear(next(keys), d_model, tgt_vocab_size)
    proj_pad = jnp.zeros((d_model, V_PAD), jnp.float32
                         ).at[:, :tgt_vocab_size].set(proj).astype(jnp.bfloat16)

    params = {
        "src_emb": jax.random.normal(next(keys), (src_vocab_size, d_model), jnp.float32),
        "tgt_emb": jax.random.normal(next(keys), (tgt_vocab_size, d_model), jnp.float32),
        "src_pos": get_sinusoid_encoding_table(src_vocab_size, d_model),
        "tgt_pos": get_sinusoid_encoding_table(tgt_vocab_size, d_model),
        "enc_wq": qkv_stack(), "enc_wk": qkv_stack(), "enc_wv": qkv_stack(),
        "enc_wo": out_stack(),
        "enc_w1": plain_stack(d_model, d_ff), "enc_w2": plain_stack(d_ff, d_model),
        "dec_s_wq": qkv_stack(), "dec_s_wk": qkv_stack(), "dec_s_wv": qkv_stack(),
        "dec_s_wo": out_stack(),
        "dec_c_wq": qkv_stack(), "dec_c_wk": qkv_stack(), "dec_c_wv": qkv_stack(),
        "dec_c_wo": out_stack(),
        "proj": proj_pad,
    }
    return params


@jax.jit
def transformer_forward(params, enc_inputs, dec_inputs):
    B, Ls = enc_inputs.shape
    _, Lt = dec_inputs.shape

    # Embeddings (positional table indexed by token id, as in the reference).
    x_enc = params["src_emb"][enc_inputs] + params["src_pos"][enc_inputs]
    x_dec = params["tgt_emb"][dec_inputs] + params["tgt_pos"][dec_inputs]

    # Additive float masks (0 / -1e9), precomputed once, broadcast over heads
    # inside the kernel.
    enc_mask = _additive(get_attn_pad_mask(enc_inputs, enc_inputs))
    self_bool = get_attn_pad_mask(dec_inputs, dec_inputs) | \
        (get_attn_subsequence_mask(dec_inputs) > 0)
    self_mask = _additive(self_bool)
    cross_mask = _additive(get_attn_pad_mask(dec_inputs, enc_inputs))

    def full_spec(arr):
        return pl.BlockSpec(arr.shape, lambda b, n=arr.ndim: (0,) * n)

    weight_names = ["enc_wq", "enc_wk", "enc_wv", "enc_wo", "enc_w1", "enc_w2",
                    "dec_s_wq", "dec_s_wk", "dec_s_wv", "dec_s_wo",
                    "dec_c_wq", "dec_c_wk", "dec_c_wv", "dec_c_wo", "proj"]
    weights = [params[n] for n in weight_names]

    in_specs = [
        pl.BlockSpec((1, Ls, d_model), lambda b: (b, 0, 0)),
        pl.BlockSpec((1, Lt, d_model), lambda b: (b, 0, 0)),
        pl.BlockSpec((1, Ls, Ls), lambda b: (b, 0, 0)),
        pl.BlockSpec((1, Lt, Lt), lambda b: (b, 0, 0)),
        pl.BlockSpec((1, Lt, Ls), lambda b: (b, 0, 0)),
    ] + [full_spec(w) for w in weights]

    out_shapes = (
        jax.ShapeDtypeStruct((B, Lt, V_PAD), jnp.float32),
        jax.ShapeDtypeStruct((B, n_layers, n_heads, Ls, LANE), jnp.float32),
        jax.ShapeDtypeStruct((B, n_layers, n_heads, Lt, LANE), jnp.float32),
        jax.ShapeDtypeStruct((B, n_layers, n_heads, Lt, LANE), jnp.float32),
    )
    out_specs = (
        pl.BlockSpec((1, Lt, V_PAD), lambda b: (b, 0, 0)),
        pl.BlockSpec((1, n_layers, n_heads, Ls, LANE), lambda b: (b, 0, 0, 0, 0)),
        pl.BlockSpec((1, n_layers, n_heads, Lt, LANE), lambda b: (b, 0, 0, 0, 0)),
        pl.BlockSpec((1, n_layers, n_heads, Lt, LANE), lambda b: (b, 0, 0, 0, 0)),
    )

    logits_pad, enc_attn, dec_self_attn, dec_cross_attn = pl.pallas_call(
        transformer_kernel,
        out_shape=out_shapes,
        grid=(B,),
        in_specs=in_specs,
        out_specs=out_specs,
        compiler_params=pltpu.CompilerParams(
            dimension_semantics=("parallel",)),
    )(x_enc, x_dec, enc_mask, self_mask, cross_mask, *weights)

    logits = logits_pad[:, :, :tgt_vocab_size].reshape(B * Lt, tgt_vocab_size)
    enc_self_attns = [enc_attn[:, l, :, :, :Ls] for l in range(n_layers)]
    dec_self_attns = [dec_self_attn[:, l, :, :, :Lt] for l in range(n_layers)]
    dec_enc_attns = [dec_cross_attn[:, l, :, :, :Ls] for l in range(n_layers)]
    return logits, enc_self_attns, dec_self_attns, dec_enc_attns


# ================================== main ====================================

if __name__ == "__main__":
    key = jax.random.PRNGKey(0)
    k_p, k_e, k_d = jax.random.split(key, 3)

    batch = 2
    src_len = 8
    tgt_len = 8

    params = init_params(k_p)
    enc_inputs = jax.random.randint(k_e, (batch, src_len), 1, src_vocab_size,
                                    dtype=jnp.int32)
    dec_inputs = jax.random.randint(k_d, (batch, tgt_len), 1, tgt_vocab_size,
                                    dtype=jnp.int32)
    # introduce padding tokens (id 0) so the pad masks are exercised
    enc_inputs = enc_inputs.at[:, -2:].set(0)
    dec_inputs = dec_inputs.at[:, -1:].set(0)

    logits, enc_attns, dec_self_attns, dec_enc_attns = transformer_forward(
        params, enc_inputs, dec_inputs)
    jax.block_until_ready(logits)
    jax.block_until_ready(enc_attns[-1])
    jax.block_until_ready(dec_self_attns[-1])
    jax.block_until_ready(dec_enc_attns[-1])

    assert logits.shape == (batch * tgt_len, tgt_vocab_size)
    assert enc_attns[0].shape == (batch, n_heads, src_len, src_len)
    assert dec_self_attns[0].shape == (batch, n_heads, tgt_len, tgt_len)
    assert dec_enc_attns[0].shape == (batch, n_heads, tgt_len, src_len)
    assert bool(jnp.all(jnp.isfinite(logits)))
    assert bool(jnp.all(jnp.isfinite(enc_attns[-1])))
    print("KERNEL_OK")
</pallas_src>

<mosaic_0001>
module attributes {stable_mosaic.version = 11 : i64} {
  func.func @transformer_kernel(%arg0: i32, %arg1: memref<1x8x128xf32, #tpu.memory_space<vmem>>, %arg2: memref<1x8x128xf32, #tpu.memory_space<vmem>>, %arg3: memref<1x8x8xf32, #tpu.memory_space<vmem>>, %arg4: memref<1x8x8xf32, #tpu.memory_space<vmem>>, %arg5: memref<1x8x8xf32, #tpu.memory_space<vmem>>, %arg6: memref<2x4x128x32xbf16, #tpu.memory_space<vmem>>, %arg7: memref<2x4x128x32xbf16, #tpu.memory_space<vmem>>, %arg8: memref<2x4x128x32xbf16, #tpu.memory_space<vmem>>, %arg9: memref<2x4x32x128xbf16, #tpu.memory_space<vmem>>, %arg10: memref<2x128x256xbf16, #tpu.memory_space<vmem>>, %arg11: memref<2x256x128xbf16, #tpu.memory_space<vmem>>, %arg12: memref<2x4x128x32xbf16, #tpu.memory_space<vmem>>, %arg13: memref<2x4x128x32xbf16, #tpu.memory_space<vmem>>, %arg14: memref<2x4x128x32xbf16, #tpu.memory_space<vmem>>, %arg15: memref<2x4x32x128xbf16, #tpu.memory_space<vmem>>, %arg16: memref<2x4x128x32xbf16, #tpu.memory_space<vmem>>, %arg17: memref<2x4x128x32xbf16, #tpu.memory_space<vmem>>, %arg18: memref<2x4x128x32xbf16, #tpu.memory_space<vmem>>, %arg19: memref<2x4x32x128xbf16, #tpu.memory_space<vmem>>, %arg20: memref<128x128xbf16, #tpu.memory_space<vmem>>, %arg21: memref<1x8x128xf32, #tpu.memory_space<vmem>>, %arg22: memref<1x2x4x8x128xf32, #tpu.memory_space<vmem>>, %arg23: memref<1x2x4x8x128xf32, #tpu.memory_space<vmem>>, %arg24: memref<1x2x4x8x128xf32, #tpu.memory_space<vmem>>) attributes {dimension_semantics = [#tpu.dimension_semantics<parallel>], iteration_bounds = array<i64: 2>, scalar_prefetch = 0 : i64, scratch_operands = 0 : i64, tpu.core_type = #tpu.core_type<tc>, window_params = [{transform_indices = @transform_0, window_bounds = array<i64: 1, 8, 128>}, {transform_indices = @transform_1, window_bounds = array<i64: 1, 8, 128>}, {transform_indices = @transform_2, window_bounds = array<i64: 1, 8, 8>}, {transform_indices = @transform_3, window_bounds = array<i64: 1, 8, 8>}, {transform_indices = @transform_4, window_bounds = array<i64: 1, 8, 8>}, {pipeline_mode = #tpu.pipeline_mode<synchronous>, transform_indices = @transform_5, window_bounds = array<i64: 2, 4, 128, 32>}, {pipeline_mode = #tpu.pipeline_mode<synchronous>, transform_indices = @transform_6, window_bounds = array<i64: 2, 4, 128, 32>}, {pipeline_mode = #tpu.pipeline_mode<synchronous>, transform_indices = @transform_7, window_bounds = array<i64: 2, 4, 128, 32>}, {pipeline_mode = #tpu.pipeline_mode<synchronous>, transform_indices = @transform_8, window_bounds = array<i64: 2, 4, 32, 128>}, {pipeline_mode = #tpu.pipeline_mode<synchronous>, transform_indices = @transform_9, window_bounds = array<i64: 2, 128, 256>}, {pipeline_mode = #tpu.pipeline_mode<synchronous>, transform_indices = @transform_10, window_bounds = array<i64: 2, 256, 128>}, {pipeline_mode = #tpu.pipeline_mode<synchronous>, transform_indices = @transform_11, window_bounds = array<i64: 2, 4, 128, 32>}, {pipeline_mode = #tpu.pipeline_mode<synchronous>, transform_indices = @transform_12, window_bounds = array<i64: 2, 4, 128, 32>}, {pipeline_mode = #tpu.pipeline_mode<synchronous>, transform_indices = @transform_13, window_bounds = array<i64: 2, 4, 128, 32>}, {pipeline_mode = #tpu.pipeline_mode<synchronous>, transform_indices = @transform_14, window_bounds = array<i64: 2, 4, 32, 128>}, {pipeline_mode = #tpu.pipeline_mode<synchronous>, transform_indices = @transform_15, window_bounds = array<i64: 2, 4, 128, 32>}, {pipeline_mode = #tpu.pipeline_mode<synchronous>, transform_indices = @transform_16, window_bounds = array<i64: 2, 4, 128, 32>}, {pipeline_mode = #tpu.pipeline_mode<synchronous>, transform_indices = @transform_17, window_bounds = array<i64: 2, 4, 128, 32>}, {pipeline_mode = #tpu.pipeline_mode<synchronous>, transform_indices = @transform_18, window_bounds = array<i64: 2, 4, 32, 128>}, {pipeline_mode = #tpu.pipeline_mode<synchronous>, transform_indices = @transform_19, window_bounds = array<i64: 128, 128>}, {transform_indices = @transform_20, window_bounds = array<i64: 1, 8, 128>}, {transform_indices = @transform_21, window_bounds = array<i64: 1, 2, 4, 8, 128>}, {transform_indices = @transform_22, window_bounds = array<i64: 1, 2, 4, 8, 128>}, {transform_indices = @transform_23, window_bounds = array<i64: 1, 2, 4, 8, 128>}]} {
    %0 = tpu.iota {dimensions = array<i32: 0>} : vector<8x128xi32>
    %1 = tpu.iota {dimensions = array<i32: 1>} : vector<8x128xi32>
    %2 = arith.cmpi eq, %0, %1 : vector<8x128xi32>
    %3 = arith.extui %2 : vector<8x128xi1> to vector<8x128xi32>
    %4 = arith.sitofp %3 : vector<8x128xi32> to vector<8x128xf32>
    %5 = tpu.iota {dimensions = array<i32: 0>} : vector<8x128xi32>
    %6 = tpu.iota {dimensions = array<i32: 1>} : vector<8x128xi32>
    %7 = arith.cmpi eq, %5, %6 : vector<8x128xi32>
    %8 = arith.extui %7 : vector<8x128xi1> to vector<8x128xi32>
    %9 = arith.sitofp %8 : vector<8x128xi32> to vector<8x128xf32>
    %c0 = arith.constant 0 : index
    %c0_0 = arith.constant 0 : index
    %c0_1 = arith.constant 0 : index
    %10 = vector.load %arg1[%c0, %c0_0, %c0_1] : memref<1x8x128xf32, #tpu.memory_space<vmem>>, vector<1x8x128xf32>
    %11 = vector.shape_cast %10 : vector<1x8x128xf32> to vector<8x128xf32>
    %c0_2 = arith.constant 0 : index
    %c0_3 = arith.constant 0 : index
    %c0_4 = arith.constant 0 : index
    %12 = vector.load %arg3[%c0_2, %c0_3, %c0_4] : memref<1x8x8xf32, #tpu.memory_space<vmem>>, vector<1x8x8xf32>
    %13 = vector.shape_cast %12 : vector<1x8x8xf32> to vector<8x8xf32>
    %c0_5 = arith.constant 0 : index
    %c0_6 = arith.constant 0 : index
    %c0_7 = arith.constant 0 : index
    %c0_8 = arith.constant 0 : index
    %14 = vector.load %arg6[%c0_5, %c0_6, %c0_7, %c0_8] : memref<2x4x128x32xbf16, #tpu.memory_space<vmem>>, vector<1x4x128x32xbf16>
    %15 = vector.shape_cast %14 : vector<1x4x128x32xbf16> to vector<4x128x32xbf16>
    %c0_9 = arith.constant 0 : index
    %c0_10 = arith.constant 0 : index
    %c0_11 = arith.constant 0 : index
    %c0_12 = arith.constant 0 : index
    %16 = vector.load %arg7[%c0_9, %c0_10, %c0_11, %c0_12] : memref<2x4x128x32xbf16, #tpu.memory_space<vmem>>, vector<1x4x128x32xbf16>
    %17 = vector.shape_cast %16 : vector<1x4x128x32xbf16> to vector<4x128x32xbf16>
    %c0_13 = arith.constant 0 : index
    %c0_14 = arith.constant 0 : index
    %c0_15 = arith.constant 0 : index
    %c0_16 = arith.constant 0 : index
    %18 = vector.load %arg8[%c0_13, %c0_14, %c0_15, %c0_16] : memref<2x4x128x32xbf16, #tpu.memory_space<vmem>>, vector<1x4x128x32xbf16>
    %19 = vector.shape_cast %18 : vector<1x4x128x32xbf16> to vector<4x128x32xbf16>
    %c0_17 = arith.constant 0 : index
    %c0_18 = arith.constant 0 : index
    %c0_19 = arith.constant 0 : index
    %c0_20 = arith.constant 0 : index
    %20 = vector.load %arg9[%c0_17, %c0_18, %c0_19, %c0_20] : memref<2x4x32x128xbf16, #tpu.memory_space<vmem>>, vector<1x4x32x128xbf16>
    %21 = vector.shape_cast %20 : vector<1x4x32x128xbf16> to vector<4x32x128xbf16>
    %22 = arith.truncf %11 : vector<8x128xf32> to vector<8x128xbf16>
    %23 = vector.shape_cast %22 : vector<8x128xbf16> to vector<1x8x128xbf16>
    %24 = vector.shape_cast %23 : vector<1x8x128xbf16> to vector<1x8x128xbf16>
    %25 = vector.broadcast %24 : vector<1x8x128xbf16> to vector<4x8x128xbf16>
    %26 = arith.truncf %11 : vector<8x128xf32> to vector<8x128xbf16>
    %27 = vector.shape_cast %26 : vector<8x128xbf16> to vector<1x8x128xbf16>
    %28 = vector.shape_cast %27 : vector<1x8x128xbf16> to vector<1x8x128xbf16>
    %29 = vector.broadcast %28 : vector<1x8x128xbf16> to vector<4x8x128xbf16>
    "tpu.trace_start"() <{level = 10 : i32, message = "hqd,hdk->hqk"}> : () -> ()
    %cst = arith.constant dense<0.000000e+00> : vector<4x8x32xf32>
    %30 = tpu.matmul %25, %15, %cst {dimension_numbers = #tpu.dot_dimension_numbers<[2], [1], [1], [2], [0, 0, 0, 1, 1, 2], [0], [0]>} : vector<4x8x128xbf16>, vector<4x128x32xbf16>, vector<4x8x32xf32> -> vector<4x8x32xf32>
    "tpu.trace_stop"() : () -> ()
    "tpu.trace_start"() <{level = 10 : i32, message = "hkd,hdc->hkc"}> : () -> ()
    %cst_21 = arith.constant dense<0.000000e+00> : vector<4x8x32xf32>
    %31 = tpu.matmul %29, %17, %cst_21 {dimension_numbers = #tpu.dot_dimension_numbers<[2], [1], [1], [2], [0, 0, 0, 1, 1, 2], [0], [0]>} : vector<4x8x128xbf16>, vector<4x128x32xbf16>, vector<4x8x32xf32> -> vector<4x8x32xf32>
    %cst_22 = arith.constant dense<0.000000e+00> : vector<4x8x32xf32>
    %32 = tpu.matmul %29, %19, %cst_22 {dimension_numbers = #tpu.dot_dimension_numbers<[2], [1], [1], [2], [0, 0, 0, 1, 1, 2], [0], [0]>} : vector<4x8x128xbf16>, vector<4x128x32xbf16>, vector<4x8x32xf32> -> vector<4x8x32xf32>
    "tpu.trace_stop"() : () -> ()
    %33 = arith.truncf %30 : vector<4x8x32xf32> to vector<4x8x32xbf16>
    %34 = arith.truncf %31 : vector<4x8x32xf32> to vector<4x8x32xbf16>
    "tpu.trace_start"() <{level = 10 : i32, message = "hqc,hkc->hqk"}> : () -> ()
    %cst_23 = arith.constant dense<0.000000e+00> : vector<4x8x8xf32>
    %35 = tpu.matmul %33, %34, %cst_23 {dimension_numbers = #tpu.dot_dimension_numbers<[2], [2], [1], [1], [0, 0, 0, 1, 1, 1], [0], [0]>} : vector<4x8x32xbf16>, vector<4x8x32xbf16>, vector<4x8x8xf32> -> vector<4x8x8xf32>
    "tpu.trace_stop"() : () -> ()
    %cst_24 = arith.constant 0.176776692 : f32
    %36 = vector.broadcast %cst_24 : f32 to vector<4x8x8xf32>
    %37 = arith.mulf %35, %36 : vector<4x8x8xf32>
    %38 = vector.shape_cast %13 : vector<8x8xf32> to vector<1x8x8xf32>
    %39 = vector.broadcast %38 : vector<1x8x8xf32> to vector<4x8x8xf32>
    %40 = arith.addf %37, %39 : vector<4x8x8xf32>
    %cst_25 = arith.constant dense<0xFF800000> : vector<4x8xf32>
    %41 = vector.multi_reduction <maximumf>, %40, %cst_25 [2] : vector<4x8x8xf32> to vector<4x8xf32>
    %42 = vector.shape_cast %41 : vector<4x8xf32> to vector<4x8x1xf32>
    %43 = vector.broadcast %42 : vector<4x8x1xf32> to vector<4x8x8xf32>
    %44 = arith.subf %40, %43 : vector<4x8x8xf32>
    %45 = math.exp %44 : vector<4x8x8xf32>
    %cst_26 = arith.constant dense<0.000000e+00> : vector<4x8xf32>
    %46 = vector.multi_reduction <add>, %45, %cst_26 [2] : vector<4x8x8xf32> to vector<4x8xf32>
    %47 = vector.shape_cast %46 : vector<4x8xf32> to vector<4x8x1xf32>
    %48 = tpu.reciprocal %47 {approx = true} : vector<4x8x1xf32> -> vector<4x8x1xf32>
    %49 = vector.broadcast %48 : vector<4x8x1xf32> to vector<4x8x8xf32>
    %50 = arith.mulf %45, %49 : vector<4x8x8xf32>
    %51 = arith.truncf %50 : vector<4x8x8xf32> to vector<4x8x8xbf16>
    %52 = arith.truncf %32 : vector<4x8x32xf32> to vector<4x8x32xbf16>
    "tpu.trace_start"() <{level = 10 : i32, message = "hqk,hkc->hqc"}> : () -> ()
    %cst_27 = arith.constant dense<0.000000e+00> : vector<4x8x32xf32>
    %53 = tpu.matmul %51, %52, %cst_27 {dimension_numbers = #tpu.dot_dimension_numbers<[2], [1], [1], [2], [0, 0, 0, 1, 1, 2], [0], [0]>} : vector<4x8x8xbf16>, vector<4x8x32xbf16>, vector<4x8x32xf32> -> vector<4x8x32xf32>
    "tpu.trace_stop"() : () -> ()
    %54 = arith.truncf %53 : vector<4x8x32xf32> to vector<4x8x32xbf16>
    "tpu.trace_start"() <{level = 10 : i32, message = "hqc,hcd->hqd"}> : () -> ()
    %cst_28 = arith.constant dense<0.000000e+00> : vector<4x8x128xf32>
    %55 = tpu.matmul %54, %21, %cst_28 {dimension_numbers = #tpu.dot_dimension_numbers<[2], [1], [1], [2], [0, 0, 0, 1, 1, 2], [0], [0]>} : vector<4x8x32xbf16>, vector<4x32x128xbf16>, vector<4x8x128xf32> -> vector<4x8x128xf32>
    "tpu.trace_stop"() : () -> ()
    %cst_29 = arith.constant dense<0.000000e+00> : vector<8x128xf32>
    %56 = vector.multi_reduction <add>, %55, %cst_29 [0] : vector<4x8x128xf32> to vector<8x128xf32>
    %57 = arith.addf %56, %11 : vector<8x128xf32>
    %cst_30 = arith.constant dense<0.000000e+00> : vector<8xf32>
    %58 = vector.multi_reduction <add>, %57, %cst_30 [1] : vector<8x128xf32> to vector<8xf32>
    %59 = vector.shape_cast %58 : vector<8xf32> to vector<8x1xf32>
    %cst_31 = arith.constant 1.280000e+02 : f32
    %60 = vector.broadcast %cst_31 : f32 to vector<8x1xf32>
    %61 = arith.divf %59, %60 : vector<8x1xf32>
    %62 = vector.broadcast %61 : vector<8x1xf32> to vector<8x128xf32>
    %63 = arith.subf %57, %62 : vector<8x128xf32>
    %64 = arith.mulf %63, %63 : vector<8x128xf32>
    %cst_32 = arith.constant dense<0.000000e+00> : vector<8xf32>
    %65 = vector.multi_reduction <add>, %64, %cst_32 [1] : vector<8x128xf32> to vector<8xf32>
    %66 = vector.shape_cast %65 : vector<8xf32> to vector<8x1xf32>
    %cst_33 = arith.constant 1.280000e+02 : f32
    %67 = vector.broadcast %cst_33 : f32 to vector<8x1xf32>
    %68 = arith.divf %66, %67 : vector<8x1xf32>
    %cst_34 = arith.constant 9.99999974E-6 : f32
    %69 = vector.broadcast %cst_34 : f32 to vector<8x1xf32>
    %70 = arith.addf %68, %69 : vector<8x1xf32>
    %71 = math.rsqrt %70 : vector<8x1xf32>
    %72 = vector.broadcast %71 : vector<8x1xf32> to vector<8x128xf32>
    %73 = arith.mulf %63, %72 : vector<8x128xf32>
    %74 = vector.shape_cast %4 : vector<8x128xf32> to vector<1x8x128xf32>
    %75 = vector.shape_cast %74 : vector<1x8x128xf32> to vector<1x8x128xf32>
    %76 = vector.broadcast %75 : vector<1x8x128xf32> to vector<4x8x128xf32>
    "tpu.trace_start"() <{level = 10 : i32, message = "hqk,hkm->hqm"}> : () -> ()
    %cst_35 = arith.constant dense<0.000000e+00> : vector<4x8x128xf32>
    %77 = tpu.matmul %50, %76, %cst_35 {dimension_numbers = #tpu.dot_dimension_numbers<[2], [1], [1], [2], [0, 0, 0, 1, 1, 2], [0], [0]>} : vector<4x8x8xf32>, vector<4x8x128xf32>, vector<4x8x128xf32> -> vector<4x8x128xf32>
    "tpu.trace_stop"() : () -> ()
    %c0_36 = arith.constant 0 : index
    %c0_37 = arith.constant 0 : index
    %c0_38 = arith.constant 0 : index
    %78 = vector.load %arg10[%c0_36, %c0_37, %c0_38] : memref<2x128x256xbf16, #tpu.memory_space<vmem>>, vector<1x128x256xbf16>
    %79 = vector.shape_cast %78 : vector<1x128x256xbf16> to vector<128x256xbf16>
    %c0_39 = arith.constant 0 : index
    %c0_40 = arith.constant 0 : index
    %c0_41 = arith.constant 0 : index
    %80 = vector.load %arg11[%c0_39, %c0_40, %c0_41] : memref<2x256x128xbf16, #tpu.memory_space<vmem>>, vector<1x256x128xbf16>
    %81 = vector.shape_cast %80 : vector<1x256x128xbf16> to vector<256x128xbf16>
    %82 = arith.truncf %73 : vector<8x128xf32> to vector<8x128xbf16>
    %cst_42 = arith.constant dense<0.000000e+00> : vector<8x256xf32>
    %83 = tpu.matmul %82, %79, %cst_42 {dimension_numbers = #tpu.dot_dimension_numbers<[1], [0], [0], [1], [0, 0, 1, 1], [], []>} : vector<8x128xbf16>, vector<128x256xbf16>, vector<8x256xf32> -> vector<8x256xf32>
    %cst_43 = arith.constant 0.000000e+00 : f32
    %84 = vector.broadcast %cst_43 : f32 to vector<8x256xf32>
    %85 = arith.maximumf %83, %84 : vector<8x256xf32>
    %86 = arith.truncf %85 : vector<8x256xf32> to vector<8x256xbf16>
    %cst_44 = arith.constant dense<0.000000e+00> : vector<8x128xf32>
    %87 = tpu.matmul %86, %81, %cst_44 {dimension_numbers = #tpu.dot_dimension_numbers<[1], [0], [0], [1], [0, 0, 1, 1], [], []>} : vector<8x256xbf16>, vector<256x128xbf16>, vector<8x128xf32> -> vector<8x128xf32>
    %88 = arith.addf %87, %73 : vector<8x128xf32>
    %cst_45 = arith.constant dense<0.000000e+00> : vector<8xf32>
    %89 = vector.multi_reduction <add>, %88, %cst_45 [1] : vector<8x128xf32> to vector<8xf32>
    %90 = vector.shape_cast %89 : vector<8xf32> to vector<8x1xf32>
    %cst_46 = arith.constant 1.280000e+02 : f32
    %91 = vector.broadcast %cst_46 : f32 to vector<8x1xf32>
    %92 = arith.divf %90, %91 : vector<8x1xf32>
    %93 = vector.broadcast %92 : vector<8x1xf32> to vector<8x128xf32>
    %94 = arith.subf %88, %93 : vector<8x128xf32>
    %95 = arith.mulf %94, %94 : vector<8x128xf32>
    %cst_47 = arith.constant dense<0.000000e+00> : vector<8xf32>
    %96 = vector.multi_reduction <add>, %95, %cst_47 [1] : vector<8x128xf32> to vector<8xf32>
    %97 = vector.shape_cast %96 : vector<8xf32> to vector<8x1xf32>
    %cst_48 = arith.constant 1.280000e+02 : f32
    %98 = vector.broadcast %cst_48 : f32 to vector<8x1xf32>
    %99 = arith.divf %97, %98 : vector<8x1xf32>
    %cst_49 = arith.constant 9.99999974E-6 : f32
    %100 = vector.broadcast %cst_49 : f32 to vector<8x1xf32>
    %101 = arith.addf %99, %100 : vector<8x1xf32>
    %102 = math.rsqrt %101 : vector<8x1xf32>
    %103 = vector.broadcast %102 : vector<8x1xf32> to vector<8x128xf32>
    %104 = arith.mulf %94, %103 : vector<8x128xf32>
    %c0_50 = arith.constant 0 : index
    %c0_51 = arith.constant 0 : index
    %c0_52 = arith.constant 0 : index
    %c0_53 = arith.constant 0 : index
    %c0_54 = arith.constant 0 : index
    %105 = vector.load %arg22[%c0_50, %c0_51, %c0_52, %c0_53, %c0_54] : memref<1x2x4x8x128xf32, #tpu.memory_space<vmem>>, vector<1x1x4x8x128xf32>
    %106 = vector.shape_cast %105 : vector<1x1x4x8x128xf32> to vector<4x8x128xf32>
    %107 = vector.shape_cast %77 : vector<4x8x128xf32> to vector<1x1x4x8x128xf32>
    tpu.vector_store %arg22[%c0_50, %c0_51, %c0_52, %c0_53, %c0_54], %107 {strides = array<i32>} : memref<1x2x4x8x128xf32, #tpu.memory_space<vmem>>, vector<1x1x4x8x128xf32>,
    %c1 = arith.constant 1 : index
    %c0_55 = arith.constant 0 : index
    %c0_56 = arith.constant 0 : index
    %c0_57 = arith.constant 0 : index
    %108 = vector.load %arg6[%c1, %c0_55, %c0_56, %c0_57] : memref<2x4x128x32xbf16, #tpu.memory_space<vmem>>, vector<1x4x128x32xbf16>
    %109 = vector.shape_cast %108 : vector<1x4x128x32xbf16> to vector<4x128x32xbf16>
    %c1_58 = arith.constant 1 : index
    %c0_59 = arith.constant 0 : index
    %c0_60 = arith.constant 0 : index
    %c0_61 = arith.constant 0 : index
    %110 = vector.load %arg7[%c1_58, %c0_59, %c0_60, %c0_61] : memref<2x4x128x32xbf16, #tpu.memory_space<vmem>>, vector<1x4x128x32xbf16>
    %111 = vector.shape_cast %110 : vector<1x4x128x32xbf16> to vector<4x128x32xbf16>
    %c1_62 = arith.constant 1 : index
    %c0_63 = arith.constant 0 : index
    %c0_64 = arith.constant 0 : index
    %c0_65 = arith.constant 0 : index
    %112 = vector.load %arg8[%c1_62, %c0_63, %c0_64, %c0_65] : memref<2x4x128x32xbf16, #tpu.memory_space<vmem>>, vector<1x4x128x32xbf16>
    %113 = vector.shape_cast %112 : vector<1x4x128x32xbf16> to vector<4x128x32xbf16>
    %c1_66 = arith.constant 1 : index
    %c0_67 = arith.constant 0 : index
    %c0_68 = arith.constant 0 : index
    %c0_69 = arith.constant 0 : index
    %114 = vector.load %arg9[%c1_66, %c0_67, %c0_68, %c0_69] : memref<2x4x32x128xbf16, #tpu.memory_space<vmem>>, vector<1x4x32x128xbf16>
    %115 = vector.shape_cast %114 : vector<1x4x32x128xbf16> to vector<4x32x128xbf16>
    %116 = arith.truncf %104 : vector<8x128xf32> to vector<8x128xbf16>
    %117 = vector.shape_cast %116 : vector<8x128xbf16> to vector<1x8x128xbf16>
    %118 = vector.shape_cast %117 : vector<1x8x128xbf16> to vector<1x8x128xbf16>
    %119 = vector.broadcast %118 : vector<1x8x128xbf16> to vector<4x8x128xbf16>
    %120 = arith.truncf %104 : vector<8x128xf32> to vector<8x128xbf16>
    %121 = vector.shape_cast %120 : vector<8x128xbf16> to vector<1x8x128xbf16>
    %122 = vector.shape_cast %121 : vector<1x8x128xbf16> to vector<1x8x128xbf16>
    %123 = vector.broadcast %122 : vector<1x8x128xbf16> to vector<4x8x128xbf16>
    "tpu.trace_start"() <{level = 10 : i32, message = "hqd,hdk->hqk"}> : () -> ()
    %cst_70 = arith.constant dense<0.000000e+00> : vector<4x8x32xf32>
    %124 = tpu.matmul %119, %109, %cst_70 {dimension_numbers = #tpu.dot_dimension_numbers<[2], [1], [1], [2], [0, 0, 0, 1, 1, 2], [0], [0]>} : vector<4x8x128xbf16>, vector<4x128x32xbf16>, vector<4x8x32xf32> -> vector<4x8x32xf32>
    "tpu.trace_stop"() : () -> ()
    "tpu.trace_start"() <{level = 10 : i32, message = "hkd,hdc->hkc"}> : () -> ()
    %cst_71 = arith.constant dense<0.000000e+00> : vector<4x8x32xf32>
    %125 = tpu.matmul %123, %111, %cst_71 {dimension_numbers = #tpu.dot_dimension_numbers<[2], [1], [1], [2], [0, 0, 0, 1, 1, 2], [0], [0]>} : vector<4x8x128xbf16>, vector<4x128x32xbf16>, vector<4x8x32xf32> -> vector<4x8x32xf32>
    %cst_72 = arith.constant dense<0.000000e+00> : vector<4x8x32xf32>
    %126 = tpu.matmul %123, %113, %cst_72 {dimension_numbers = #tpu.dot_dimension_numbers<[2], [1], [1], [2], [0, 0, 0, 1, 1, 2], [0], [0]>} : vector<4x8x128xbf16>, vector<4x128x32xbf16>, vector<4x8x32xf32> -> vector<4x8x32xf32>
    "tpu.trace_stop"() : () -> ()
    %127 = arith.truncf %124 : vector<4x8x32xf32> to vector<4x8x32xbf16>
    %128 = arith.truncf %125 : vector<4x8x32xf32> to vector<4x8x32xbf16>
    "tpu.trace_start"() <{level = 10 : i32, message = "hqc,hkc->hqk"}> : () -> ()
    %cst_73 = arith.constant dense<0.000000e+00> : vector<4x8x8xf32>
    %129 = tpu.matmul %127, %128, %cst_73 {dimension_numbers = #tpu.dot_dimension_numbers<[2], [2], [1], [1], [0, 0, 0, 1, 1, 1], [0], [0]>} : vector<4x8x32xbf16>, vector<4x8x32xbf16>, vector<4x8x8xf32> -> vector<4x8x8xf32>
    "tpu.trace_stop"() : () -> ()
    %cst_74 = arith.constant 0.176776692 : f32
    %130 = vector.broadcast %cst_74 : f32 to vector<4x8x8xf32>
    %131 = arith.mulf %129, %130 : vector<4x8x8xf32>
    %132 = vector.shape_cast %13 : vector<8x8xf32> to vector<1x8x8xf32>
    %133 = vector.broadcast %132 : vector<1x8x8xf32> to vector<4x8x8xf32>
    %134 = arith.addf %131, %133 : vector<4x8x8xf32>
    %cst_75 = arith.constant dense<0xFF800000> : vector<4x8xf32>
    %135 = vector.multi_reduction <maximumf>, %134, %cst_75 [2] : vector<4x8x8xf32> to vector<4x8xf32>
    %136 = vector.shape_cast %135 : vector<4x8xf32> to vector<4x8x1xf32>
    %137 = vector.broadcast %136 : vector<4x8x1xf32> to vector<4x8x8xf32>
    %138 = arith.subf %134, %137 : vector<4x8x8xf32>
    %139 = math.exp %138 : vector<4x8x8xf32>
    %cst_76 = arith.constant dense<0.000000e+00> : vector<4x8xf32>
    %140 = vector.multi_reduction <add>, %139, %cst_76 [2] : vector<4x8x8xf32> to vector<4x8xf32>
    %141 = vector.shape_cast %140 : vector<4x8xf32> to vector<4x8x1xf32>
    %142 = tpu.reciprocal %141 {approx = true} : vector<4x8x1xf32> -> vector<4x8x1xf32>
    %143 = vector.broadcast %142 : vector<4x8x1xf32> to vector<4x8x8xf32>
    %144 = arith.mulf %139, %143 : vector<4x8x8xf32>
    %145 = arith.truncf %144 : vector<4x8x8xf32> to vector<4x8x8xbf16>
    %146 = arith.truncf %126 : vector<4x8x32xf32> to vector<4x8x32xbf16>
    "tpu.trace_start"() <{level = 10 : i32, message = "hqk,hkc->hqc"}> : () -> ()
    %cst_77 = arith.constant dense<0.000000e+00> : vector<4x8x32xf32>
    %147 = tpu.matmul %145, %146, %cst_77 {dimension_numbers = #tpu.dot_dimension_numbers<[2], [1], [1], [2], [0, 0, 0, 1, 1, 2], [0], [0]>} : vector<4x8x8xbf16>, vector<4x8x32xbf16>, vector<4x8x32xf32> -> vector<4x8x32xf32>
    "tpu.trace_stop"() : () -> ()
    %148 = arith.truncf %147 : vector<4x8x32xf32> to vector<4x8x32xbf16>
    "tpu.trace_start"() <{level = 10 : i32, message = "hqc,hcd->hqd"}> : () -> ()
    %cst_78 = arith.constant dense<0.000000e+00> : vector<4x8x128xf32>
    %149 = tpu.matmul %148, %115, %cst_78 {dimension_numbers = #tpu.dot_dimension_numbers<[2], [1], [1], [2], [0, 0, 0, 1, 1, 2], [0], [0]>} : vector<4x8x32xbf16>, vector<4x32x128xbf16>, vector<4x8x128xf32> -> vector<4x8x128xf32>
    "tpu.trace_stop"() : () -> ()
    %cst_79 = arith.constant dense<0.000000e+00> : vector<8x128xf32>
    %150 = vector.multi_reduction <add>, %149, %cst_79 [0] : vector<4x8x128xf32> to vector<8x128xf32>
    %151 = arith.addf %150, %104 : vector<8x128xf32>
    %cst_80 = arith.constant dense<0.000000e+00> : vector<8xf32>
    %152 = vector.multi_reduction <add>, %151, %cst_80 [1] : vector<8x128xf32> to vector<8xf32>
    %153 = vector.shape_cast %152 : vector<8xf32> to vector<8x1xf32>
    %cst_81 = arith.constant 1.280000e+02 : f32
    %154 = vector.broadcast %cst_81 : f32 to vector<8x1xf32>
    %155 = arith.divf %153, %154 : vector<8x1xf32>
    %156 = vector.broadcast %155 : vector<8x1xf32> to vector<8x128xf32>
    %157 = arith.subf %151, %156 : vector<8x128xf32>
    %158 = arith.mulf %157, %157 : vector<8x128xf32>
    %cst_82 = arith.constant dense<0.000000e+00> : vector<8xf32>
    %159 = vector.multi_reduction <add>, %158, %cst_82 [1] : vector<8x128xf32> to vector<8xf32>
    %160 = vector.shape_cast %159 : vector<8xf32> to vector<8x1xf32>
    %cst_83 = arith.constant 1.280000e+02 : f32
    %161 = vector.broadcast %cst_83 : f32 to vector<8x1xf32>
    %162 = arith.divf %160, %161 : vector<8x1xf32>
    %cst_84 = arith.constant 9.99999974E-6 : f32
    %163 = vector.broadcast %cst_84 : f32 to vector<8x1xf32>
    %164 = arith.addf %162, %163 : vector<8x1xf32>
    %165 = math.rsqrt %164 : vector<8x1xf32>
    %166 = vector.broadcast %165 : vector<8x1xf32> to vector<8x128xf32>
    %167 = arith.mulf %157, %166 : vector<8x128xf32>
    %168 = vector.shape_cast %4 : vector<8x128xf32> to vector<1x8x128xf32>
    %169 = vector.shape_cast %168 : vector<1x8x128xf32> to vector<1x8x128xf32>
    %170 = vector.broadcast %169 : vector<1x8x128xf32> to vector<4x8x128xf32>
    "tpu.trace_start"() <{level = 10 : i32, message = "hqk,hkm->hqm"}> : () -> ()
    %cst_85 = arith.constant dense<0.000000e+00> : vector<4x8x128xf32>
    %171 = tpu.matmul %144, %170, %cst_85 {dimension_numbers = #tpu.dot_dimension_numbers<[2], [1], [1], [2], [0, 0, 0, 1, 1, 2], [0], [0]>} : vector<4x8x8xf32>, vector<4x8x128xf32>, vector<4x8x128xf32> -> vector<4x8x128xf32>
    "tpu.trace_stop"() : () -> ()
    %c1_86 = arith.constant 1 : index
    %c0_87 = arith.constant 0 : index
    %c0_88 = arith.constant 0 : index
    %172 = vector.load %arg10[%c1_86, %c0_87, %c0_88] : memref<2x128x256xbf16, #tpu.memory_space<vmem>>, vector<1x128x256xbf16>
    %173 = vector.shape_cast %172 : vector<1x128x256xbf16> to vector<128x256xbf16>
    %c1_89 = arith.constant 1 : index
    %c0_90 = arith.constant 0 : index
    %c0_91 = arith.constant 0 : index
    %174 = vector.load %arg11[%c1_89, %c0_90, %c0_91] : memref<2x256x128xbf16, #tpu.memory_space<vmem>>, vector<1x256x128xbf16>
    %175 = vector.shape_cast %174 : vector<1x256x128xbf16> to vector<256x128xbf16>
    %176 = arith.truncf %167 : vector<8x128xf32> to vector<8x128xbf16>
    %cst_92 = arith.constant dense<0.000000e+00> : vector<8x256xf32>
    %177 = tpu.matmul %176, %173, %cst_92 {dimension_numbers = #tpu.dot_dimension_numbers<[1], [0], [0], [1], [0, 0, 1, 1], [], []>} : vector<8x128xbf16>, vector<128x256xbf16>, vector<8x256xf32> -> vector<8x256xf32>
    %cst_93 = arith.constant 0.000000e+00 : f32
    %178 = vector.broadcast %cst_93 : f32 to vector<8x256xf32>
    %179 = arith.maximumf %177, %178 : vector<8x256xf32>
    %180 = arith.truncf %179 : vector<8x256xf32> to vector<8x256xbf16>
    %cst_94 = arith.constant dense<0.000000e+00> : vector<8x128xf32>
    %181 = tpu.matmul %180, %175, %cst_94 {dimension_numbers = #tpu.dot_dimension_numbers<[1], [0], [0], [1], [0, 0, 1, 1], [], []>} : vector<8x256xbf16>, vector<256x128xbf16>, vector<8x128xf32> -> vector<8x128xf32>
    %182 = arith.addf %181, %167 : vector<8x128xf32>
    %cst_95 = arith.constant dense<0.000000e+00> : vector<8xf32>
    %183 = vector.multi_reduction <add>, %182, %cst_95 [1] : vector<8x128xf32> to vector<8xf32>
    %184 = vector.shape_cast %183 : vector<8xf32> to vector<8x1xf32>
    %cst_96 = arith.constant 1.280000e+02 : f32
    %185 = vector.broadcast %cst_96 : f32 to vector<8x1xf32>
    %186 = arith.divf %184, %185 : vector<8x1xf32>
    %187 = vector.broadcast %186 : vector<8x1xf32> to vector<8x128xf32>
    %188 = arith.subf %182, %187 : vector<8x128xf32>
    %189 = arith.mulf %188, %188 : vector<8x128xf32>
    %cst_97 = arith.constant dense<0.000000e+00> : vector<8xf32>
    %190 = vector.multi_reduction <add>, %189, %cst_97 [1] : vector<8x128xf32> to vector<8xf32>
    %191 = vector.shape_cast %190 : vector<8xf32> to vector<8x1xf32>
    %cst_98 = arith.constant 1.280000e+02 : f32
    %192 = vector.broadcast %cst_98 : f32 to vector<8x1xf32>
    %193 = arith.divf %191, %192 : vector<8x1xf32>
    %cst_99 = arith.constant 9.99999974E-6 : f32
    %194 = vector.broadcast %cst_99 : f32 to vector<8x1xf32>
    %195 = arith.addf %193, %194 : vector<8x1xf32>
    %196 = math.rsqrt %195 : vector<8x1xf32>
    %197 = vector.broadcast %196 : vector<8x1xf32> to vector<8x128xf32>
    %198 = arith.mulf %188, %197 : vector<8x128xf32>
    %c0_100 = arith.constant 0 : index
    %c1_101 = arith.constant 1 : index
    %c0_102 = arith.constant 0 : index
    %c0_103 = arith.constant 0 : index
    %c0_104 = arith.constant 0 : index
    %199 = vector.load %arg22[%c0_100, %c1_101, %c0_102, %c0_103, %c0_104] : memref<1x2x4x8x128xf32, #tpu.memory_space<vmem>>, vector<1x1x4x8x128xf32>
    %200 = vector.shape_cast %199 : vector<1x1x4x8x128xf32> to vector<4x8x128xf32>
    %201 = vector.shape_cast %171 : vector<4x8x128xf32> to vector<1x1x4x8x128xf32>
    tpu.vector_store %arg22[%c0_100, %c1_101, %c0_102, %c0_103, %c0_104], %201 {strides = array<i32>} : memref<1x2x4x8x128xf32, #tpu.memory_space<vmem>>, vector<1x1x4x8x128xf32>,
    %c0_105 = arith.constant 0 : index
    %c0_106 = arith.constant 0 : index
    %c0_107 = arith.constant 0 : index
    %202 = vector.load %arg2[%c0_105, %c0_106, %c0_107] : memref<1x8x128xf32, #tpu.memory_space<vmem>>, vector<1x8x128xf32>
    %203 = vector.shape_cast %202 : vector<1x8x128xf32> to vector<8x128xf32>
    %c0_108 = arith.constant 0 : index
    %c0_109 = arith.constant 0 : index
    %c0_110 = arith.constant 0 : index
    %204 = vector.load %arg4[%c0_108, %c0_109, %c0_110] : memref<1x8x8xf32, #tpu.memory_space<vmem>>, vector<1x8x8xf32>
    %205 = vector.shape_cast %204 : vector<1x8x8xf32> to vector<8x8xf32>
    %c0_111 = arith.constant 0 : index
    %c0_112 = arith.constant 0 : index
    %c0_113 = arith.constant 0 : index
    %206 = vector.load %arg5[%c0_111, %c0_112, %c0_113] : memref<1x8x8xf32, #tpu.memory_space<vmem>>, vector<1x8x8xf32>
    %207 = vector.shape_cast %206 : vector<1x8x8xf32> to vector<8x8xf32>
    %c0_114 = arith.constant 0 : index
    %c0_115 = arith.constant 0 : index
    %c0_116 = arith.constant 0 : index
    %c0_117 = arith.constant 0 : index
    %208 = vector.load %arg12[%c0_114, %c0_115, %c0_116, %c0_117] : memref<2x4x128x32xbf16, #tpu.memory_space<vmem>>, vector<1x4x128x32xbf16>
    %209 = vector.shape_cast %208 : vector<1x4x128x32xbf16> to vector<4x128x32xbf16>
    %c0_118 = arith.constant 0 : index
    %c0_119 = arith.constant 0 : index
    %c0_120 = arith.constant 0 : index
    %c0_121 = arith.constant 0 : index
    %210 = vector.load %arg13[%c0_118, %c0_119, %c0_120, %c0_121] : memref<2x4x128x32xbf16, #tpu.memory_space<vmem>>, vector<1x4x128x32xbf16>
    %211 = vector.shape_cast %210 : vector<1x4x128x32xbf16> to vector<4x128x32xbf16>
    %c0_122 = arith.constant 0 : index
    %c0_123 = arith.constant 0 : index
    %c0_124 = arith.constant 0 : index
    %c0_125 = arith.constant 0 : index
    %212 = vector.load %arg14[%c0_122, %c0_123, %c0_124, %c0_125] : memref<2x4x128x32xbf16, #tpu.memory_space<vmem>>, vector<1x4x128x32xbf16>
    %213 = vector.shape_cast %212 : vector<1x4x128x32xbf16> to vector<4x128x32xbf16>
    %c0_126 = arith.constant 0 : index
    %c0_127 = arith.constant 0 : index
    %c0_128 = arith.constant 0 : index
    %c0_129 = arith.constant 0 : index
    %214 = vector.load %arg15[%c0_126, %c0_127, %c0_128, %c0_129] : memref<2x4x32x128xbf16, #tpu.memory_space<vmem>>, vector<1x4x32x128xbf16>
    %215 = vector.shape_cast %214 : vector<1x4x32x128xbf16> to vector<4x32x128xbf16>
    %216 = arith.truncf %203 : vector<8x128xf32> to vector<8x128xbf16>
    %217 = vector.shape_cast %216 : vector<8x128xbf16> to vector<1x8x128xbf16>
    %218 = vector.shape_cast %217 : vector<1x8x128xbf16> to vector<1x8x128xbf16>
    %219 = vector.broadcast %218 : vector<1x8x128xbf16> to vector<4x8x128xbf16>
    %220 = arith.truncf %203 : vector<8x128xf32> to vector<8x128xbf16>
    %221 = vector.shape_cast %220 : vector<8x128xbf16> to vector<1x8x128xbf16>
    %222 = vector.shape_cast %221 : vector<1x8x128xbf16> to vector<1x8x128xbf16>
    %223 = vector.broadcast %222 : vector<1x8x128xbf16> to vector<4x8x128xbf16>
    "tpu.trace_start"() <{level = 10 : i32, message = "hqd,hdk->hqk"}> : () -> ()
    %cst_130 = arith.constant dense<0.000000e+00> : vector<4x8x32xf32>
    %224 = tpu.matmul %219, %209, %cst_130 {dimension_numbers = #tpu.dot_dimension_numbers<[2], [1], [1], [2], [0, 0, 0, 1, 1, 2], [0], [0]>} : vector<4x8x128xbf16>, vector<4x128x32xbf16>, vector<4x8x32xf32> -> vector<4x8x32xf32>
    "tpu.trace_stop"() : () -> ()
    "tpu.trace_start"() <{level = 10 : i32, message = "hkd,hdc->hkc"}> : () -> ()
    %cst_131 = arith.constant dense<0.000000e+00> : vector<4x8x32xf32>
    %225 = tpu.matmul %223, %211, %cst_131 {dimension_numbers = #tpu.dot_dimension_numbers<[2], [1], [1], [2], [0, 0, 0, 1, 1, 2], [0], [0]>} : vector<4x8x128xbf16>, vector<4x128x32xbf16>, vector<4x8x32xf32> -> vector<4x8x32xf32>
    %cst_132 = arith.constant dense<0.000000e+00> : vector<4x8x32xf32>
    %226 = tpu.matmul %223, %213, %cst_132 {dimension_numbers = #tpu.dot_dimension_numbers<[2], [1], [1], [2], [0, 0, 0, 1, 1, 2], [0], [0]>} : vector<4x8x128xbf16>, vector<4x128x32xbf16>, vector<4x8x32xf32> -> vector<4x8x32xf32>
    "tpu.trace_stop"() : () -> ()
    %227 = arith.truncf %224 : vector<4x8x32xf32> to vector<4x8x32xbf16>
    %228 = arith.truncf %225 : vector<4x8x32xf32> to vector<4x8x32xbf16>
    "tpu.trace_start"() <{level = 10 : i32, message = "hqc,hkc->hqk"}> : () -> ()
    %cst_133 = arith.constant dense<0.000000e+00> : vector<4x8x8xf32>
    %229 = tpu.matmul %227, %228, %cst_133 {dimension_numbers = #tpu.dot_dimension_numbers<[2], [2], [1], [1], [0, 0, 0, 1, 1, 1], [0], [0]>} : vector<4x8x32xbf16>, vector<4x8x32xbf16>, vector<4x8x8xf32> -> vector<4x8x8xf32>
    "tpu.trace_stop"() : () -> ()
    %cst_134 = arith.constant 0.176776692 : f32
    %230 = vector.broadcast %cst_134 : f32 to vector<4x8x8xf32>
    %231 = arith.mulf %229, %230 : vector<4x8x8xf32>
    %232 = vector.shape_cast %205 : vector<8x8xf32> to vector<1x8x8xf32>
    %233 = vector.broadcast %232 : vector<1x8x8xf32> to vector<4x8x8xf32>
    %234 = arith.addf %231, %233 : vector<4x8x8xf32>
    %cst_135 = arith.constant dense<0xFF800000> : vector<4x8xf32>
    %235 = vector.multi_reduction <maximumf>, %234, %cst_135 [2] : vector<4x8x8xf32> to vector<4x8xf32>
    %236 = vector.shape_cast %235 : vector<4x8xf32> to vector<4x8x1xf32>
    %237 = vector.broadcast %236 : vector<4x8x1xf32> to vector<4x8x8xf32>
    %238 = arith.subf %234, %237 : vector<4x8x8xf32>
    %239 = math.exp %238 : vector<4x8x8xf32>
    %cst_136 = arith.constant dense<0.000000e+00> : vector<4x8xf32>
    %240 = vector.multi_reduction <add>, %239, %cst_136 [2] : vector<4x8x8xf32> to vector<4x8xf32>
    %241 = vector.shape_cast %240 : vector<4x8xf32> to vector<4x8x1xf32>
    %242 = tpu.reciprocal %241 {approx = true} : vector<4x8x1xf32> -> vector<4x8x1xf32>
    %243 = vector.broadcast %242 : vector<4x8x1xf32> to vector<4x8x8xf32>
    %244 = arith.mulf %239, %243 : vector<4x8x8xf32>
    %245 = arith.truncf %244 : vector<4x8x8xf32> to vector<4x8x8xbf16>
    %246 = arith.truncf %226 : vector<4x8x32xf32> to vector<4x8x32xbf16>
    "tpu.trace_start"() <{level = 10 : i32, message = "hqk,hkc->hqc"}> : () -> ()
    %cst_137 = arith.constant dense<0.000000e+00> : vector<4x8x32xf32>
    %247 = tpu.matmul %245, %246, %cst_137 {dimension_numbers = #tpu.dot_dimension_numbers<[2], [1], [1], [2], [0, 0, 0, 1, 1, 2], [0], [0]>} : vector<4x8x8xbf16>, vector<4x8x32xbf16>, vector<4x8x32xf32> -> vector<4x8x32xf32>
    "tpu.trace_stop"() : () -> ()
    %248 = arith.truncf %247 : vector<4x8x32xf32> to vector<4x8x32xbf16>
    "tpu.trace_start"() <{level = 10 : i32, message = "hqc,hcd->hqd"}> : () -> ()
    %cst_138 = arith.constant dense<0.000000e+00> : vector<4x8x128xf32>
    %249 = tpu.matmul %248, %215, %cst_138 {dimension_numbers = #tpu.dot_dimension_numbers<[2], [1], [1], [2], [0, 0, 0, 1, 1, 2], [0], [0]>} : vector<4x8x32xbf16>, vector<4x32x128xbf16>, vector<4x8x128xf32> -> vector<4x8x128xf32>
    "tpu.trace_stop"() : () -> ()
    %cst_139 = arith.constant dense<0.000000e+00> : vector<8x128xf32>
    %250 = vector.multi_reduction <add>, %249, %cst_139 [0] : vector<4x8x128xf32> to vector<8x128xf32>
    %251 = arith.addf %250, %203 : vector<8x128xf32>
    %cst_140 = arith.constant dense<0.000000e+00> : vector<8xf32>
    %252 = vector.multi_reduction <add>, %251, %cst_140 [1] : vector<8x128xf32> to vector<8xf32>
    %253 = vector.shape_cast %252 : vector<8xf32> to vector<8x1xf32>
    %cst_141 = arith.constant 1.280000e+02 : f32
    %254 = vector.broadcast %cst_141 : f32 to vector<8x1xf32>
    %255 = arith.divf %253, %254 : vector<8x1xf32>
    %256 = vector.broadcast %255 : vector<8x1xf32> to vector<8x128xf32>
    %257 = arith.subf %251, %256 : vector<8x128xf32>
    %258 = arith.mulf %257, %257 : vector<8x128xf32>
    %cst_142 = arith.constant dense<0.000000e+00> : vector<8xf32>
    %259 = vector.multi_reduction <add>, %258, %cst_142 [1] : vector<8x128xf32> to vector<8xf32>
    %260 = vector.shape_cast %259 : vector<8xf32> to vector<8x1xf32>
    %cst_143 = arith.constant 1.280000e+02 : f32
    %261 = vector.broadcast %cst_143 : f32 to vector<8x1xf32>
    %262 = arith.divf %260, %261 : vector<8x1xf32>
    %cst_144 = arith.constant 9.99999974E-6 : f32
    %263 = vector.broadcast %cst_144 : f32 to vector<8x1xf32>
    %264 = arith.addf %262, %263 : vector<8x1xf32>
    %265 = math.rsqrt %264 : vector<8x1xf32>
    %266 = vector.broadcast %265 : vector<8x1xf32> to vector<8x128xf32>
    %267 = arith.mulf %257, %266 : vector<8x128xf32>
    %268 = vector.shape_cast %9 : vector<8x128xf32> to vector<1x8x128xf32>
    %269 = vector.shape_cast %268 : vector<1x8x128xf32> to vector<1x8x128xf32>
    %270 = vector.broadcast %269 : vector<1x8x128xf32> to vector<4x8x128xf32>
    "tpu.trace_start"() <{level = 10 : i32, message = "hqk,hkm->hqm"}> : () -> ()
    %cst_145 = arith.constant dense<0.000000e+00> : vector<4x8x128xf32>
    %271 = tpu.matmul %244, %270, %cst_145 {dimension_numbers = #tpu.dot_dimension_numbers<[2], [1], [1], [2], [0, 0, 0, 1, 1, 2], [0], [0]>} : vector<4x8x8xf32>, vector<4x8x128xf32>, vector<4x8x128xf32> -> vector<4x8x128xf32>
    "tpu.trace_stop"() : () -> ()
    %c0_146 = arith.constant 0 : index
    %c0_147 = arith.constant 0 : index
    %c0_148 = arith.constant 0 : index
    %c0_149 = arith.constant 0 : index
    %c0_150 = arith.constant 0 : index
    %272 = vector.load %arg23[%c0_146, %c0_147, %c0_148, %c0_149, %c0_150] : memref<1x2x4x8x128xf32, #tpu.memory_space<vmem>>, vector<1x1x4x8x128xf32>
    %273 = vector.shape_cast %272 : vector<1x1x4x8x128xf32> to vector<4x8x128xf32>
    %274 = vector.shape_cast %271 : vector<4x8x128xf32> to vector<1x1x4x8x128xf32>
    tpu.vector_store %arg23[%c0_146, %c0_147, %c0_148, %c0_149, %c0_150], %274 {strides = array<i32>} : memref<1x2x4x8x128xf32, #tpu.memory_space<vmem>>, vector<1x1x4x8x128xf32>,
    %c0_151 = arith.constant 0 : index
    %c0_152 = arith.constant 0 : index
    %c0_153 = arith.constant 0 : index
    %c0_154 = arith.constant 0 : index
    %275 = vector.load %arg16[%c0_151, %c0_152, %c0_153, %c0_154] : memref<2x4x128x32xbf16, #tpu.memory_space<vmem>>, vector<1x4x128x32xbf16>
    %276 = vector.shape_cast %275 : vector<1x4x128x32xbf16> to vector<4x128x32xbf16>
    %c0_155 = arith.constant 0 : index
    %c0_156 = arith.constant 0 : index
    %c0_157 = arith.constant 0 : index
    %c0_158 = arith.constant 0 : index
    %277 = vector.load %arg17[%c0_155, %c0_156, %c0_157, %c0_158] : memref<2x4x128x32xbf16, #tpu.memory_space<vmem>>, vector<1x4x128x32xbf16>
    %278 = vector.shape_cast %277 : vector<1x4x128x32xbf16> to vector<4x128x32xbf16>
    %c0_159 = arith.constant 0 : index
    %c0_160 = arith.constant 0 : index
    %c0_161 = arith.constant 0 : index
    %c0_162 = arith.constant 0 : index
    %279 = vector.load %arg18[%c0_159, %c0_160, %c0_161, %c0_162] : memref<2x4x128x32xbf16, #tpu.memory_space<vmem>>, vector<1x4x128x32xbf16>
    %280 = vector.shape_cast %279 : vector<1x4x128x32xbf16> to vector<4x128x32xbf16>
    %c0_163 = arith.constant 0 : index
    %c0_164 = arith.constant 0 : index
    %c0_165 = arith.constant 0 : index
    %c0_166 = arith.constant 0 : index
    %281 = vector.load %arg19[%c0_163, %c0_164, %c0_165, %c0_166] : memref<2x4x32x128xbf16, #tpu.memory_space<vmem>>, vector<1x4x32x128xbf16>
    %282 = vector.shape_cast %281 : vector<1x4x32x128xbf16> to vector<4x32x128xbf16>
    %283 = arith.truncf %267 : vector<8x128xf32> to vector<8x128xbf16>
    %284 = vector.shape_cast %283 : vector<8x128xbf16> to vector<1x8x128xbf16>
    %285 = vector.shape_cast %284 : vector<1x8x128xbf16> to vector<1x8x128xbf16>
    %286 = vector.broadcast %285 : vector<1x8x128xbf16> to vector<4x8x128xbf16>
    %287 = arith.truncf %198 : vector<8x128xf32> to vector<8x128xbf16>
    %288 = vector.shape_cast %287 : vector<8x128xbf16> to vector<1x8x128xbf16>
    %289 = vector.shape_cast %288 : vector<1x8x128xbf16> to vector<1x8x128xbf16>
    %290 = vector.broadcast %289 : vector<1x8x128xbf16> to vector<4x8x128xbf16>
    "tpu.trace_start"() <{level = 10 : i32, message = "hqd,hdk->hqk"}> : () -> ()
    %cst_167 = arith.constant dense<0.000000e+00> : vector<4x8x32xf32>
    %291 = tpu.matmul %286, %276, %cst_167 {dimension_numbers = #tpu.dot_dimension_numbers<[2], [1], [1], [2], [0, 0, 0, 1, 1, 2], [0], [0]>} : vector<4x8x128xbf16>, vector<4x128x32xbf16>, vector<4x8x32xf32> -> vector<4x8x32xf32>
    "tpu.trace_stop"() : () -> ()
    "tpu.trace_start"() <{level = 10 : i32, message = "hkd,hdc->hkc"}> : () -> ()
    %cst_168 = arith.constant dense<0.000000e+00> : vector<4x8x32xf32>
    %292 = tpu.matmul %290, %278, %cst_168 {dimension_numbers = #tpu.dot_dimension_numbers<[2], [1], [1], [2], [0, 0, 0, 1, 1, 2], [0], [0]>} : vector<4x8x128xbf16>, vector<4x128x32xbf16>, vector<4x8x32xf32> -> vector<4x8x32xf32>
    %cst_169 = arith.constant dense<0.000000e+00> : vector<4x8x32xf32>
    %293 = tpu.matmul %290, %280, %cst_169 {dimension_numbers = #tpu.dot_dimension_numbers<[2], [1], [1], [2], [0, 0, 0, 1, 1, 2], [0], [0]>} : vector<4x8x128xbf16>, vector<4x128x32xbf16>, vector<4x8x32xf32> -> vector<4x8x32xf32>
    "tpu.trace_stop"() : () -> ()
    %294 = arith.truncf %291 : vector<4x8x32xf32> to vector<4x8x32xbf16>
    %295 = arith.truncf %292 : vector<4x8x32xf32> to vector<4x8x32xbf16>
    "tpu.trace_start"() <{level = 10 : i32, message = "hqc,hkc->hqk"}> : () -> ()
    %cst_170 = arith.constant dense<0.000000e+00> : vector<4x8x8xf32>
    %296 = tpu.matmul %294, %295, %cst_170 {dimension_numbers = #tpu.dot_dimension_numbers<[2], [2], [1], [1], [0, 0, 0, 1, 1, 1], [0], [0]>} : vector<4x8x32xbf16>, vector<4x8x32xbf16>, vector<4x8x8xf32> -> vector<4x8x8xf32>
    "tpu.trace_stop"() : () -> ()
    %cst_171 = arith.constant 0.176776692 : f32
    %297 = vector.broadcast %cst_171 : f32 to vector<4x8x8xf32>
    %298 = arith.mulf %296, %297 : vector<4x8x8xf32>
    %299 = vector.shape_cast %207 : vector<8x8xf32> to vector<1x8x8xf32>
    %300 = vector.broadcast %299 : vector<1x8x8xf32> to vector<4x8x8xf32>
    %301 = arith.addf %298, %300 : vector<4x8x8xf32>
    %cst_172 = arith.constant dense<0xFF800000> : vector<4x8xf32>
    %302 = vector.multi_reduction <maximumf>, %301, %cst_172 [2] : vector<4x8x8xf32> to vector<4x8xf32>
    %303 = vector.shape_cast %302 : vector<4x8xf32> to vector<4x8x1xf32>
    %304 = vector.broadcast %303 : vector<4x8x1xf32> to vector<4x8x8xf32>
    %305 = arith.subf %301, %304 : vector<4x8x8xf32>
    %306 = math.exp %305 : vector<4x8x8xf32>
    %cst_173 = arith.constant dense<0.000000e+00> : vector<4x8xf32>
    %307 = vector.multi_reduction <add>, %306, %cst_173 [2] : vector<4x8x8xf32> to vector<4x8xf32>
    %308 = vector.shape_cast %307 : vector<4x8xf32> to vector<4x8x1xf32>
    %309 = tpu.reciprocal %308 {approx = true} : vector<4x8x1xf32> -> vector<4x8x1xf32>
    %310 = vector.broadcast %309 : vector<4x8x1xf32> to vector<4x8x8xf32>
    %311 = arith.mulf %306, %310 : vector<4x8x8xf32>
    %312 = arith.truncf %311 : vector<4x8x8xf32> to vector<4x8x8xbf16>
    %313 = arith.truncf %293 : vector<4x8x32xf32> to vector<4x8x32xbf16>
    "tpu.trace_start"() <{level = 10 : i32, message = "hqk,hkc->hqc"}> : () -> ()
    %cst_174 = arith.constant dense<0.000000e+00> : vector<4x8x32xf32>
    %314 = tpu.matmul %312, %313, %cst_174 {dimension_numbers = #tpu.dot_dimension_numbers<[2], [1], [1], [2], [0, 0, 0, 1, 1, 2], [0], [0]>} : vector<4x8x8xbf16>, vector<4x8x32xbf16>, vector<4x8x32xf32> -> vector<4x8x32xf32>
    "tpu.trace_stop"() : () -> ()
    %315 = arith.truncf %314 : vector<4x8x32xf32> to vector<4x8x32xbf16>
    "tpu.trace_start"() <{level = 10 : i32, message = "hqc,hcd->hqd"}> : () -> ()
    %cst_175 = arith.constant dense<0.000000e+00> : vector<4x8x128xf32>
    %316 = tpu.matmul %315, %282, %cst_175 {dimension_numbers = #tpu.dot_dimension_numbers<[2], [1], [1], [2], [0, 0, 0, 1, 1, 2], [0], [0]>} : vector<4x8x32xbf16>, vector<4x32x128xbf16>, vector<4x8x128xf32> -> vector<4x8x128xf32>
    "tpu.trace_stop"() : () -> ()
    %cst_176 = arith.constant dense<0.000000e+00> : vector<8x128xf32>
    %317 = vector.multi_reduction <add>, %316, %cst_176 [0] : vector<4x8x128xf32> to vector<8x128xf32>
    %318 = arith.addf %317, %267 : vector<8x128xf32>
    %cst_177 = arith.constant dense<0.000000e+00> : vector<8xf32>
    %319 = vector.multi_reduction <add>, %318, %cst_177 [1] : vector<8x128xf32> to vector<8xf32>
    %320 = vector.shape_cast %319 : vector<8xf32> to vector<8x1xf32>
    %cst_178 = arith.constant 1.280000e+02 : f32
    %321 = vector.broadcast %cst_178 : f32 to vector<8x1xf32>
    %322 = arith.divf %320, %321 : vector<8x1xf32>
    %323 = vector.broadcast %322 : vector<8x1xf32> to vector<8x128xf32>
    %324 = arith.subf %318, %323 : vector<8x128xf32>
    %325 = arith.mulf %324, %324 : vector<8x128xf32>
    %cst_179 = arith.constant dense<0.000000e+00> : vector<8xf32>
    %326 = vector.multi_reduction <add>, %325, %cst_179 [1] : vector<8x128xf32> to vector<8xf32>
    %327 = vector.shape_cast %326 : vector<8xf32> to vector<8x1xf32>
    %cst_180 = arith.constant 1.280000e+02 : f32
    %328 = vector.broadcast %cst_180 : f32 to vector<8x1xf32>
    %329 = arith.divf %327, %328 : vector<8x1xf32>
    %cst_181 = arith.constant 9.99999974E-6 : f32
    %330 = vector.broadcast %cst_181 : f32 to vector<8x1xf32>
    %331 = arith.addf %329, %330 : vector<8x1xf32>
    %332 = math.rsqrt %331 : vector<8x1xf32>
    %333 = vector.broadcast %332 : vector<8x1xf32> to vector<8x128xf32>
    %334 = arith.mulf %324, %333 : vector<8x128xf32>
    %335 = vector.shape_cast %4 : vector<8x128xf32> to vector<1x8x128xf32>
    %336 = vector.shape_cast %335 : vector<1x8x128xf32> to vector<1x8x128xf32>
    %337 = vector.broadcast %336 : vector<1x8x128xf32> to vector<4x8x128xf32>
    "tpu.trace_start"() <{level = 10 : i32, message = "hqk,hkm->hqm"}> : () -> ()
    %cst_182 = arith.constant dense<0.000000e+00> : vector<4x8x128xf32>
    %338 = tpu.matmul %311, %337, %cst_182 {dimension_numbers = #tpu.dot_dimension_numbers<[2], [1], [1], [2], [0, 0, 0, 1, 1, 2], [0], [0]>} : vector<4x8x8xf32>, vector<4x8x128xf32>, vector<4x8x128xf32> -> vector<4x8x128xf32>
    "tpu.trace_stop"() : () -> ()
    %c0_183 = arith.constant 0 : index
    %c0_184 = arith.constant 0 : index
    %c0_185 = arith.constant 0 : index
    %c0_186 = arith.constant 0 : index
    %c0_187 = arith.constant 0 : index
    %339 = vector.load %arg24[%c0_183, %c0_184, %c0_185, %c0_186, %c0_187] : memref<1x2x4x8x128xf32, #tpu.memory_space<vmem>>, vector<1x1x4x8x128xf32>
    %340 = vector.shape_cast %339 : vector<1x1x4x8x128xf32> to vector<4x8x128xf32>
    %341 = vector.shape_cast %338 : vector<4x8x128xf32> to vector<1x1x4x8x128xf32>
    tpu.vector_store %arg24[%c0_183, %c0_184, %c0_185, %c0_186, %c0_187], %341 {strides = array<i32>} : memref<1x2x4x8x128xf32, #tpu.memory_space<vmem>>, vector<1x1x4x8x128xf32>,
    %c1_188 = arith.constant 1 : index
    %c0_189 = arith.constant 0 : index
    %c0_190 = arith.constant 0 : index
    %c0_191 = arith.constant 0 : index
    %342 = vector.load %arg12[%c1_188, %c0_189, %c0_190, %c0_191] : memref<2x4x128x32xbf16, #tpu.memory_space<vmem>>, vector<1x4x128x32xbf16>
    %343 = vector.shape_cast %342 : vector<1x4x128x32xbf16> to vector<4x128x32xbf16>
    %c1_192 = arith.constant 1 : index
    %c0_193 = arith.constant 0 : index
    %c0_194 = arith.constant 0 : index
    %c0_195 = arith.constant 0 : index
    %344 = vector.load %arg13[%c1_192, %c0_193, %c0_194, %c0_195] : memref<2x4x128x32xbf16, #tpu.memory_space<vmem>>, vector<1x4x128x32xbf16>
    %345 = vector.shape_cast %344 : vector<1x4x128x32xbf16> to vector<4x128x32xbf16>
    %c1_196 = arith.constant 1 : index
    %c0_197 = arith.constant 0 : index
    %c0_198 = arith.constant 0 : index
    %c0_199 = arith.constant 0 : index
    %346 = vector.load %arg14[%c1_196, %c0_197, %c0_198, %c0_199] : memref<2x4x128x32xbf16, #tpu.memory_space<vmem>>, vector<1x4x128x32xbf16>
    %347 = vector.shape_cast %346 : vector<1x4x128x32xbf16> to vector<4x128x32xbf16>
    %c1_200 = arith.constant 1 : index
    %c0_201 = arith.constant 0 : index
    %c0_202 = arith.constant 0 : index
    %c0_203 = arith.constant 0 : index
    %348 = vector.load %arg15[%c1_200, %c0_201, %c0_202, %c0_203] : memref<2x4x32x128xbf16, #tpu.memory_space<vmem>>, vector<1x4x32x128xbf16>
    %349 = vector.shape_cast %348 : vector<1x4x32x128xbf16> to vector<4x32x128xbf16>
    %350 = arith.truncf %334 : vector<8x128xf32> to vector<8x128xbf16>
    %351 = vector.shape_cast %350 : vector<8x128xbf16> to vector<1x8x128xbf16>
    %352 = vector.shape_cast %351 : vector<1x8x128xbf16> to vector<1x8x128xbf16>
    %353 = vector.broadcast %352 : vector<1x8x128xbf16> to vector<4x8x128xbf16>
    %354 = arith.truncf %334 : vector<8x128xf32> to vector<8x128xbf16>
    %355 = vector.shape_cast %354 : vector<8x128xbf16> to vector<1x8x128xbf16>
    %356 = vector.shape_cast %355 : vector<1x8x128xbf16> to vector<1x8x128xbf16>
    %357 = vector.broadcast %356 : vector<1x8x128xbf16> to vector<4x8x128xbf16>
    "tpu.trace_start"() <{level = 10 : i32, message = "hqd,hdk->hqk"}> : () -> ()
    %cst_204 = arith.constant dense<0.000000e+00> : vector<4x8x32xf32>
    %358 = tpu.matmul %353, %343, %cst_204 {dimension_numbers = #tpu.dot_dimension_numbers<[2], [1], [1], [2], [0, 0, 0, 1, 1, 2], [0], [0]>} : vector<4x8x128xbf16>, vector<4x128x32xbf16>, vector<4x8x32xf32> -> vector<4x8x32xf32>
    "tpu.trace_stop"() : () -> ()
    "tpu.trace_start"() <{level = 10 : i32, message = "hkd,hdc->hkc"}> : () -> ()
    %cst_205 = arith.constant dense<0.000000e+00> : vector<4x8x32xf32>
    %359 = tpu.matmul %357, %345, %cst_205 {dimension_numbers = #tpu.dot_dimension_numbers<[2], [1], [1], [2], [0, 0, 0, 1, 1, 2], [0], [0]>} : vector<4x8x128xbf16>, vector<4x128x32xbf16>, vector<4x8x32xf32> -> vector<4x8x32xf32>
    %cst_206 = arith.constant dense<0.000000e+00> : vector<4x8x32xf32>
    %360 = tpu.matmul %357, %347, %cst_206 {dimension_numbers = #tpu.dot_dimension_numbers<[2], [1], [1], [2], [0, 0, 0, 1, 1, 2], [0], [0]>} : vector<4x8x128xbf16>, vector<4x128x32xbf16>, vector<4x8x32xf32> -> vector<4x8x32xf32>
    "tpu.trace_stop"() : () -> ()
    %361 = arith.truncf %358 : vector<4x8x32xf32> to vector<4x8x32xbf16>
    %362 = arith.truncf %359 : vector<4x8x32xf32> to vector<4x8x32xbf16>
    "tpu.trace_start"() <{level = 10 : i32, message = "hqc,hkc->hqk"}> : () -> ()
    %cst_207 = arith.constant dense<0.000000e+00> : vector<4x8x8xf32>
    %363 = tpu.matmul %361, %362, %cst_207 {dimension_numbers = #tpu.dot_dimension_numbers<[2], [2], [1], [1], [0, 0, 0, 1, 1, 1], [0], [0]>} : vector<4x8x32xbf16>, vector<4x8x32xbf16>, vector<4x8x8xf32> -> vector<4x8x8xf32>
    "tpu.trace_stop"() : () -> ()
    %cst_208 = arith.constant 0.176776692 : f32
    %364 = vector.broadcast %cst_208 : f32 to vector<4x8x8xf32>
    %365 = arith.mulf %363, %364 : vector<4x8x8xf32>
    %366 = vector.shape_cast %205 : vector<8x8xf32> to vector<1x8x8xf32>
    %367 = vector.broadcast %366 : vector<1x8x8xf32> to vector<4x8x8xf32>
    %368 = arith.addf %365, %367 : vector<4x8x8xf32>
    %cst_209 = arith.constant dense<0xFF800000> : vector<4x8xf32>
    %369 = vector.multi_reduction <maximumf>, %368, %cst_209 [2] : vector<4x8x8xf32> to vector<4x8xf32>
    %370 = vector.shape_cast %369 : vector<4x8xf32> to vector<4x8x1xf32>
    %371 = vector.broadcast %370 : vector<4x8x1xf32> to vector<4x8x8xf32>
    %372 = arith.subf %368, %371 : vector<4x8x8xf32>
    %373 = math.exp %372 : vector<4x8x8xf32>
    %cst_210 = arith.constant dense<0.000000e+00> : vector<4x8xf32>
    %374 = vector.multi_reduction <add>, %373, %cst_210 [2] : vector<4x8x8xf32> to vector<4x8xf32>
    %375 = vector.shape_cast %374 : vector<4x8xf32> to vector<4x8x1xf32>
    %376 = tpu.reciprocal %375 {approx = true} : vector<4x8x1xf32> -> vector<4x8x1xf32>
    %377 = vector.broadcast %376 : vector<4x8x1xf32> to vector<4x8x8xf32>
    %378 = arith.mulf %373, %377 : vector<4x8x8xf32>
    %379 = arith.truncf %378 : vector<4x8x8xf32> to vector<4x8x8xbf16>
    %380 = arith.truncf %360 : vector<4x8x32xf32> to vector<4x8x32xbf16>
    "tpu.trace_start"() <{level = 10 : i32, message = "hqk,hkc->hqc"}> : () -> ()
    %cst_211 = arith.constant dense<0.000000e+00> : vector<4x8x32xf32>
    %381 = tpu.matmul %379, %380, %cst_211 {dimension_numbers = #tpu.dot_dimension_numbers<[2], [1], [1], [2], [0, 0, 0, 1, 1, 2], [0], [0]>} : vector<4x8x8xbf16>, vector<4x8x32xbf16>, vector<4x8x32xf32> -> vector<4x8x32xf32>
    "tpu.trace_stop"() : () -> ()
    %382 = arith.truncf %381 : vector<4x8x32xf32> to vector<4x8x32xbf16>
    "tpu.trace_start"() <{level = 10 : i32, message = "hqc,hcd->hqd"}> : () -> ()
    %cst_212 = arith.constant dense<0.000000e+00> : vector<4x8x128xf32>
    %383 = tpu.matmul %382, %349, %cst_212 {dimension_numbers = #tpu.dot_dimension_numbers<[2], [1], [1], [2], [0, 0, 0, 1, 1, 2], [0], [0]>} : vector<4x8x32xbf16>, vector<4x32x128xbf16>, vector<4x8x128xf32> -> vector<4x8x128xf32>
    "tpu.trace_stop"() : () -> ()
    %cst_213 = arith.constant dense<0.000000e+00> : vector<8x128xf32>
    %384 = vector.multi_reduction <add>, %383, %cst_213 [0] : vector<4x8x128xf32> to vector<8x128xf32>
    %385 = arith.addf %384, %334 : vector<8x128xf32>
    %cst_214 = arith.constant dense<0.000000e+00> : vector<8xf32>
    %386 = vector.multi_reduction <add>, %385, %cst_214 [1] : vector<8x128xf32> to vector<8xf32>
    %387 = vector.shape_cast %386 : vector<8xf32> to vector<8x1xf32>
    %cst_215 = arith.constant 1.280000e+02 : f32
    %388 = vector.broadcast %cst_215 : f32 to vector<8x1xf32>
    %389 = arith.divf %387, %388 : vector<8x1xf32>
    %390 = vector.broadcast %389 : vector<8x1xf32> to vector<8x128xf32>
    %391 = arith.subf %385, %390 : vector<8x128xf32>
    %392 = arith.mulf %391, %391 : vector<8x128xf32>
    %cst_216 = arith.constant dense<0.000000e+00> : vector<8xf32>
    %393 = vector.multi_reduction <add>, %392, %cst_216 [1] : vector<8x128xf32> to vector<8xf32>
    %394 = vector.shape_cast %393 : vector<8xf32> to vector<8x1xf32>
    %cst_217 = arith.constant 1.280000e+02 : f32
    %395 = vector.broadcast %cst_217 : f32 to vector<8x1xf32>
    %396 = arith.divf %394, %395 : vector<8x1xf32>
    %cst_218 = arith.constant 9.99999974E-6 : f32
    %397 = vector.broadcast %cst_218 : f32 to vector<8x1xf32>
    %398 = arith.addf %396, %397 : vector<8x1xf32>
    %399 = math.rsqrt %398 : vector<8x1xf32>
    %400 = vector.broadcast %399 : vector<8x1xf32> to vector<8x128xf32>
    %401 = arith.mulf %391, %400 : vector<8x128xf32>
    %402 = vector.shape_cast %9 : vector<8x128xf32> to vector<1x8x128xf32>
    %403 = vector.shape_cast %402 : vector<1x8x128xf32> to vector<1x8x128xf32>
    %404 = vector.broadcast %403 : vector<1x8x128xf32> to vector<4x8x128xf32>
    "tpu.trace_start"() <{level = 10 : i32, message = "hqk,hkm->hqm"}> : () -> ()
    %cst_219 = arith.constant dense<0.000000e+00> : vector<4x8x128xf32>
    %405 = tpu.matmul %378, %404, %cst_219 {dimension_numbers = #tpu.dot_dimension_numbers<[2], [1], [1], [2], [0, 0, 0, 1, 1, 2], [0], [0]>} : vector<4x8x8xf32>, vector<4x8x128xf32>, vector<4x8x128xf32> -> vector<4x8x128xf32>
    "tpu.trace_stop"() : () -> ()
    %c0_220 = arith.constant 0 : index
    %c1_221 = arith.constant 1 : index
    %c0_222 = arith.constant 0 : index
    %c0_223 = arith.constant 0 : index
    %c0_224 = arith.constant 0 : index
    %406 = vector.load %arg23[%c0_220, %c1_221, %c0_222, %c0_223, %c0_224] : memref<1x2x4x8x128xf32, #tpu.memory_space<vmem>>, vector<1x1x4x8x128xf32>
    %407 = vector.shape_cast %406 : vector<1x1x4x8x128xf32> to vector<4x8x128xf32>
    %408 = vector.shape_cast %405 : vector<4x8x128xf32> to vector<1x1x4x8x128xf32>
    tpu.vector_store %arg23[%c0_220, %c1_221, %c0_222, %c0_223, %c0_224], %408 {strides = array<i32>} : memref<1x2x4x8x128xf32, #tpu.memory_space<vmem>>, vector<1x1x4x8x128xf32>,
    %c1_225 = arith.constant 1 : index
    %c0_226 = arith.constant 0 : index
    %c0_227 = arith.constant 0 : index
    %c0_228 = arith.constant 0 : index
    %409 = vector.load %arg16[%c1_225, %c0_226, %c0_227, %c0_228] : memref<2x4x128x32xbf16, #tpu.memory_space<vmem>>, vector<1x4x128x32xbf16>
    %410 = vector.shape_cast %409 : vector<1x4x128x32xbf16> to vector<4x128x32xbf16>
    %c1_229 = arith.constant 1 : index
    %c0_230 = arith.constant 0 : index
    %c0_231 = arith.constant 0 : index
    %c0_232 = arith.constant 0 : index
    %411 = vector.load %arg17[%c1_229, %c0_230, %c0_231, %c0_232] : memref<2x4x128x32xbf16, #tpu.memory_space<vmem>>, vector<1x4x128x32xbf16>
    %412 = vector.shape_cast %411 : vector<1x4x128x32xbf16> to vector<4x128x32xbf16>
    %c1_233 = arith.constant 1 : index
    %c0_234 = arith.constant 0 : index
    %c0_235 = arith.constant 0 : index
    %c0_236 = arith.constant 0 : index
    %413 = vector.load %arg18[%c1_233, %c0_234, %c0_235, %c0_236] : memref<2x4x128x32xbf16, #tpu.memory_space<vmem>>, vector<1x4x128x32xbf16>
    %414 = vector.shape_cast %413 : vector<1x4x128x32xbf16> to vector<4x128x32xbf16>
    %c1_237 = arith.constant 1 : index
    %c0_238 = arith.constant 0 : index
    %c0_239 = arith.constant 0 : index
    %c0_240 = arith.constant 0 : index
    %415 = vector.load %arg19[%c1_237, %c0_238, %c0_239, %c0_240] : memref<2x4x32x128xbf16, #tpu.memory_space<vmem>>, vector<1x4x32x128xbf16>
    %416 = vector.shape_cast %415 : vector<1x4x32x128xbf16> to vector<4x32x128xbf16>
    %417 = arith.truncf %401 : vector<8x128xf32> to vector<8x128xbf16>
    %418 = vector.shape_cast %417 : vector<8x128xbf16> to vector<1x8x128xbf16>
    %419 = vector.shape_cast %418 : vector<1x8x128xbf16> to vector<1x8x128xbf16>
    %420 = vector.broadcast %419 : vector<1x8x128xbf16> to vector<4x8x128xbf16>
    %421 = arith.truncf %198 : vector<8x128xf32> to vector<8x128xbf16>
    %422 = vector.shape_cast %421 : vector<8x128xbf16> to vector<1x8x128xbf16>
    %423 = vector.shape_cast %422 : vector<1x8x128xbf16> to vector<1x8x128xbf16>
    %424 = vector.broadcast %423 : vector<1x8x128xbf16> to vector<4x8x128xbf16>
    "tpu.trace_start"() <{level = 10 : i32, message = "hqd,hdk->hqk"}> : () -> ()
    %cst_241 = arith.constant dense<0.000000e+00> : vector<4x8x32xf32>
    %425 = tpu.matmul %420, %410, %cst_241 {dimension_numbers = #tpu.dot_dimension_numbers<[2], [1], [1], [2], [0, 0, 0, 1, 1, 2], [0], [0]>} : vector<4x8x128xbf16>, vector<4x128x32xbf16>, vector<4x8x32xf32> -> vector<4x8x32xf32>
    "tpu.trace_stop"() : () -> ()
    "tpu.trace_start"() <{level = 10 : i32, message = "hkd,hdc->hkc"}> : () -> ()
    %cst_242 = arith.constant dense<0.000000e+00> : vector<4x8x32xf32>
    %426 = tpu.matmul %424, %412, %cst_242 {dimension_numbers = #tpu.dot_dimension_numbers<[2], [1], [1], [2], [0, 0, 0, 1, 1, 2], [0], [0]>} : vector<4x8x128xbf16>, vector<4x128x32xbf16>, vector<4x8x32xf32> -> vector<4x8x32xf32>
    %cst_243 = arith.constant dense<0.000000e+00> : vector<4x8x32xf32>
    %427 = tpu.matmul %424, %414, %cst_243 {dimension_numbers = #tpu.dot_dimension_numbers<[2], [1], [1], [2], [0, 0, 0, 1, 1, 2], [0], [0]>} : vector<4x8x128xbf16>, vector<4x128x32xbf16>, vector<4x8x32xf32> -> vector<4x8x32xf32>
    "tpu.trace_stop"() : () -> ()
    %428 = arith.truncf %425 : vector<4x8x32xf32> to vector<4x8x32xbf16>
    %429 = arith.truncf %426 : vector<4x8x32xf32> to vector<4x8x32xbf16>
    "tpu.trace_start"() <{level = 10 : i32, message = "hqc,hkc->hqk"}> : () -> ()
    %cst_244 = arith.constant dense<0.000000e+00> : vector<4x8x8xf32>
    %430 = tpu.matmul %428, %429, %cst_244 {dimension_numbers = #tpu.dot_dimension_numbers<[2], [2], [1], [1], [0, 0, 0, 1, 1, 1], [0], [0]>} : vector<4x8x32xbf16>, vector<4x8x32xbf16>, vector<4x8x8xf32> -> vector<4x8x8xf32>
    "tpu.trace_stop"() : () -> ()
    %cst_245 = arith.constant 0.176776692 : f32
    %431 = vector.broadcast %cst_245 : f32 to vector<4x8x8xf32>
    %432 = arith.mulf %430, %431 : vector<4x8x8xf32>
    %433 = vector.shape_cast %207 : vector<8x8xf32> to vector<1x8x8xf32>
    %434 = vector.broadcast %433 : vector<1x8x8xf32> to vector<4x8x8xf32>
    %435 = arith.addf %432, %434 : vector<4x8x8xf32>
    %cst_246 = arith.constant dense<0xFF800000> : vector<4x8xf32>
    %436 = vector.multi_reduction <maximumf>, %435, %cst_246 [2] : vector<4x8x8xf32> to vector<4x8xf32>
    %437 = vector.shape_cast %436 : vector<4x8xf32> to vector<4x8x1xf32>
    %438 = vector.broadcast %437 : vector<4x8x1xf32> to vector<4x8x8xf32>
    %439 = arith.subf %435, %438 : vector<4x8x8xf32>
    %440 = math.exp %439 : vector<4x8x8xf32>
    %cst_247 = arith.constant dense<0.000000e+00> : vector<4x8xf32>
    %441 = vector.multi_reduction <add>, %440, %cst_247 [2] : vector<4x8x8xf32> to vector<4x8xf32>
    %442 = vector.shape_cast %441 : vector<4x8xf32> to vector<4x8x1xf32>
    %443 = tpu.reciprocal %442 {approx = true} : vector<4x8x1xf32> -> vector<4x8x1xf32>
    %444 = vector.broadcast %443 : vector<4x8x1xf32> to vector<4x8x8xf32>
    %445 = arith.mulf %440, %444 : vector<4x8x8xf32>
    %446 = arith.truncf %445 : vector<4x8x8xf32> to vector<4x8x8xbf16>
    %447 = arith.truncf %427 : vector<4x8x32xf32> to vector<4x8x32xbf16>
    "tpu.trace_start"() <{level = 10 : i32, message = "hqk,hkc->hqc"}> : () -> ()
    %cst_248 = arith.constant dense<0.000000e+00> : vector<4x8x32xf32>
    %448 = tpu.matmul %446, %447, %cst_248 {dimension_numbers = #tpu.dot_dimension_numbers<[2], [1], [1], [2], [0, 0, 0, 1, 1, 2], [0], [0]>} : vector<4x8x8xbf16>, vector<4x8x32xbf16>, vector<4x8x32xf32> -> vector<4x8x32xf32>
    "tpu.trace_stop"() : () -> ()
    %449 = arith.truncf %448 : vector<4x8x32xf32> to vector<4x8x32xbf16>
    "tpu.trace_start"() <{level = 10 : i32, message = "hqc,hcd->hqd"}> : () -> ()
    %cst_249 = arith.constant dense<0.000000e+00> : vector<4x8x128xf32>
    %450 = tpu.matmul %449, %416, %cst_249 {dimension_numbers = #tpu.dot_dimension_numbers<[2], [1], [1], [2], [0, 0, 0, 1, 1, 2], [0], [0]>} : vector<4x8x32xbf16>, vector<4x32x128xbf16>, vector<4x8x128xf32> -> vector<4x8x128xf32>
    "tpu.trace_stop"() : () -> ()
    %cst_250 = arith.constant dense<0.000000e+00> : vector<8x128xf32>
    %451 = vector.multi_reduction <add>, %450, %cst_250 [0] : vector<4x8x128xf32> to vector<8x128xf32>
    %452 = arith.addf %451, %401 : vector<8x128xf32>
    %cst_251 = arith.constant dense<0.000000e+00> : vector<8xf32>
    %453 = vector.multi_reduction <add>, %452, %cst_251 [1] : vector<8x128xf32> to vector<8xf32>
    %454 = vector.shape_cast %453 : vector<8xf32> to vector<8x1xf32>
    %cst_252 = arith.constant 1.280000e+02 : f32
    %455 = vector.broadcast %cst_252 : f32 to vector<8x1xf32>
    %456 = arith.divf %454, %455 : vector<8x1xf32>
    %457 = vector.broadcast %456 : vector<8x1xf32> to vector<8x128xf32>
    %458 = arith.subf %452, %457 : vector<8x128xf32>
    %459 = arith.mulf %458, %458 : vector<8x128xf32>
    %cst_253 = arith.constant dense<0.000000e+00> : vector<8xf32>
    %460 = vector.multi_reduction <add>, %459, %cst_253 [1] : vector<8x128xf32> to vector<8xf32>
    %461 = vector.shape_cast %460 : vector<8xf32> to vector<8x1xf32>
    %cst_254 = arith.constant 1.280000e+02 : f32
    %462 = vector.broadcast %cst_254 : f32 to vector<8x1xf32>
    %463 = arith.divf %461, %462 : vector<8x1xf32>
    %cst_255 = arith.constant 9.99999974E-6 : f32
    %464 = vector.broadcast %cst_255 : f32 to vector<8x1xf32>
    %465 = arith.addf %463, %464 : vector<8x1xf32>
    %466 = math.rsqrt %465 : vector<8x1xf32>
    %467 = vector.broadcast %466 : vector<8x1xf32> to vector<8x128xf32>
    %468 = arith.mulf %458, %467 : vector<8x128xf32>
    %469 = vector.shape_cast %4 : vector<8x128xf32> to vector<1x8x128xf32>
    %470 = vector.shape_cast %469 : vector<1x8x128xf32> to vector<1x8x128xf32>
    %471 = vector.broadcast %470 : vector<1x8x128xf32> to vector<4x8x128xf32>
    "tpu.trace_start"() <{level = 10 : i32, message = "hqk,hkm->hqm"}> : () -> ()
    %cst_256 = arith.constant dense<0.000000e+00> : vector<4x8x128xf32>
    %472 = tpu.matmul %445, %471, %cst_256 {dimension_numbers = #tpu.dot_dimension_numbers<[2], [1], [1], [2], [0, 0, 0, 1, 1, 2], [0], [0]>} : vector<4x8x8xf32>, vector<4x8x128xf32>, vector<4x8x128xf32> -> vector<4x8x128xf32>
    "tpu.trace_stop"() : () -> ()
    %c0_257 = arith.constant 0 : index
    %c1_258 = arith.constant 1 : index
    %c0_259 = arith.constant 0 : index
    %c0_260 = arith.constant 0 : index
    %c0_261 = arith.constant 0 : index
    %473 = vector.load %arg24[%c0_257, %c1_258, %c0_259, %c0_260, %c0_261] : memref<1x2x4x8x128xf32, #tpu.memory_space<vmem>>, vector<1x1x4x8x128xf32>
    %474 = vector.shape_cast %473 : vector<1x1x4x8x128xf32> to vector<4x8x128xf32>
    %475 = vector.shape_cast %472 : vector<4x8x128xf32> to vector<1x1x4x8x128xf32>
    tpu.vector_store %arg24[%c0_257, %c1_258, %c0_259, %c0_260, %c0_261], %475 {strides = array<i32>} : memref<1x2x4x8x128xf32, #tpu.memory_space<vmem>>, vector<1x1x4x8x128xf32>,
    %476 = arith.truncf %468 : vector<8x128xf32> to vector<8x128xbf16>
    %c0_262 = arith.constant 0 : index
    %c0_263 = arith.constant 0 : index
    %477 = vector.load %arg20[%c0_262, %c0_263] : memref<128x128xbf16, #tpu.memory_space<vmem>>, vector<128x128xbf16>
    %cst_264 = arith.constant dense<0.000000e+00> : vector<8x128xf32>
    %478 = tpu.matmul %476, %477, %cst_264 {dimension_numbers = #tpu.dot_dimension_numbers<[1], [0], [0], [1], [0, 0, 1, 1], [], []>} : vector<8x128xbf16>, vector<128x128xbf16>, vector<8x128xf32> -> vector<8x128xf32>
    %c0_265 = arith.constant 0 : index
    %c0_266 = arith.constant 0 : index
    %c0_267 = arith.constant 0 : index
    %479 = vector.load %arg21[%c0_265, %c0_266, %c0_267] : memref<1x8x128xf32, #tpu.memory_space<vmem>>, vector<1x8x128xf32>
    %480 = vector.shape_cast %479 : vector<1x8x128xf32> to vector<8x128xf32>
    %481 = vector.shape_cast %478 : vector<8x128xf32> to vector<1x8x128xf32>
    tpu.vector_store %arg21[%c0_265, %c0_266, %c0_267], %481 {strides = array<i32>} : memref<1x8x128xf32, #tpu.memory_space<vmem>>, vector<1x8x128xf32>,
    return
  }
  func.func @transform_0(%arg0: i32) -> (i32, i32, i32) {
    %c0_i32 = arith.constant 0 : i32
    %c0_i32_0 = arith.constant 0 : i32
    %c0_i32_1 = arith.constant 0 : i32
    return %arg0, %c0_i32, %c0_i32_0 : i32, i32, i32
  }
  func.func @transform_1(%arg0: i32) -> (i32, i32, i32) {
    %c0_i32 = arith.constant 0 : i32
    %c0_i32_0 = arith.constant 0 : i32
    %c0_i32_1 = arith.constant 0 : i32
    return %arg0, %c0_i32, %c0_i32_0 : i32, i32, i32
  }
  func.func @transform_2(%arg0: i32) -> (i32, i32, i32) {
    %c0_i32 = arith.constant 0 : i32
    %c0_i32_0 = arith.constant 0 : i32
    %c0_i32_1 = arith.constant 0 : i32
    return %arg0, %c0_i32, %c0_i32_0 : i32, i32, i32
  }
  func.func @transform_3(%arg0: i32) -> (i32, i32, i32) {
    %c0_i32 = arith.constant 0 : i32
    %c0_i32_0 = arith.constant 0 : i32
    %c0_i32_1 = arith.constant 0 : i32
    return %arg0, %c0_i32, %c0_i32_0 : i32, i32, i32
  }
  func.func @transform_4(%arg0: i32) -> (i32, i32, i32) {
    %c0_i32 = arith.constant 0 : i32
    %c0_i32_0 = arith.constant 0 : i32
    %c0_i32_1 = arith.constant 0 : i32
    return %arg0, %c0_i32, %c0_i32_0 : i32, i32, i32
  }
  func.func @transform_5(%arg0: i32) -> (i32, i32, i32, i32) {
    %c0_i32 = arith.constant 0 : i32
    %c0_i32_0 = arith.constant 0 : i32
    %c0_i32_1 = arith.constant 0 : i32
    %c0_i32_2 = arith.constant 0 : i32
    %c0_i32_3 = arith.constant 0 : i32
    return %c0_i32, %c0_i32_0, %c0_i32_1, %c0_i32_2 : i32, i32, i32, i32
  }
  func.func @transform_6(%arg0: i32) -> (i32, i32, i32, i32) {
    %c0_i32 = arith.constant 0 : i32
    %c0_i32_0 = arith.constant 0 : i32
    %c0_i32_1 = arith.constant 0 : i32
    %c0_i32_2 = arith.constant 0 : i32
    %c0_i32_3 = arith.constant 0 : i32
    return %c0_i32, %c0_i32_0, %c0_i32_1, %c0_i32_2 : i32, i32, i32, i32
  }
  func.func @transform_7(%arg0: i32) -> (i32, i32, i32, i32) {
    %c0_i32 = arith.constant 0 : i32
    %c0_i32_0 = arith.constant 0 : i32
    %c0_i32_1 = arith.constant 0 : i32
    %c0_i32_2 = arith.constant 0 : i32
    %c0_i32_3 = arith.constant 0 : i32
    return %c0_i32, %c0_i32_0, %c0_i32_1, %c0_i32_2 : i32, i32, i32, i32
  }
  func.func @transform_8(%arg0: i32) -> (i32, i32, i32, i32) {
    %c0_i32 = arith.constant 0 : i32
    %c0_i32_0 = arith.constant 0 : i32
    %c0_i32_1 = arith.constant 0 : i32
    %c0_i32_2 = arith.constant 0 : i32
    %c0_i32_3 = arith.constant 0 : i32
    return %c0_i32, %c0_i32_0, %c0_i32_1, %c0_i32_2 : i32, i32, i32, i32
  }
  func.func @transform_9(%arg0: i32) -> (i32, i32, i32) {
    %c0_i32 = arith.constant 0 : i32
    %c0_i32_0 = arith.constant 0 : i32
    %c0_i32_1 = arith.constant 0 : i32
    %c0_i32_2 = arith.constant 0 : i32
    return %c0_i32, %c0_i32_0, %c0_i32_1 : i32, i32, i32
  }
  func.func @transform_10(%arg0: i32) -> (i32, i32, i32) {
    %c0_i32 = arith.constant 0 : i32
    %c0_i32_0 = arith.constant 0 : i32
    %c0_i32_1 = arith.constant 0 : i32
    %c0_i32_2 = arith.constant 0 : i32
    return %c0_i32, %c0_i32_0, %c0_i32_1 : i32, i32, i32
  }
  func.func @transform_11(%arg0: i32) -> (i32, i32, i32, i32) {
    %c0_i32 = arith.constant 0 : i32
    %c0_i32_0 = arith.constant 0 : i32
    %c0_i32_1 = arith.constant 0 : i32
    %c0_i32_2 = arith.constant 0 : i32
    %c0_i32_3 = arith.constant 0 : i32
    return %c0_i32, %c0_i32_0, %c0_i32_1, %c0_i32_2 : i32, i32, i32, i32
  }
  func.func @transform_12(%arg0: i32) -> (i32, i32, i32, i32) {
    %c0_i32 = arith.constant 0 : i32
    %c0_i32_0 = arith.constant 0 : i32
    %c0_i32_1 = arith.constant 0 : i32
    %c0_i32_2 = arith.constant 0 : i32
    %c0_i32_3 = arith.constant 0 : i32
    return %c0_i32, %c0_i32_0, %c0_i32_1, %c0_i32_2 : i32, i32, i32, i32
  }
  func.func @transform_13(%arg0: i32) -> (i32, i32, i32, i32) {
    %c0_i32 = arith.constant 0 : i32
    %c0_i32_0 = arith.constant 0 : i32
    %c0_i32_1 = arith.constant 0 : i32
    %c0_i32_2 = arith.constant 0 : i32
    %c0_i32_3 = arith.constant 0 : i32
    return %c0_i32, %c0_i32_0, %c0_i32_1, %c0_i32_2 : i32, i32, i32, i32
  }
  func.func @transform_14(%arg0: i32) -> (i32, i32, i32, i32) {
    %c0_i32 = arith.constant 0 : i32
    %c0_i32_0 = arith.constant 0 : i32
    %c0_i32_1 = arith.constant 0 : i32
    %c0_i32_2 = arith.constant 0 : i32
    %c0_i32_3 = arith.constant 0 : i32
    return %c0_i32, %c0_i32_0, %c0_i32_1, %c0_i32_2 : i32, i32, i32, i32
  }
  func.func @transform_15(%arg0: i32) -> (i32, i32, i32, i32) {
    %c0_i32 = arith.constant 0 : i32
    %c0_i32_0 = arith.constant 0 : i32
    %c0_i32_1 = arith.constant 0 : i32
    %c0_i32_2 = arith.constant 0 : i32
    %c0_i32_3 = arith.constant 0 : i32
    return %c0_i32, %c0_i32_0, %c0_i32_1, %c0_i32_2 : i32, i32, i32, i32
  }
  func.func @transform_16(%arg0: i32) -> (i32, i32, i32, i32) {
    %c0_i32 = arith.constant 0 : i32
    %c0_i32_0 = arith.constant 0 : i32
    %c0_i32_1 = arith.constant 0 : i32
    %c0_i32_2 = arith.constant 0 : i32
    %c0_i32_3 = arith.constant 0 : i32
    return %c0_i32, %c0_i32_0, %c0_i32_1, %c0_i32_2 : i32, i32, i32, i32
  }
  func.func @transform_17(%arg0: i32) -> (i32, i32, i32, i32) {
    %c0_i32 = arith.constant 0 : i32
    %c0_i32_0 = arith.constant 0 : i32
    %c0_i32_1 = arith.constant 0 : i32
    %c0_i32_2 = arith.constant 0 : i32
    %c0_i32_3 = arith.constant 0 : i32
    return %c0_i32, %c0_i32_0, %c0_i32_1, %c0_i32_2 : i32, i32, i32, i32
  }
  func.func @transform_18(%arg0: i32) -> (i32, i32, i32, i32) {
    %c0_i32 = arith.constant 0 : i32
    %c0_i32_0 = arith.constant 0 : i32
    %c0_i32_1 = arith.constant 0 : i32
    %c0_i32_2 = arith.constant 0 : i32
    %c0_i32_3 = arith.constant 0 : i32
    return %c0_i32, %c0_i32_0, %c0_i32_1, %c0_i32_2 : i32, i32, i32, i32
  }
  func.func @transform_19(%arg0: i32) -> (i32, i32) {
    %c0_i32 = arith.constant 0 : i32
    %c0_i32_0 = arith.constant 0 : i32
    %c0_i32_1 = arith.constant 0 : i32
    return %c0_i32, %c0_i32_0 : i32, i32
  }
  func.func @transform_20(%arg0: i32) -> (i32, i32, i32) {
    %c0_i32 = arith.constant 0 : i32
    %c0_i32_0 = arith.constant 0 : i32
    %c0_i32_1 = arith.constant 0 : i32
    return %arg0, %c0_i32, %c0_i32_0 : i32, i32, i32
  }
  func.func @transform_21(%arg0: i32) -> (i32, i32, i32, i32, i32) {
    %c0_i32 = arith.constant 0 : i32
    %c0_i32_0 = arith.constant 0 : i32
    %c0_i32_1 = arith.constant 0 : i32
    %c0_i32_2 = arith.constant 0 : i32
    %c0_i32_3 = arith.constant 0 : i32
    return %arg0, %c0_i32, %c0_i32_0, %c0_i32_1, %c0_i32_2 : i32, i32, i32, i32, i32
  }
  func.func @transform_22(%arg0: i32) -> (i32, i32, i32, i32, i32) {
    %c0_i32 = arith.constant 0 : i32
    %c0_i32_0 = arith.constant 0 : i32
    %c0_i32_1 = arith.constant 0 : i32
    %c0_i32_2 = arith.constant 0 : i32
    %c0_i32_3 = arith.constant 0 : i32
    return %arg0, %c0_i32, %c0_i32_0, %c0_i32_1, %c0_i32_2 : i32, i32, i32, i32, i32
  }
  func.func @transform_23(%arg0: i32) -> (i32, i32, i32, i32, i32) {
    %c0_i32 = arith.constant 0 : i32
    %c0_i32_0 = arith.constant 0 : i32
    %c0_i32_1 = arith.constant 0 : i32
    %c0_i32_2 = arith.constant 0 : i32
    %c0_i32_3 = arith.constant 0 : i32
    return %arg0, %c0_i32, %c0_i32_0, %c0_i32_1, %c0_i32_2 : i32, i32, i32, i32, i32
  }
}

</mosaic_0001>

<bundles_post_ra>
// kernel: transformer_forward.1
= control target key start
LH: loop header
LB: loop body
LE: loop exit
PB: predicated region body
PF: predicated region fallthrough
CT: control target
= control target key end

     0   :  { %s17416_s0 = inlined_call_operand.vmem [shape: f32[2,8,128], index: 0, kind: input, shape index: {}]   ;;  %s17417_s1 = inlined_call_operand.vmem [shape: f32[2,8,128], index: 1, kind: input, shape index: {}]   ;;  %s17418_s2 = inlined_call_operand.vmem [shape: f32[2,8,8], index: 2, kind: input, shape index: {}, may-alias: {2,4}]   ;;  %s17419_s3 = inlined_call_operand.vmem [shape: f32[2,8,8], index: 3, kind: input, shape index: {}]   ;;  %s17420_s4 = inlined_call_operand.vmem [shape: f32[2,8,8], index: 4, kind: input, shape index: {}, may-alias: {2,4}]   ;;  %s17421_s5 = inlined_call_operand.vmem [shape: bf16[2,4,128,32], index: 5, kind: input, shape index: {}]   ;;  %s17422_s6 = inlined_call_operand.vmem [shape: bf16[2,4,128,32], index: 6, kind: input, shape index: {}]   ;;  %s17423_s7 = inlined_call_operand.vmem [shape: bf16[2,4,128,32], index: 7, kind: input, shape index: {}]   ;;  %s17424_s8 = inlined_call_operand.vmem [shape: bf16[2,4,32,128], index: 8, kind: input, shape index: {}]   ;;  %s17425_s9 = inlined_call_operand.vmem [shape: bf16[2,128,256], index: 9, kind: input, shape index: {}]   ;;  %s17426_s10 = inlined_call_operand.vmem [shape: bf16[2,256,128], index: 10, kind: input, shape index: {}]   ;;  %s17427_s11 = inlined_call_operand.vmem [shape: bf16[2,4,128,32], index: 11, kind: input, shape index: {}]   ;;  %s17428_s12 = inlined_call_operand.vmem [shape: bf16[2,4,128,32], index: 12, kind: input, shape index: {}]   ;;  %s17429_s13 = inlined_call_operand.vmem [shape: bf16[2,4,128,32], index: 13, kind: input, shape index: {}]   ;;  %s17430_s14 = inlined_call_operand.vmem [shape: bf16[2,4,32,128], index: 14, kind: input, shape index: {}]   ;;  %s17431_s15 = inlined_call_operand.vmem [shape: bf16[2,4,128,32], index: 15, kind: input, shape index: {}]   ;;  %s17432_s16 = inlined_call_operand.vmem [shape: bf16[2,4,128,32], index: 16, kind: input, shape index: {}]   ;;  %s17433_s17 = inlined_call_operand.vmem [shape: bf16[2,4,128,32], index: 17, kind: input, shape index: {}]   ;;  %s17434_s18 = inlined_call_operand.vmem [shape: bf16[2,4,32,128], index: 18, kind: input, shape index: {}]   ;;  %s17435_s19 = inlined_call_operand.vmem [shape: bf16[128,128], index: 19, kind: input, shape index: {}]   ;;  %s17436_s20 = inlined_call_operand.vmem [shape: f32[2,8,128], index: 20, kind: output, shape index: {0}]   ;;  %s17437_s21 = inlined_call_operand.vmem [shape: f32[2,2,4,8,128], index: 21, kind: output, shape index: {1}]   ;;  %s17438_s22 = inlined_call_operand.vmem [shape: f32[2,2,4,8,128], index: 22, kind: output, shape index: {2}]   ;;  %s17439_s23 = inlined_call_operand.vmem [shape: f32[2,2,4,8,128], index: 23, kind: output, shape index: {3}]  }
   0x1   :  { %17445 = sst [smem:[#allocation3_spill]] %s17416_s0 }
   0x2   :  { %17446 = sst [smem:[#allocation4_spill]] %s17417_s1 }
   0x3   :  { %17447 = sst [smem:[#allocation5_spill]] %s17418_s2 }
   0x4   :  { %17448 = sst [smem:[#allocation6_spill]] %s17419_s3 }
   0x5   :  { %17449 = sst [smem:[#allocation7_spill]] %s17420_s4  ;;  %s14679_s4 = smov 0  }
   0x6   :  { %17450 = sst [smem:[#allocation8_spill]] %s17421_s5 }
   0x7   :  { %17451 = sst [smem:[#allocation9_spill]] %s17422_s6 }
   0x8   :  { %17452 = sst [smem:[#allocation10_spill]] %s17423_s7 }
   0x9   :  { %17453 = sst [smem:[#allocation11_spill]] %s17435_s19 }
   0xa   :  { %17454 = sst [smem:[#allocation12_spill]] %s17436_s20 }
   0xb   :  { %17455 = sst [smem:[#allocation13_spill]] %s17437_s21 }
   0xc LB: > { %17456 = sst [smem:[#allocation2_spill]] %s14555_s4  ;;  %s10115_s30 = sadd.s32 4294967295, %s14555_s4   ;;  %s14555_s4 = sphi %s14679_s4, %s34_s4  }
   0xd   : > { %p10119_p0 = scmp.ge.s32.totalorder %s14555_s4, 1  ;;  %p679_p1 = scmp.lt.s32.totalorder %s14555_s4, 3 }
   0xf   : > { %p680_p2 = pnand %p10119_p0, %p679_p1 }
  0x10   : > { %s17457_s5 = sld [smem:[#allocation8_spill]] (!%p680_p2)  ;;  %p772_p3 = scmp.lt.s32.totalorder (!%p680_p2), %s10115_s30, 1 }
  0x11   : > { %683 = sbr.rel (%p680_p2) target bundleno = 7412 (0x1cf4), region = 100  ;;  %s17458_s29 = sld [smem:[#allocation3_spill]] (!%p680_p2) }
  0x12   : > { %s17459_s7 = sld [smem:[#allocation9_spill]] (!%p680_p2) }
  0x13   : > { %s17460_s6 = sld [smem:[#allocation10_spill]] (!%p680_p2) }
  0x14   : > { %s17461_s25 = sld [smem:[#allocation5_spill]] (!%p680_p2) }
  0x15   : > { %s17464_s21 = sld [smem:[#allocation13_spill]] (!%p680_p2) }
  0x16   : > { %v13733_v0 = vld [vmem:[%s17457_s5 + $0x38] sm:$0xff]  ;;  %v13732_v3 = vld [vmem:[%s17457_s5 + $0x30] sm:$0xff]  ;;  %v13731_v7 = vld [vmem:[%s17457_s5 + $0x28] sm:$0xff]  ;;  %s17472_s30 = smov (!%p772_p3, %s10115_s30), 1  ;;  %vm1770_vm0 = vcmask 261120   ;;  %vm1911_vm1 = vcmask 1043456  }
  0x17   : > { %v13749_v1 = vld [vmem:[%s17457_s5 + $0xb8] sm:$0xff]  ;;  %1078 = vmatpush.bf16.msra.mxu0 %v13733_v0  ;;  %v13748_v4 = vld [vmem:[%s17457_s5 + $0xb0] sm:$0xff]  ;;  %v13747_v8 = vld [vmem:[%s17457_s5 + $0xa8] sm:$0xff]  ;;  %s14763_s3 = sshll.u32 %s17472_s30, 3  ;;  %vm1855_vm2 = vcmask 64512   ;;  %s15087_s20 = sshll.u32 %s17472_s30, 6 }
  0x18   : > { %v13757_v2 = vld [vmem:[%s17457_s5 + $0xf8] sm:$0xff]  ;;  %1200 = vmatpush.bf16.msra.mxu2 %v13749_v1  ;;  %v13756_v5 = vld [vmem:[%s17457_s5 + $0xf0] sm:$0xff]  ;;  %v13755_v9 = vld [vmem:[%s17457_s5 + $0xe8] sm:$0xff]  ;;  %s775_s4 = scalar_lea.vmem %s17458_s29, %s14763_s3  ;;  %s17465_s29 = sld [smem:[#allocation4_spill]] }
  0x19   : > { %1261 = vmatpush.bf16.msra.mxu3 %v13757_v2  ;;  %v13741_v6 = vld [vmem:[%s17457_s5 + $0x78] sm:$0xff]  ;;  %v13740_v10 = vld [vmem:[%s17457_s5 + $0x70] sm:$0xff]  ;;  %v13730_v11 = vld [vmem:[%s17457_s5 + $0x20] sm:$0xff]  ;;  %s17467_s24 = sld [smem:[#allocation7_spill]]  ;;  %s16600_s0 = scalar_lea.vmem %s17439_s23, %s15087_s20 }
  0x1a   : > { %1139 = vmatpush.bf16.msra.mxu1 %v13741_v6  ;;  %v13746_v12 = vld [vmem:[%s17457_s5 + $0xa0] sm:$0xff]  ;;  %v13739_v14 = vld [vmem:[%s17457_s5 + $0x68] sm:$0xff]  ;;  %v13729_v15 = vld [vmem:[%s17457_s5 + $0x18] sm:$0xff]  ;;  %s15002_s1 = scalar_lea.vmem %s17461_s25, %s14763_s3  ;;  %s16197_s25 = scalar_lea.vmem %s17438_s22, %s15087_s20 }
  0x1b   : > { %1079 = vmatpush.bf16.msra.mxu0 %v13732_v3  ;;  %v13754_v13 = vld [vmem:[%s17457_s5 + $0xe0] sm:$0xff]  ;;  %v13745_v16 = vld [vmem:[%s17457_s5 + $0x98] sm:$0xff]  ;;  %v13728_v19 = vld [vmem:[%s17457_s5 + $0x10] sm:$0xff]  ;;  %s15093_s27 = scalar_lea.vmem %s17464_s21, %s15087_s20  ;;  %s17468_s20 = sld [smem:[#allocation11_spill]] }
  0x1c   : > { %1201 = vmatpush.bf16.msra.mxu2 %v13748_v4  ;;  %v13753_v17 = vld [vmem:[%s17457_s5 + $0xd8] sm:$0xff]  ;;  %v13738_v18 = vld [vmem:[%s17457_s5 + $0x60] sm:$0xff]  ;;  %v13744_v20 = vld [vmem:[%s17457_s5 + $0x90] sm:$0xff] }
  0x1d   : > { %1262 = vmatpush.bf16.msra.mxu3 %v13756_v5  ;;  %v13752_v21 = vld [vmem:[%s17457_s5 + $0xd0] sm:$0xff]  ;;  %v13737_v22 = vld [vmem:[%s17457_s5 + $0x58] sm:$0xff]  ;;  %v13727_v23 = vld [vmem:[%s17457_s5 + $0x8] sm:$0xff] }
  0x1e   : > { %1140 = vmatpush.bf16.msra.mxu1 %v13740_v10  ;;  %v13743_v24 = vld [vmem:[%s17457_s5 + $0x88] sm:$0xff]  ;;  %v13736_v26 = vld [vmem:[%s17457_s5 + $0x50] sm:$0xff]  ;;  %v13726_v27 = vld [vmem:[%s17457_s5] sm:$0xff] }
  0x1f   : > { %1080 = vmatpush.bf16.msra.mxu0 %v13731_v7  ;;  %v13751_v25 = vld [vmem:[%s17457_s5 + $0xc8] sm:$0xff]  ;;  %v13742_v28 = vld [vmem:[%s17457_s5 + $0x80] sm:$0xff]  ;;  %v13765_v31 = vld [vmem:[%s17459_s7 + $0x38] sm:$0xff]  ;;  %s16537_s19 = scalar_lea.vmem %s17467_s24, %s14763_s3 }
  0x20   : > { %1202 = vmatpush.bf16.msra.mxu2 %v13747_v8  ;;  %v14787_v29 = vld [vmem:[%s775_s4] sm:$0xff]  ;;  %v13781_v32 = vld [vmem:[%s17459_s7 + $0xb8] sm:$0xff]  ;;  %v13735_v35 = vld [vmem:[%s17457_s5 + $0x48] sm:$0xff]  ;;  %s17469_s4 = sld [smem:[#allocation12_spill]] }
  0x21   : > { %1263 = vmatpush.bf16.msra.mxu3 %v13755_v9  ;;  %v13750_v30 = vld [vmem:[%s17457_s5 + $0xc0] sm:$0xff]  ;;  %v13789_v33 = vld [vmem:[%s17459_s7 + $0xf8] sm:$0xff]  ;;  %v14803_v34 = vpack.c.bf16 %v14787_v29, %v14787_v29  ;;  %v13764_v36 = vld [vmem:[%s17459_s7 + $0x30] sm:$0xff] }
  0x22   : > { %1141 = vmatpush.bf16.msra.mxu1 %v13739_v14  ;;  %v13780_v37 = vld [vmem:[%s17459_s7 + $0xb0] sm:$0xff]  ;;  %v13734_v39 = vld [vmem:[%s17457_s5 + $0x40] sm:$0xff]  ;;  %v13773_v40 = vld [vmem:[%s17459_s7 + $0x78] sm:$0xff] }
  0x23   : > { %1081 = vmatpush.bf16.msra.mxu0 %v13730_v11  ;;  %v13788_v38 = vld [vmem:[%s17459_s7 + $0xf0] sm:$0xff]  ;;  %v13763_v41 = vld [vmem:[%s17459_s7 + $0x28] sm:$0xff]  ;;  %v13762_v45 = vld [vmem:[%s17459_s7 + $0x20] sm:$0xff] }
  0x24   : > { %1203 = vmatpush.bf16.msra.mxu2 %v13746_v12  ;;  %v13779_v42 = vld [vmem:[%s17459_s7 + $0xa8] sm:$0xff]  ;;  %v13772_v44 = vld [vmem:[%s17459_s7 + $0x70] sm:$0xff]  ;;  %v13778_v46 = vld [vmem:[%s17459_s7 + $0xa0] sm:$0xff] }
  0x25   : > { %1264 = vmatpush.bf16.msra.mxu3 %v13754_v13  ;;  %v13787_v43 = vld [vmem:[%s17459_s7 + $0xe8] sm:$0xff]  ;;  %v13786_v47 = vld [vmem:[%s17459_s7 + $0xe0] sm:$0xff]  ;;  %v13761_v49 = vld [vmem:[%s17459_s7 + $0x18] sm:$0xff] }
  0x26   : > { %1142 = vmatpush.bf16.msra.mxu1 %v13738_v18  ;;  %v13771_v48 = vld [vmem:[%s17459_s7 + $0x68] sm:$0xff]  ;;  %v13777_v50 = vld [vmem:[%s17459_s7 + $0x98] sm:$0xff]  ;;  %v13770_v52 = vld [vmem:[%s17459_s7 + $0x60] sm:$0xff] }
  0x27   : > { %1082 = vmatpush.bf16.msra.mxu0 %v13729_v15  ;;  %v13785_v51 = vld [vmem:[%s17459_s7 + $0xd8] sm:$0xff]  ;;  %v13760_v53 = vld [vmem:[%s17459_s7 + $0x10] sm:$0xff]  ;;  %v13759_v57 = vld [vmem:[%s17459_s7 + $0x8] sm:$0xff] }
  0x28   : > { %1204 = vmatpush.bf16.msra.mxu2 %v13745_v16  ;;  %v13776_v54 = vld [vmem:[%s17459_s7 + $0x90] sm:$0xff]  ;;  %v13769_v56 = vld [vmem:[%s17459_s7 + $0x58] sm:$0xff]  ;;  %v13775_v58 = vld [vmem:[%s17459_s7 + $0x88] sm:$0xff] }
  0x29   : > { %1265 = vmatpush.bf16.msra.mxu3 %v13753_v17  ;;  %v13784_v55 = vld [vmem:[%s17459_s7 + $0xd0] sm:$0xff]  ;;  %v13783_v59 = vld [vmem:[%s17459_s7 + $0xc8] sm:$0xff]  ;;  %v13758_v61 = vld [vmem:[%s17459_s7] sm:$0xff] }
  0x2a   : > { %1143 = vmatpush.bf16.msra.mxu1 %v13737_v22  ;;  %v13768_v60 = vld [vmem:[%s17459_s7 + $0x50] sm:$0xff]  ;;  %v13774_v62 = vld [vmem:[%s17459_s7 + $0x80] sm:$0xff]  ;;  %v13813_v0 = vld [vmem:[%s17460_s6 + $0xb8] sm:$0xff] }
  0x2b   : > { %1083 = vmatpush.bf16.msra.mxu0 %v13728_v19  ;;  %v13782_v63 = vld [vmem:[%s17459_s7 + $0xc0] sm:$0xff]  ;;  %v13821_v1 = vld [vmem:[%s17460_s6 + $0xf8] sm:$0xff]  ;;  %v13767_v2 = vld [vmem:[%s17459_s7 + $0x48] sm:$0xff] }
  0x2c   : > { %1205 = vmatpush.bf16.msra.mxu2 %v13744_v20  ;;  %v13812_v3 = vld [vmem:[%s17460_s6 + $0xb0] sm:$0xff]  ;;  %v13766_v5 = vld [vmem:[%s17459_s7 + $0x40] sm:$0xff]  ;;  %v13805_v6 = vld [vmem:[%s17460_s6 + $0x78] sm:$0xff] }
  0x2d   : > { %1266 = vmatpush.bf16.msra.mxu3 %v13752_v21  ;;  %v13820_v4 = vld [vmem:[%s17460_s6 + $0xf0] sm:$0xff]  ;;  %v13811_v7 = vld [vmem:[%s17460_s6 + $0xa8] sm:$0xff]  ;;  %v13810_v10 = vld [vmem:[%s17460_s6 + $0xa0] sm:$0xff] }
  0x2e   : > { %1144 = vmatpush.bf16.msra.mxu1 %v13736_v26  ;;  %v13819_v8 = vld [vmem:[%s17460_s6 + $0xe8] sm:$0xff]  ;;  %v13804_v9 = vld [vmem:[%s17460_s6 + $0x70] sm:$0xff]  ;;  %v13809_v12 = vld [vmem:[%s17460_s6 + $0x98] sm:$0xff] }
  0x2f   : > { %1084 = vmatpush.bf16.msra.mxu0 %v13727_v23  ;;  %v13803_v11 = vld [vmem:[%s17460_s6 + $0x68] sm:$0xff]  ;;  %v13802_v13 = vld [vmem:[%s17460_s6 + $0x60] sm:$0xff]  ;;  %v13801_v14 = vld [vmem:[%s17460_s6 + $0x58] sm:$0xff] }
  0x30   : > { %1206 = vmatpush.bf16.msra.mxu2 %v13743_v24  ;;  %v13808_v15 = vld [vmem:[%s17460_s6 + $0x90] sm:$0xff]  ;;  %v13818_v16 = vld [vmem:[%s17460_s6 + $0xe0] sm:$0xff]  ;;  %v13807_v18 = vld [vmem:[%s17460_s6 + $0x88] sm:$0xff] }
  0x31   : > { %1267 = vmatpush.bf16.msra.mxu3 %v13751_v25  ;;  %v13800_v17 = vld [vmem:[%s17460_s6 + $0x50] sm:$0xff]  ;;  %v13817_v19 = vld [vmem:[%s17460_s6 + $0xd8] sm:$0xff]  ;;  %v13799_v20 = vld [vmem:[%s17460_s6 + $0x48] sm:$0xff] }
  0x32   : > { %1145 = vmatpush.bf16.msra.mxu1 %v13735_v35  ;;  %v13806_v21 = vld [vmem:[%s17460_s6 + $0x80] sm:$0xff]  ;;  %v13816_v22 = vld [vmem:[%s17460_s6 + $0xd0] sm:$0xff]  ;;  %v13815_v24 = vld [vmem:[%s17460_s6 + $0xc8] sm:$0xff] }
  0x33   : > { %1085 = vmatpush.bf16.msra.mxu0 %v13726_v27  ;;  %v13798_v23 = vld [vmem:[%s17460_s6 + $0x40] sm:$0xff] }
  0x34   : > { %1207 = vmatpush.bf16.msra.mxu2 %v13742_v28  ;;  %v13814_v25 = vld [vmem:[%s17460_s6 + $0xc0] sm:$0xff] }
  0x35   : > { %1268 = vmatpush.bf16.msra.mxu3 %v13750_v30 }
  0x36   : > { %1086 = vmatmul.bf16.vlgmr.msra.gmra.mxu0 %v14803_v34  ;;  %1146 = vmatpush.bf16.msra.mxu1 %v13734_v39 }
  0x37   : > { %1322 = vmatpush.bf16.msrb.mxu0 %v13765_v31  ;;  %1208 = vmatmul.bf16.vlgmr.msra.gmra.mxu2 %v14803_v34 }
  0x38   : > { %1444 = vmatpush.bf16.msrb.mxu2 %v13781_v32  ;;  %1269 = vmatmul.bf16.vlgmr.msra.gmra.mxu3 %v14803_v34 }
  0x39   : > { %1505 = vmatpush.bf16.msrb.mxu3 %v13789_v33  ;;  %1147 = vmatmul.bf16.vlgmr.msra.gmra.mxu1 %v14803_v34 }
  0x3a   : > { %1383 = vmatpush.bf16.msrb.mxu1 %v13773_v40 }
  0x3b   : > { %1323 = vmatpush.bf16.msrb.mxu0 %v13764_v36 }
  0x3c   : > { %1445 = vmatpush.bf16.msrb.mxu2 %v13780_v37 }
  0x3d   : > { %1506 = vmatpush.bf16.msrb.mxu3 %v13788_v38 }
  0x3e   : > { %1384 = vmatpush.bf16.msrb.mxu1 %v13772_v44 }
  0x3f   : > { %1324 = vmatpush.bf16.msrb.mxu0 %v13763_v41 }
  0x40   : > { %1446 = vmatpush.bf16.msrb.mxu2 %v13779_v42 }
  0x41   : > { %1507 = vmatpush.bf16.msrb.mxu3 %v13787_v43 }
  0x42   : > { %1385 = vmatpush.bf16.msrb.mxu1 %v13771_v48 }
  0x43   : > { %1325 = vmatpush.bf16.msrb.mxu0 %v13762_v45 }
  0x44   : > { %1447 = vmatpush.bf16.msrb.mxu2 %v13778_v46 }
  0x45   : > { %1508 = vmatpush.bf16.msrb.mxu3 %v13786_v47 }
  0x46   : > { %1386 = vmatpush.bf16.msrb.mxu1 %v13770_v52 }
  0x47   : > { %1326 = vmatpush.bf16.msrb.mxu0 %v13761_v49 }
  0x48   : > { %1448 = vmatpush.bf16.msrb.mxu2 %v13777_v50 }
  0x49   : > { %1509 = vmatpush.bf16.msrb.mxu3 %v13785_v51 }
  0x4a   : > { %1387 = vmatpush.bf16.msrb.mxu1 %v13769_v56 }
  0x4b   : > { %1327 = vmatpush.bf16.msrb.mxu0 %v13760_v53 }
  0x4c   : > { %1449 = vmatpush.bf16.msrb.mxu2 %v13776_v54 }
  0x4d   : > { %1510 = vmatpush.bf16.msrb.mxu3 %v13784_v55 }
  0x4e   : > { %1388 = vmatpush.bf16.msrb.mxu1 %v13768_v60 }
  0x4f   : > { %1328 = vmatpush.bf16.msrb.mxu0 %v13759_v57 }
  0x50   : > { %1450 = vmatpush.bf16.msrb.mxu2 %v13775_v58 }
  0x51   : > { %1511 = vmatpush.bf16.msrb.mxu3 %v13783_v59 }
  0x52   : > { %1389 = vmatpush.bf16.msrb.mxu1 %v13767_v2 }
  0x53   : > { %1329 = vmatpush.bf16.msrb.mxu0 %v13758_v61 }
  0x54   : > { %1451 = vmatpush.bf16.msrb.mxu2 %v13774_v62 }
  0x55   : > { %1512 = vmatpush.bf16.msrb.mxu3 %v13782_v63 }
  0x56   : > { %1330 = vmatmul.bf16.vlgmr.msrb.gmra.mxu0 %v14803_v34  ;;  %1390 = vmatpush.bf16.msrb.mxu1 %v13766_v5  ;;  %v13796_v5 = vld [vmem:[%s17460_s6 + $0x30] sm:$0xff] }
  0x57   : > { %1452 = vmatmul.bf16.vlgmr.msrb.gmra.mxu2 %v14803_v34 }
  0x58   : > { %1688 = vmatpush.bf16.msra.mxu2 %v13813_v0  ;;  %1513 = vmatmul.bf16.vlgmr.msrb.gmra.mxu3 %v14803_v34 }
  0x59   : > { %1749 = vmatpush.bf16.msra.mxu3 %v13821_v1  ;;  %1391 = vmatmul.bf16.vlgmr.msrb.gmra.mxu1 %v14803_v34 }
  0x5a   : > { %1627 = vmatpush.bf16.msra.mxu1 %v13805_v6 }
  0x5c   : > { %1689 = vmatpush.bf16.msra.mxu2 %v13812_v3 }
  0x5d   : > { %1750 = vmatpush.bf16.msra.mxu3 %v13820_v4  ;;  %v13797_v4 = vld [vmem:[%s17460_s6 + $0x38] sm:$0xff] }
  0x5e   : > { %1628 = vmatpush.bf16.msra.mxu1 %v13804_v9  ;;  %1566 = vmatpush.bf16.msra.mxu0 %v13797_v4 }
  0x60   : > { %1690 = vmatpush.bf16.msra.mxu2 %v13811_v7  ;;  %v820_v7 = vld [vmem:[%s15002_s1] sm:$0xff] }
  0x61   : > { %1751 = vmatpush.bf16.msra.mxu3 %v13819_v8  ;;  %v13795_v8 = vld [vmem:[%s17460_s6 + $0x28] sm:$0xff] }
  0x62   : > { %1629 = vmatpush.bf16.msra.mxu1 %v13803_v11  ;;  %1567 = vmatpush.bf16.msra.mxu0 %v13796_v5  ;;  %v13794_v11 = vld [vmem:[%s17460_s6 + $0x20] sm:$0xff] }
  0x64   : > { %1691 = vmatpush.bf16.msra.mxu2 %v13810_v10 }
  0x65   : > { %1752 = vmatpush.bf16.msra.mxu3 %v13818_v16 }
  0x66   : > { %1630 = vmatpush.bf16.msra.mxu1 %v13802_v13  ;;  %1568 = vmatpush.bf16.msra.mxu0 %v13795_v8 }
  0x68   : > { %1692 = vmatpush.bf16.msra.mxu2 %v13809_v12 }
  0x69   : > { %1753 = vmatpush.bf16.msra.mxu3 %v13817_v19 }
  0x6a   : > { %1631 = vmatpush.bf16.msra.mxu1 %v13801_v14  ;;  %1569 = vmatpush.bf16.msra.mxu0 %v13794_v11  ;;  %v13793_v14 = vld [vmem:[%s17460_s6 + $0x18] sm:$0xff]  ;;  %v13822_v11 = vld [vmem:[%s17424_s8] sm:$0xff] }
  0x6c   : > { %1693 = vmatpush.bf16.msra.mxu2 %v13808_v15 }
  0x6d   : > { %1754 = vmatpush.bf16.msra.mxu3 %v13816_v22 }
  0x6e   : > { %1632 = vmatpush.bf16.msra.mxu1 %v13800_v17  ;;  %1570 = vmatpush.bf16.msra.mxu0 %v13793_v14  ;;  %v13792_v17 = vld [vmem:[%s17460_s6 + $0x10] sm:$0xff] }
  0x6f   : > { %v13824_v14 = vld [vmem:[%s17424_s8 + $0x10] sm:$0xff] }
  0x70   : > { %1694 = vmatpush.bf16.msra.mxu2 %v13807_v18 }
  0x71   : > { %1755 = vmatpush.bf16.msra.mxu3 %v13815_v24 }
  0x72   : > { %1633 = vmatpush.bf16.msra.mxu1 %v13799_v20  ;;  %1571 = vmatpush.bf16.msra.mxu0 %v13792_v17  ;;  %v13828_v17 = vld [vmem:[%s17424_s8 + $0x30] sm:$0xff] }
  0x74   : > { %1695 = vmatpush.bf16.msra.mxu2 %v13806_v21 }
  0x75   : > { %1756 = vmatpush.bf16.msra.mxu3 %v13814_v25 }
  0x76   : > { %1634 = vmatpush.bf16.msra.mxu1 %v13798_v23 }
  0x77   : > { %1696 = vmatmul.bf16.vlgmr.msra.gmra.mxu2 %v14803_v34 }
  0x78   : > { %1757 = vmatmul.bf16.vlgmr.msra.gmra.mxu3 %v14803_v34 }
  0x79   : > { %1635 = vmatmul.bf16.vlgmr.msra.gmra.mxu1 %v14803_v34 }
  0xb3   : > { %v1087_v26 = vpop.f32.mrf.mxu0 }
  0xb4   : > { %v1762_v46 = vpack.c.bf16 %v1087_v26, %v1087_v26 }
  0xb6   : > { %v1148_v30 = vpop.f32.mrf.mxu1 }
  0xb7   : > { %v1763_v55 = vpack.c.bf16 %v1148_v30, %v1148_v30 }
  0xba   : > { %v1209_v27 = vpop.f32.mrf.mxu2 }
  0xbb   : > { %v1270_v28 = vpop.f32.mrf.mxu3  ;;  %v1089_v31 = vpop.f32.mrf.mxu0  ;;  %v1764_v52 = vpack.c.bf16 %v1209_v27, %v1209_v27 }
  0xbc   : > { %v1765_v53 = vpack.c.bf16 %v1270_v28, %v1270_v28 }
  0xbe   : > { %v1150_v35 = vpop.f32.mrf.mxu1 }
  0xc2   : > { %v1211_v32 = vpop.f32.mrf.mxu2 }
  0xc3   : > { %v1272_v33 = vpop.f32.mrf.mxu3  ;;  %v13791_v32 = vld [vmem:[%s17460_s6 + $0x8] sm:$0xff] }
  0xc4   : > { %1572 = vmatpush.bf16.msra.mxu0 %v13791_v32  ;;  %v13790_v33 = vld [vmem:[%s17460_s6] sm:$0xff] }
  0xc8   : > { %1573 = vmatpush.bf16.msra.mxu0 %v13790_v33 }
  0xcb   : > { %1574 = vmatmul.bf16.vlgmr.msra.gmra.mxu0 %v14803_v34 }
  0xd3   : > { %v1331_v36 = vpop.f32.mrf.mxu0 }
  0xd4   : > { %v1766_v37 = vpack.c.bf16 %v1331_v36, %v1331_v36 }
  0xd6   : > { %v1775_v38 = vsel %vm1770_vm0, %v1766_v37, 0  ;;  %v1392_v44 = vpop.f32.mrf.mxu1 }
  0xd7   : > { %1784 = vmatpush.bf16.xpose.msrb.mxu1 %v1775_v38  ;;  %v1767_v45 = vpack.c.bf16 %v1392_v44, %v1392_v44 }
  0xd9   : > { %v1794_v49 = vsel %vm1770_vm0, %v1767_v45, 0 }
  0xda   : > { %v1453_v39 = vpop.f32.mrf.mxu2 }
  0xdb   : > { %v1514_v40 = vpop.f32.mrf.mxu3  ;;  %v1768_v41 = vpack.c.bf16 %v1453_v39, %v1453_v39  ;;  %v1333_v43 = vpop.f32.mrf.mxu0 }
  0xdc   : > { %v1769_v42 = vpack.c.bf16 %v1514_v40, %v1514_v40 }
  0xdd   : > { %v1813_v47 = vsel %vm1770_vm0, %v1768_v41, 0 }
  0xde   : > { %v1832_v48 = vsel %vm1770_vm0, %v1769_v42, 0  ;;  %1822 = vmatpush.bf16.xpose.msrb.mxu2 %v1813_v47  ;;  %10517 = vmatmul.msk.bf16.vlgmr.msrb.gmra.mxu1 %vm1770_vm0, %v1762_v46  ;;  %v1394_v54 = vpop.f32.mrf.mxu1 }
  0xdf   : > { %1841 = vmatpush.bf16.xpose.msrb.mxu3 %v1832_v48  ;;  %1803 = vmatpush.bf16.xpose.msra.mxu1 %v1794_v49 }
  0xe2   : > { %v1455_v50 = vpop.f32.mrf.mxu2 }
  0xe3   : > { %v1516_v51 = vpop.f32.mrf.mxu3 }
  0xe5   : > { %10519 = vmatmul.msk.bf16.vlgmr.msrb.gmra.mxu2 %vm1770_vm0, %v1764_v52 }
  0xe6   : > { %10520 = vmatmul.msk.bf16.vlgmr.msrb.gmra.mxu3 %vm1770_vm0, %v1765_v53 }
  0xee   : > { %10518 = vmatmul.msk.bf16.vlgmr.msra.gmra.mxu1 %vm1770_vm0, %v1763_v55 }
  0xf6   : > { %v1636_v56 = vpop.f32.mrf.mxu1 }
  0xf7   : > { %v1905_v61 = vpack.c.bf16 %v1636_v56, %v1636_v56 }
  0xf9   : > { %v1932_v63 = vsel %vm1911_vm1, %v1905_v61, 0 }
  0xfa   : > { %v1697_v57 = vpop.f32.mrf.mxu2  ;;  %1941 = vmatpush.bf16.msrb.mxu1 %v1932_v63 }
  0xfb   : > { %v1758_v60 = vpop.f32.mrf.mxu3  ;;  %v1906_v62 = vpack.c.bf16 %v1697_v57, %v1697_v57 }
  0xfc   : > { %v1907_v2 = vpack.c.bf16 %v1758_v60, %v1758_v60 }
  0xfd   : > { %v1951_v0 = vsel %vm1911_vm1, %v1906_v62, 0 }
  0xfe   : > { %v1638_v58 = vpop.f32.mrf.mxu1  ;;  %1960 = vmatpush.bf16.msra.mxu2 %v1951_v0  ;;  %v1970_v3 = vsel %vm1911_vm1, %v1907_v2, 0 }
  0xff   : > { %1979 = vmatpush.bf16.msra.mxu3 %v1970_v3 }
 0x102   : > { %v1699_v59 = vpop.f32.mrf.mxu2 }
 0x103   : > { %v1760_v1 = vpop.f32.mrf.mxu3  ;;  %v13823_v59 = vld [vmem:[%s17424_s8 + $0x8] sm:$0xff] }
 0x148   : > { %v1575_v54 = vpop.f32.mrf.mxu0 }
 0x149   : > { %v1904_v55 = vpack.c.bf16 %v1575_v54, %v1575_v54  ;;  %v13844_v54 = vld [vmem:[%s17425_s9 + $0x74] sm:$0xf] }
 0x14b   : > { %v1913_v56 = vsel %vm1911_vm1, %v1904_v55, 0 }
 0x14c   : > { %1922 = vmatpush.bf16.msrb.mxu0 %v1913_v56  ;;  %v10629_v56 = vld [vmem:[%s17425_s9 + $0x78] sm:$0xf0] }
 0x150   : > { %v1577_v57 = vpop.f32.mrf.mxu0  ;;  %2010 = vmatpush.bf16.msra.mxu0 %v13823_v59  ;;  %v10632_v59 = vor.u32 %v13844_v54, %v10629_v56  ;;  %v13851_v54 = vld [vmem:[%s17426_s10 + $0x28] sm:$0xff] }
 0x151   : > { %v10619_v57 = vld [vmem:[%s17425_s9 + $0x60] sm:$0xf] }
 0x154   : > { %2011 = vmatpush.bf16.msra.mxu0 %v13822_v11  ;;  %v13841_v11 = vld [vmem:[%s17425_s9 + $0x54] sm:$0xf0] }
 0x15b   : > { %v1786_v6 = vpop.f32.mrf.mxu1 }
 0x15c   : > { %v1847_v9 = vmul.f32 0.17677669, %v1786_v6 }
 0x15e   : > { %v1851_v10 = vadd.f32 %v1847_v9, %v820_v7 }
 0x160   : > { %v1856_v12 = vsel %vm1855_vm2, %v1851_v10, -inf }
 0x161   : > { %1857 = vmax.xlane.f32.xlu1 %v1856_v12  ;;  %v13825_v12 = vld [vmem:[%s17424_s8 + $0x18] sm:$0xff] }
 0x162   : > { %2038 = vmatpush.bf16.msra.mxu1 %v13825_v12  ;;  %v13840_v12 = vld [vmem:[%s17425_s9 + $0x54] sm:$0xf] }
 0x163   : > { %v1788_v13 = vpop.f32.mrf.mxu1 }
 0x164   : > { %v13827_v13 = vld [vmem:[%s17424_s8 + $0x28] sm:$0xff] }
 0x165   : > { %2066 = vmatpush.bf16.msrb.mxu2 %v13827_v13 }
 0x166   : > { %2039 = vmatpush.bf16.msra.mxu1 %v13824_v14  ;;  %v10613_v14 = vld [vmem:[%s17425_s9 + $0x58] sm:$0xf0] }
 0x168   : > { %v1824_v15 = vpop.f32.mrf.mxu2 }
 0x169   : > { %v1843_v16 = vpop.f32.mrf.mxu3  ;;  %v1849_v18 = vmul.f32 0.17677669, %v1824_v15  ;;  %v13826_v15 = vld [vmem:[%s17424_s8 + $0x20] sm:$0xff] }
 0x16a   : > { %v1850_v21 = vmul.f32 0.17677669, %v1843_v16  ;;  %2067 = vmatpush.bf16.msrb.mxu2 %v13826_v15  ;;  %v13829_v16 = vld [vmem:[%s17424_s8 + $0x38] sm:$0xff]  ;;  %v10616_v15 = vor.u32 %v13840_v12, %v10613_v14  ;;  %v13846_v12 = vld [vmem:[%s17426_s10] sm:$0xff] }
 0x16b   : > { %v1853_v19 = vadd.f32 %v1849_v18, %v820_v7  ;;  %v1805_v20 = vpop.f32.mrf.mxu1  ;;  %2094 = vmatpush.bf16.msrb.mxu3 %v13829_v16  ;;  %v812_v18 = vlaneseq  ;;  %v10603_v16 = vld [vmem:[%s17425_s9 + $0x40] sm:$0xf] }
 0x16c   : > { %v1848_v22 = vmul.f32 0.17677669, %v1805_v20  ;;  %v1854_v28 = vadd.f32 %v1850_v21, %v820_v7 }
 0x16d   : > { %v1862_v23 = vsel %vm1855_vm2, %v1853_v19, -inf  ;;  %v813_v21 = vshrl.u32 %v812_v18, 7 }
 0x16e   : > { %1863 = vmax.xlane.f32.xlu0 %v1862_v23  ;;  %v1852_v24 = vadd.f32 %v1848_v22, %v820_v7  ;;  %v1865_v31 = vsel %vm1855_vm2, %v1854_v28, -inf  ;;  %v815_v22 = vand.u32 127, %v812_v18  ;;  %v13838_v18 = vld [vmem:[%s17425_s9 + $0x44] sm:$0xf] }
 0x16f   : > { %2095 = vmatpush.bf16.msrb.mxu3 %v13828_v17  ;;  %v13839_v17 = vld [vmem:[%s17425_s9 + $0x44] sm:$0xf0] }
 0x170   : > { %v1826_v25 = vpop.f32.mrf.mxu2  ;;  %v1859_v27 = vsel %vm1855_vm2, %v1852_v24, -inf  ;;  %vm15062_vm3 = vcmp.eq.s32.totalorder %v813_v21, %v815_v22  ;;  %v10595_v22 = vld [vmem:[%s17425_s9 + $0x30] sm:$0xf] }
 0x171   : > { %v1845_v26 = vpop.f32.mrf.mxu3  ;;  %1860 = vmax.xlane.f32.xlu1 %v1859_v27 }
 0x173   : > { %v1807_v30 = vpop.f32.mrf.mxu1 }
 0x176   : > { %1866 = vmax.xlane.f32.xlu0 %v1865_v31 }
 0x1d4   : > { %v1858_v35 = vpop.xlane.xlu1 %1857 }
 0x1d5   : > { %v1868_v36 = vsub.f32 %v1851_v10, %v1858_v35 }
 0x1d7   : > { %v1872_v37 = vmul.f32 1.442695, %v1868_v36 }
 0x1d9   : > { %14432 = vpow2.f32 %v1872_v37 }
 0x1df   : > { %v14433_v38 = vpop.eup %14432 }
 0x1e0   : > { %v1880_v40 = vsel %vm1855_vm2, %v14433_v38, 0.0 }
 0x1e1   : > { %v1864_v39 = vpop.xlane.xlu0 %1863  ;;  %1881 = vadd.xlane.f32.xlu0 %v1880_v40 }
 0x1e2   : > { %v1870_v41 = vsub.f32 %v1853_v19, %v1864_v39 }
 0x1e4   : > { %v1876_v42 = vmul.f32 1.442695, %v1870_v41  ;;  %v1861_v43 = vpop.xlane.xlu1 %1860 }
 0x1e5   : > { %v1869_v44 = vsub.f32 %v1852_v24, %v1861_v43  ;;  %v14557_v24 = vmov 1.0  }
 0x1e6   : > { %14434 = vpow2.f32 %v1876_v42 }
 0x1e7   : > { %v1874_v45 = vmul.f32 1.442695, %v1869_v44 }
 0x1e9   : > { %v1867_v46 = vpop.xlane.xlu0 %1866  ;;  %14436 = vpow2.f32 %v1874_v45 }
 0x1ea   : > { %v1871_v47 = vsub.f32 %v1854_v28, %v1867_v46 }
 0x1ec   : > { %v14435_v48 = vpop.eup %14434  ;;  %v1878_v34 = vmul.f32 1.442695, %v1871_v47 }
 0x1ed   : > { %v1886_v49 = vsel %vm1855_vm2, %v14435_v48, 0.0 }
 0x1ee   : > { %14438 = vpow2.f32 %v1878_v34  ;;  %1887 = vadd.xlane.f32.xlu2 %v1886_v49 }
 0x1ef   : > { %v14437_v50 = vpop.eup %14436 }
 0x1f0   : > { %v1883_v51 = vsel %vm1855_vm2, %v14437_v50, 0.0 }
 0x1f1   : > { %1884 = vadd.xlane.f32.xlu1 %v1883_v51  ;;  %v14558_v51 = vmov 128.0  }
 0x1f4   : > { %v14439_v52 = vpop.eup %14438 }
 0x1f5   : > { %v1889_v53 = vsel %vm1855_vm2, %v14439_v52, 0.0 }
 0x1f6   : > { %1890 = vadd.xlane.f32.xlu2 %v1889_v53  ;;  %v13845_v53 = vld [vmem:[%s17425_s9 + $0x74] sm:$0xf0] }
 0x254   : > { %v1882_v58 = vpop.xlane.xlu0 %1881 }
 0x255   : > { %14440 = vrcp.f32 %v1882_v58  ;;  %v13843_v58 = vld [vmem:[%s17425_s9 + $0x64] sm:$0xf0] }
 0x25b   : > { %v14441_v60 = vpop.eup %14440 }
 0x25c   : > { %v1896_v61 = vmul.f32 %v14441_v60, %v14433_v38  ;;  %v13842_v60 = vld [vmem:[%s17425_s9 + $0x64] sm:$0xf] }
 0x25e   : > { %v1900_v62 = vpack.c.bf16 %v1896_v61, %v1896_v61 }
 0x260   : > { %10521 = vmatmul.msk.bf16.vlgmr.msrb.gmra.mxu0 %vm1855_vm2, %v1900_v62  ;;  %v10620_v62 = vor.u32 %v13843_v58, %v10619_v57  ;;  %v13850_v57 = vld [vmem:[%s17426_s10 + $0x20] sm:$0xff] }
 0x261   : > { %v1888_v63 = vpop.xlane.xlu2 %1887  ;;  %v13858_v58 = vld [vmem:[%s17426_s10 + $0x60] sm:$0xff] }
 0x262   : > { %14442 = vrcp.f32 %v1888_v63 }
 0x264   : > { %v1885_v0 = vpop.xlane.xlu1 %1884 }
 0x265   : > { %14444 = vrcp.f32 %v1885_v0 }
 0x268   : > { %v14443_v1 = vpop.eup %14442 }
 0x269   : > { %v1898_v2 = vmul.f32 %v14443_v1, %v14435_v48  ;;  %v1891_v3 = vpop.xlane.xlu2 %1890 }
 0x26a   : > { %14446 = vrcp.f32 %v1891_v3 }
 0x26b   : > { %v1902_v4 = vpack.c.bf16 %v1898_v2, %v1898_v2  ;;  %v14445_v5 = vpop.eup %14444  ;;  %14448 = vrcp.f32 %v14558_v51  ;;  %v13860_v51 = vld [vmem:[%s17426_s10 + $0x70] sm:$0xff] }
 0x26c   : > { %v1897_v6 = vmul.f32 %v14445_v5, %v14437_v50 }
 0x26d   : > { %10523 = vmatmul.msk.bf16.vlgmr.msra.gmra.mxu2 %vm1855_vm2, %v1902_v4 }
 0x26e   : > { %v1901_v7 = vpack.c.bf16 %v1897_v6, %v1897_v6  ;;  %10561 = vmatpush.msk.msra.mxu2 %vm15062_vm3, %v14557_v24 }
 0x270   : > { %v14447_v8 = vpop.eup %14446  ;;  %10522 = vmatmul.msk.bf16.vlgmr.msrb.gmra.mxu1 %vm1855_vm2, %v1901_v7 }
 0x271   : > { %v1899_v9 = vmul.f32 %v14447_v8, %v14439_v52  ;;  %v10627_v52 = vld [vmem:[%s17425_s9 + $0x70] sm:$0xf]  ;;  %v14449_v63 = vpop.eup %14448  ;;  %2366 = vmatpush.bf16.msrb.mxu1 %v10632_v59  ;;  %v13849_v59 = vld [vmem:[%s17426_s10 + $0x18] sm:$0xff] }
 0x272   : > { %v10628_v55 = vor.u32 %v13845_v53, %v10627_v52  ;;  %v2108_v1 = vmul.f32 128.0, %v14449_v63  ;;  %vm2112_vm4 = vweird.f32 %v14449_v63 }
 0x273   : > { %v1903_v10 = vpack.c.bf16 %v1899_v9, %v1899_v9 }
 0x274   : > { %2353 = vmatpush.bf16.msrb.mxu0 %v10628_v55  ;;  %v13859_v55 = vld [vmem:[%s17426_s10 + $0x68] sm:$0xff] }
 0x275   : > { %10524 = vmatmul.msk.bf16.vlgmr.msra.gmra.mxu3 %vm1855_vm2, %v1903_v10  ;;  %v10611_v10 = vld [vmem:[%s17425_s9 + $0x50] sm:$0xf] }
 0x276   : > { %10563 = vmatpush.msk.msra.mxu3 %vm15062_vm3, %v14557_v24  ;;  %v10612_v13 = vor.u32 %v13841_v11, %v10611_v10 }
 0x278   : > { %2354 = vmatpush.bf16.msrb.mxu0 %v10620_v62 }
 0x27c   : > { %2355 = vmatpush.bf16.msrb.mxu0 %v10612_v13  ;;  %v13854_v13 = vld [vmem:[%s17426_s10 + $0x40] sm:$0xff] }
 0x2dd   : > { %v1924_v19 = vpop.f32.mrf.mxu0 }
 0x2de   : > { %v1985_v20 = vpack.c.bf16 %v1924_v19, %v1924_v19  ;;  %v10604_v19 = vor.u32 %v13839_v17, %v10603_v16 }
 0x2e0   : > { %10533 = vmatmul.msk.bf16.vlgmr.msra.gmra.mxu0 %vm1770_vm0, %v1985_v20  ;;  %v10605_v20 = vld [vmem:[%s17425_s9 + $0x48] sm:$0xf0] }
 0x2e1   : > { %v10608_v21 = vor.u32 %v13838_v18, %v10605_v20  ;;  %2356 = vmatpush.bf16.msrb.mxu0 %v10604_v19 }
 0x2e5   : > { %v1926_v25 = vpop.f32.mrf.mxu0 }
 0x2e6   : > { %v13837_v25 = vld [vmem:[%s17425_s9 + $0x34] sm:$0xf0] }
 0x2ed   : > { %v1943_v26 = vpop.f32.mrf.mxu1 }
 0x2ee   : > { %v1986_v27 = vpack.c.bf16 %v1943_v26, %v1943_v26  ;;  %v13836_v26 = vld [vmem:[%s17425_s9 + $0x34] sm:$0xf] }
 0x2f0   : > { %v1962_v28 = vpop.f32.mrf.mxu2  ;;  %10542 = vmatmul.msk.bf16.vlgmr.msra.gmra.mxu1 %vm1770_vm0, %v1986_v27  ;;  %v10596_v27 = vor.u32 %v13837_v25, %v10595_v22 }
 0x2f1   : > { %v1987_v30 = vpack.c.bf16 %v1962_v28, %v1962_v28  ;;  %v10597_v28 = vld [vmem:[%s17425_s9 + $0x38] sm:$0xf0] }
 0x2f2   : > { %2357 = vmatpush.bf16.msrb.mxu0 %v10596_v27 }
 0x2f3   : > { %10551 = vmatmul.msk.bf16.vlgmr.msrb.gmra.mxu2 %vm1770_vm0, %v1987_v30  ;;  %v10600_v30 = vor.u32 %v13836_v26, %v10597_v28 }
 0x2f4   : > { %10565 = vmatpush.msk.msrb.mxu2 %vm15062_vm3, %v14557_v24 }
 0x2f5   : > { %v1945_v31 = vpop.f32.mrf.mxu1 }
 0x2f6   : > { %v10587_v31 = vld [vmem:[%s17425_s9 + $0x20] sm:$0xf] }
 0x2f8   : > { %v1964_v32 = vpop.f32.mrf.mxu2  ;;  %v1981_v33 = vpop.f32.mrf.mxu3 }
 0x2f9   : > { %v1988_v35 = vpack.c.bf16 %v1981_v33, %v1981_v33  ;;  %v13835_v32 = vld [vmem:[%s17425_s9 + $0x24] sm:$0xf0]  ;;  %v13834_v33 = vld [vmem:[%s17425_s9 + $0x24] sm:$0xf] }
 0x2fb   : > { %10560 = vmatmul.msk.bf16.vlgmr.msrb.gmra.mxu3 %vm1770_vm0, %v1988_v35  ;;  %v10588_v35 = vor.u32 %v13835_v32, %v10587_v31  ;;  %v13877_v31 = vld [vmem:[%s17457_s5 + $0x178] sm:$0xff] }
 0x2fc   : > { %10567 = vmatpush.msk.msrb.mxu3 %vm15062_vm3, %v14557_v24  ;;  %v13885_v32 = vld [vmem:[%s17457_s5 + $0x1b8] sm:$0xff] }
 0x2fd   : > { %2358 = vmatpush.bf16.msrb.mxu0 %v10588_v35  ;;  %v13868_v35 = vld [vmem:[%s17457_s5 + $0x130] sm:$0xff] }
 0x300   : > { %v1983_v36 = vpop.f32.mrf.mxu3 }
 0x301   : > { %v10589_v36 = vld [vmem:[%s17425_s9 + $0x28] sm:$0xf0] }
 0x303   : > { %10562 = vmatmul.msk.f32.vlgmr.msra.gmra.mxu2 %vm1855_vm2, %v1896_v61  ;;  %v10621_v61 = vld [vmem:[%s17425_s9 + $0x68] sm:$0xf0] }
 0x304   : > { %v10624_v0 = vor.u32 %v13842_v60, %v10621_v61  ;;  %v13857_v60 = vld [vmem:[%s17426_s10 + $0x58] sm:$0xff] }
 0x306   : > { %2367 = vmatpush.bf16.msrb.mxu1 %v10624_v0  ;;  %v13856_v0 = vld [vmem:[%s17426_s10 + $0x50] sm:$0xff] }
 0x30a   : > { %2368 = vmatpush.bf16.msrb.mxu1 %v10616_v15 }
 0x30b   : > { %10564 = vmatmul.msk.f32.vlgmr.msra.gmra.mxu3 %vm1855_vm2, %v1897_v6  ;;  %10566 = vmatmul.msk.f32.vlgmr.msrb.gmra.mxu2 %vm1855_vm2, %v1898_v2  ;;  %v2109_v2 = vsub.f32 1.0, %v2108_v1 }
 0x30d   : > { %v2110_v3 = vmul.f32 %v14449_v63, %v2109_v2 }
 0x30e   : > { %2369 = vmatpush.bf16.msrb.mxu1 %v10608_v21 }
 0x30f   : > { %v2111_v4 = vadd.f32 %v14449_v63, %v2110_v3  ;;  %v13847_v3 = vld [vmem:[%s17426_s10 + $0x8] sm:$0xff] }
 0x311   : > { %v15123_v5 = vsel %vm2112_vm4, %v14449_v63, %v2111_v4  ;;  %v13848_v63 = vld [vmem:[%s17426_s10 + $0x10] sm:$0xff]  ;;  %v13855_v4 = vld [vmem:[%s17426_s10 + $0x48] sm:$0xff] }
 0x312   : > { %2370 = vmatpush.bf16.msrb.mxu1 %v10600_v30  ;;  %v13869_v30 = vld [vmem:[%s17457_s5 + $0x138] sm:$0xff] }
 0x313   : > { %10568 = vmatmul.msk.f32.vlgmr.msrb.gmra.mxu3 %vm1855_vm2, %v1899_v9 }
 0x35d   : > { %v2013_v37 = vpop.f32.mrf.mxu0 }
 0x365   : > { %v2015_v38 = vpop.f32.mrf.mxu0 }
 0x366   : > { %v10579_v38 = vld [vmem:[%s17425_s9 + $0x10] sm:$0xf] }
 0x36d   : > { %v2041_v39 = vpop.f32.mrf.mxu1 }
 0x36e   : > { %v2101_v42 = vadd.f32 %v2041_v39, %v2013_v37  ;;  %v10592_v37 = vor.u32 %v13834_v33, %v10589_v36  ;;  %v13833_v39 = vld [vmem:[%s17425_s9 + $0x14] sm:$0xf0]  ;;  %v13876_v36 = vld [vmem:[%s17457_s5 + $0x170] sm:$0xff] }
 0x36f   : > { %v13893_v33 = vld [vmem:[%s17457_s5 + $0x1f8] sm:$0xff] }
 0x370   : > { %2371 = vmatpush.bf16.msrb.mxu1 %v10592_v37  ;;  %v13884_v37 = vld [vmem:[%s17457_s5 + $0x1b0] sm:$0xff] }
 0x375   : > { %v2043_v40 = vpop.f32.mrf.mxu1 }
 0x376   : > { %v2069_v41 = vpop.f32.mrf.mxu2  ;;  %v13832_v40 = vld [vmem:[%s17425_s9 + $0x14] sm:$0xf] }
 0x377   : > { %v2102_v43 = vadd.f32 %v2101_v42, %v2069_v41  ;;  %v10580_v41 = vor.u32 %v13833_v39, %v10579_v38  ;;  %v10581_v42 = vld [vmem:[%s17425_s9 + $0x18] sm:$0xf0]  ;;  %v13892_v38 = vld [vmem:[%s17457_s5 + $0x1f0] sm:$0xff]  ;;  %v13867_v39 = vld [vmem:[%s17457_s5 + $0x128] sm:$0xff] }
 0x379   : > { %2359 = vmatpush.bf16.msrb.mxu0 %v10580_v41  ;;  %v13883_v41 = vld [vmem:[%s17457_s5 + $0x1a8] sm:$0xff] }
 0x37e   : > { %v2071_v44 = vpop.f32.mrf.mxu2  ;;  %v2097_v45 = vpop.f32.mrf.mxu3 }
 0x37f   : > { %v2103_v46 = vadd.f32 %v2102_v43, %v2097_v45  ;;  %v10584_v43 = vor.u32 %v13832_v40, %v10581_v42  ;;  %v10571_v44 = vld [vmem:[%s17425_s9] sm:$0xf]  ;;  %v13831_v45 = vld [vmem:[%s17425_s9 + $0x4] sm:$0xf0] }
 0x380   : > { %v13875_v40 = vld [vmem:[%s17457_s5 + $0x168] sm:$0xff] }
 0x381   : > { %v2104_v47 = vadd.f32 %v2103_v46, %v14787_v29  ;;  %2372 = vmatpush.bf16.msrb.mxu1 %v10584_v43  ;;  %v13830_v46 = vld [vmem:[%s17425_s9 + $0x4] sm:$0xf]  ;;  %v13891_v42 = vld [vmem:[%s17457_s5 + $0x1e8] sm:$0xff] }
 0x382   : > { %v13866_v43 = vld [vmem:[%s17457_s5 + $0x120] sm:$0xff] }
 0x383   : > { %2105 = vadd.xlane.f32.xlu2 %v2104_v47 }
 0x386   : > { %v2099_v48 = vpop.f32.mrf.mxu3  ;;  %v2152_v34 = vpop.f32.mrf.mxu2 }
 0x387   : > { %2525 = vst [vmem:[%s15093_s27] sm:$0xff] %v2152_v34  ;;  %v10573_v48 = vld [vmem:[%s17425_s9 + $0x8] sm:$0xf0] }
 0x388   : > { %v10576_v34 = vor.u32 %v13830_v46, %v10573_v48  ;;  %v13890_v46 = vld [vmem:[%s17457_s5 + $0x1e0] sm:$0xff]  ;;  %v13873_v48 = vld [vmem:[%s17457_s5 + $0x158] sm:$0xff] }
 0x38a   : > { %2373 = vmatpush.bf16.msrb.mxu1 %v10576_v34  ;;  %v13881_v34 = vld [vmem:[%s17457_s5 + $0x198] sm:$0xff] }
 0x38e   : > { %v2175_v49 = vpop.f32.mrf.mxu3  ;;  %v2198_v50 = vpop.f32.mrf.mxu2  ;;  %2851 = vmatpush.bf16.msra.mxu1 %v13877_v31  ;;  %v13911_v31 = vld [vmem:[%s17459_s7 + $0x188] sm:$0xff] }
 0x38f   : > { %2526 = vst [vmem:[%s15093_s27 + $0x8] sm:$0xff] %v2175_v49  ;;  %v13853_v49 = vld [vmem:[%s17426_s10 + $0x38] sm:$0xff] }
 0x390   : > { %2527 = vst [vmem:[%s15093_s27 + $0x10] sm:$0xff] %v2198_v50  ;;  %v13861_v50 = vld [vmem:[%s17426_s10 + $0x78] sm:$0xff]  ;;  %2479 = vmatpush.bf16.msra.mxu2 %v13853_v49 }
 0x391   : > { %2492 = vmatpush.bf16.msra.mxu3 %v13861_v50  ;;  %v13889_v49 = vld [vmem:[%s17457_s5 + $0x1d8] sm:$0xff]  ;;  %v13864_v50 = vld [vmem:[%s17457_s5 + $0x110] sm:$0xff] }
 0x392   : > { %2852 = vmatpush.bf16.msra.mxu1 %v13876_v36  ;;  %v13910_v36 = vld [vmem:[%s17459_s7 + $0x180] sm:$0xff] }
 0x395   : > { %2493 = vmatpush.bf16.msra.mxu3 %v13860_v51  ;;  %v13880_v51 = vld [vmem:[%s17457_s5 + $0x190] sm:$0xff] }
 0x396   : > { %v2221_v29 = vpop.f32.mrf.mxu3  ;;  %2853 = vmatpush.bf16.msra.mxu1 %v13875_v40 }
 0x397   : > { %2528 = vst [vmem:[%s15093_s27 + $0x18] sm:$0xff] %v2221_v29  ;;  %v13852_v29 = vld [vmem:[%s17426_s10 + $0x30] sm:$0xff] }
 0x398   : > { %2480 = vmatpush.bf16.msra.mxu2 %v13852_v29  ;;  %v13872_v29 = vld [vmem:[%s17457_s5 + $0x150] sm:$0xff] }
 0x399   : > { %2494 = vmatpush.bf16.msra.mxu3 %v13859_v55  ;;  %v13879_v55 = vld [vmem:[%s17457_s5 + $0x188] sm:$0xff] }
 0x39c   : > { %2481 = vmatpush.bf16.msra.mxu2 %v13851_v54  ;;  %v13871_v54 = vld [vmem:[%s17457_s5 + $0x148] sm:$0xff] }
 0x39d   : > { %2495 = vmatpush.bf16.msra.mxu3 %v13858_v58 }
 0x3a0   : > { %2482 = vmatpush.bf16.msra.mxu2 %v13850_v57 }
 0x3a1   : > { %2496 = vmatpush.bf16.msra.mxu3 %v13857_v60  ;;  %v13870_v60 = vld [vmem:[%s17457_s5 + $0x140] sm:$0xff] }
 0x3a4   : > { %2483 = vmatpush.bf16.msra.mxu2 %v13849_v59  ;;  %v13862_v59 = vld [vmem:[%s17457_s5 + $0x100] sm:$0xff] }
 0x3a5   : > { %2497 = vmatpush.bf16.msra.mxu3 %v13856_v0  ;;  %v13901_v0 = vld [vmem:[%s17459_s7 + $0x138] sm:$0xff] }
 0x3a8   : > { %2484 = vmatpush.bf16.msra.mxu2 %v13848_v63 }
 0x3a9   : > { %2498 = vmatpush.bf16.msra.mxu3 %v13855_v4  ;;  %v13925_v4 = vld [vmem:[%s17459_s7 + $0x1f8] sm:$0xff] }
 0x3ac   : > { %2485 = vmatpush.bf16.msra.mxu2 %v13847_v3 }
 0x3ad   : > { %2499 = vmatpush.bf16.msra.mxu3 %v13854_v13  ;;  %v13915_v13 = vld [vmem:[%s17459_s7 + $0x1a8] sm:$0xff] }
 0x3b0   : > { %2486 = vmatpush.bf16.msra.mxu2 %v13846_v12  ;;  %v13907_v12 = vld [vmem:[%s17459_s7 + $0x168] sm:$0xff] }
 0x3b1   : > { %2973 = vmatpush.bf16.msrb.mxu3 %v13893_v33  ;;  %v13894_v33 = vld [vmem:[%s17459_s7 + $0x100] sm:$0xff] }
 0x3b4   : > { %2912 = vmatpush.bf16.msrb.mxu2 %v13885_v32  ;;  %v13919_v32 = vld [vmem:[%s17459_s7 + $0x1c8] sm:$0xff] }
 0x3b5   : > { %2974 = vmatpush.bf16.msrb.mxu3 %v13892_v38 }
 0x3b8   : > { %2913 = vmatpush.bf16.msrb.mxu2 %v13884_v37  ;;  %v13918_v37 = vld [vmem:[%s17459_s7 + $0x1c0] sm:$0xff] }
 0x3b9   : > { %2975 = vmatpush.bf16.msrb.mxu3 %v13891_v42 }
 0x3bc   : > { %2914 = vmatpush.bf16.msrb.mxu2 %v13883_v41 }
 0x3bd   : > { %2976 = vmatpush.bf16.msrb.mxu3 %v13890_v46 }
 0x3c1   : > { %2977 = vmatpush.bf16.msrb.mxu3 %v13889_v49  ;;  %v13933_v49 = vld [vmem:[%s17460_s6 + $0x138] sm:$0xff] }
 0x3f6   : > { %v2106_v6 = vpop.xlane.xlu2 %2105 }
 0x3f7   : > { %v2114_v7 = vmul.f32 %v15123_v5, %v2106_v6 }
 0x3f9   : > { %v15126_v8 = vsub.f32 %v2104_v47, %v2114_v7  ;;  %v10572_v47 = vor.u32 %v13831_v45, %v10571_v44  ;;  %v13874_v44 = vld [vmem:[%s17457_s5 + $0x160] sm:$0xff] }
 0x3fa   : > { %v13882_v45 = vld [vmem:[%s17457_s5 + $0x1a0] sm:$0xff]  ;;  %2854 = vmatpush.bf16.msra.mxu1 %v13874_v44 }
 0x3fb   : > { %v2116_v9 = vmul.f32 %v15126_v8, %v15126_v8  ;;  %2360 = vmatpush.bf16.msrb.mxu0 %v10572_v47  ;;  %v13865_v47 = vld [vmem:[%s17457_s5 + $0x118] sm:$0xff]  ;;  %2915 = vmatpush.bf16.msrb.mxu2 %v13882_v45 }
 0x3fd   : > { %2117 = vadd.xlane.f32.xlu0 %v2116_v9 }
 0x3fe   : > { %2855 = vmatpush.bf16.msra.mxu1 %v13873_v48 }
 0x3ff   : > { %2790 = vmatpush.bf16.msra.mxu0 %v13869_v30  ;;  %2916 = vmatpush.bf16.msrb.mxu2 %v13881_v34  ;;  %v13903_v30 = vld [vmem:[%s17459_s7 + $0x148] sm:$0xff] }
 0x402   : > { %2856 = vmatpush.bf16.msra.mxu1 %v13872_v29  ;;  %v13949_v29 = vld [vmem:[%s17460_s6 + $0x1b8] sm:$0xff] }
 0x403   : > { %2791 = vmatpush.bf16.msra.mxu0 %v13868_v35  ;;  %2917 = vmatpush.bf16.msrb.mxu2 %v13880_v51  ;;  %v13902_v35 = vld [vmem:[%s17459_s7 + $0x140] sm:$0xff]  ;;  %v13957_v51 = vld [vmem:[%s17460_s6 + $0x1f8] sm:$0xff] }
 0x406   : > { %2857 = vmatpush.bf16.msra.mxu1 %v13871_v54  ;;  %v13948_v54 = vld [vmem:[%s17460_s6 + $0x1b0] sm:$0xff] }
 0x407   : > { %2792 = vmatpush.bf16.msra.mxu0 %v13867_v39  ;;  %2918 = vmatpush.bf16.msrb.mxu2 %v13879_v55  ;;  %v13956_v55 = vld [vmem:[%s17460_s6 + $0x1f0] sm:$0xff] }
 0x40a   : > { %2858 = vmatpush.bf16.msra.mxu1 %v13870_v60  ;;  %v13930_v60 = vld [vmem:[%s17460_s6 + $0x120] sm:$0xff] }
 0x40b   : > { %2793 = vmatpush.bf16.msra.mxu0 %v13866_v43 }
 0x40f   : > { %2794 = vmatpush.bf16.msra.mxu0 %v13865_v47 }
 0x413   : > { %2795 = vmatpush.bf16.msra.mxu0 %v13864_v50  ;;  %v13941_v50 = vld [vmem:[%s17460_s6 + $0x178] sm:$0xff] }
 0x470   : > { %v2118_v52 = vpop.xlane.xlu0 %2117 }
 0x471   : > { %v2119_v53 = vmul.f32 %v2118_v52, %v15123_v5  ;;  %v13888_v52 = vld [vmem:[%s17457_s5 + $0x1d0] sm:$0xff] }
 0x472   : > { %2978 = vmatpush.bf16.msrb.mxu3 %v13888_v52  ;;  %v13932_v52 = vld [vmem:[%s17460_s6 + $0x130] sm:$0xff] }
 0x473   : > { %v2120_v56 = vadd.f32 1e-05, %v2119_v53  ;;  %v13863_v53 = vld [vmem:[%s17457_s5 + $0x108] sm:$0xff] }
 0x474   : > { %2796 = vmatpush.bf16.msra.mxu0 %v13863_v53  ;;  %v13940_v53 = vld [vmem:[%s17460_s6 + $0x170] sm:$0xff] }
 0x475   : > { %14450 = vrsqrt.f32 %v2120_v56  ;;  %vm2127_vm6 = vweird.f32 %v2120_v56 }
 0x478   : > { %2797 = vmatpush.bf16.msra.mxu0 %v13862_v59  ;;  %v13955_v59 = vld [vmem:[%s17460_s6 + $0x1e8] sm:$0xff] }
 0x47b   : > { %v14451_v61 = vpop.eup %14450 }
 0x47c   : > { %v2122_v62 = vmul.f32 %v14451_v61, %v2120_v56  ;;  %vm2128_vm5 = vweird.f32 %v14451_v61  ;;  %v13887_v56 = vld [vmem:[%s17457_s5 + $0x1c8] sm:$0xff] }
 0x47d   : > { %vm2129_vm7 = vmor %vm2127_vm6, %vm2128_vm5  ;;  %2979 = vmatpush.bf16.msrb.mxu3 %v13887_v56  ;;  %v13931_v56 = vld [vmem:[%s17460_s6 + $0x128] sm:$0xff] }
 0x47e   : > { %v2123_v1 = vmul.f32 %v14451_v61, %v2122_v62  ;;  %v13886_v62 = vld [vmem:[%s17457_s5 + $0x1c0] sm:$0xff] }
 0x480   : > { %v2124_v2 = vmul.f32 0.5, %v2123_v1  ;;  %v13909_v1 = vld [vmem:[%s17459_s7 + $0x178] sm:$0xff] }
 0x481   : > { %2980 = vmatpush.bf16.msrb.mxu3 %v13886_v62  ;;  %v13946_v62 = vld [vmem:[%s17460_s6 + $0x1a0] sm:$0xff] }
 0x482   : > { %v2125_v6 = vsub.f32 1.5, %v2124_v2  ;;  %v13917_v2 = vld [vmem:[%s17459_s7 + $0x1b8] sm:$0xff] }
 0x484   : > { %v2126_v7 = vmul.f32 %v14451_v61, %v2125_v6  ;;  %v13900_v6 = vld [vmem:[%s17459_s7 + $0x130] sm:$0xff] }
 0x486   : > { %v2130_v9 = vsel %vm2129_vm7, %v14451_v61, %v2126_v7  ;;  %v13878_v61 = vld [vmem:[%s17457_s5 + $0x180] sm:$0xff]  ;;  %v13908_v7 = vld [vmem:[%s17459_s7 + $0x170] sm:$0xff] }
 0x487   : > { %v2131_v10 = vmul.f32 %v2130_v9, %v15126_v8  ;;  %2919 = vmatpush.bf16.msrb.mxu2 %v13878_v61  ;;  %v13916_v9 = vld [vmem:[%s17459_s7 + $0x1b0] sm:$0xff]  ;;  %v13938_v61 = vld [vmem:[%s17460_s6 + $0x160] sm:$0xff] }
 0x489   : > { %v2272_v11 = vpack.c.bf16 %v2131_v10, %v2131_v10 }
 0x48b   : > { %2361 = vmatmul.bf16.vlgmr.msrb.gmra.mxu0 %v2272_v11  ;;  %2374 = vmatmul.bf16.vlgmr.msrb.gmra.mxu1 %v2272_v11  ;;  %v13899_v11 = vld [vmem:[%s17459_s7 + $0x128] sm:$0xff] }
 0x48c   : > { %3034 = vmatpush.bf16.msrb.mxu0 %v13901_v0  ;;  %3095 = vmatpush.bf16.msrb.mxu1 %v13909_v1  ;;  %v13929_v0 = vld [vmem:[%s17460_s6 + $0x118] sm:$0xff] }
 0x48d   : > { %v13937_v1 = vld [vmem:[%s17460_s6 + $0x158] sm:$0xff] }
 0x490   : > { %3035 = vmatpush.bf16.msrb.mxu0 %v13900_v6  ;;  %3096 = vmatpush.bf16.msrb.mxu1 %v13908_v7  ;;  %v13936_v6 = vld [vmem:[%s17460_s6 + $0x150] sm:$0xff] }
 0x491   : > { %v13944_v7 = vld [vmem:[%s17460_s6 + $0x190] sm:$0xff] }
 0x494   : > { %3036 = vmatpush.bf16.msrb.mxu0 %v13899_v11  ;;  %3097 = vmatpush.bf16.msrb.mxu1 %v13907_v12  ;;  %v13935_v11 = vld [vmem:[%s17460_s6 + $0x148] sm:$0xff] }
 0x495   : > { %v13943_v12 = vld [vmem:[%s17460_s6 + $0x188] sm:$0xff] }
 0x508   : > { %v2362_v14 = vpop.f32.mrf.mxu0  ;;  %v2375_v15 = vpop.f32.mrf.mxu1 }
 0x509   : > { %v2379_v16 = vmax.f32 %v2362_v14, 0.0  ;;  %v2380_v17 = vmax.f32 %v2375_v15, 0.0  ;;  %v13923_v14 = vld [vmem:[%s17459_s7 + $0x1e8] sm:$0xff]  ;;  %v13898_v15 = vld [vmem:[%s17459_s7 + $0x120] sm:$0xff] }
 0x50a   : > { %3037 = vmatpush.bf16.msrb.mxu0 %v13898_v15  ;;  %v13934_v15 = vld [vmem:[%s17460_s6 + $0x140] sm:$0xff] }
 0x50b   : > { %v2381_v18 = vpack.c.bf16 %v2379_v16, %v2379_v16  ;;  %v2382_v19 = vpack.c.bf16 %v2380_v17, %v2380_v17  ;;  %v13906_v16 = vld [vmem:[%s17459_s7 + $0x160] sm:$0xff] }
 0x50c   : > { %v13914_v17 = vld [vmem:[%s17459_s7 + $0x1a0] sm:$0xff]  ;;  %3098 = vmatpush.bf16.msrb.mxu1 %v13906_v16 }
 0x50d   : > { %2487 = vmatmul.bf16.vlgmr.msra.gmra.mxu2 %v2381_v18  ;;  %2500 = vmatmul.bf16.vlgmr.msra.gmra.mxu3 %v2382_v19  ;;  %v13922_v18 = vld [vmem:[%s17459_s7 + $0x1e0] sm:$0xff]  ;;  %v13897_v19 = vld [vmem:[%s17459_s7 + $0x118] sm:$0xff] }
 0x50e   : > { %3156 = vmatpush.bf16.msra.mxu2 %v13917_v2  ;;  %3217 = vmatpush.bf16.msra.mxu3 %v13925_v4  ;;  %v13945_v2 = vld [vmem:[%s17460_s6 + $0x198] sm:$0xff]  ;;  %v13928_v4 = vld [vmem:[%s17460_s6 + $0x110] sm:$0xff]  ;;  %v13942_v16 = vld [vmem:[%s17460_s6 + $0x180] sm:$0xff] }
 0x50f   : > { %3038 = vmatpush.bf16.msrb.mxu0 %v13897_v19 }
 0x510   : > { %v2364_v8 = vpop.f32.mrf.mxu0  ;;  %v2377_v20 = vpop.f32.mrf.mxu1 }
 0x511   : > { %v13905_v8 = vld [vmem:[%s17459_s7 + $0x158] sm:$0xff] }
 0x512   : > { %3157 = vmatpush.bf16.msra.mxu2 %v13916_v9  ;;  %v13913_v20 = vld [vmem:[%s17459_s7 + $0x198] sm:$0xff]  ;;  %3099 = vmatpush.bf16.msrb.mxu1 %v13905_v8  ;;  %v13952_v9 = vld [vmem:[%s17460_s6 + $0x1d0] sm:$0xff] }
 0x516   : > { %3158 = vmatpush.bf16.msra.mxu2 %v13915_v13  ;;  %v13951_v13 = vld [vmem:[%s17460_s6 + $0x1c8] sm:$0xff] }
 0x51a   : > { %3159 = vmatpush.bf16.msra.mxu2 %v13914_v17  ;;  %v13950_v17 = vld [vmem:[%s17460_s6 + $0x1c0] sm:$0xff] }
 0x51e   : > { %3160 = vmatpush.bf16.msra.mxu2 %v13913_v20 }
 0x590   : > { %v2488_v21 = vpop.f32.mrf.mxu2  ;;  %v2501_v22 = vpop.f32.mrf.mxu3 }
 0x591   : > { %v2489_v25 = vadd.f32 %v2488_v21, %v2131_v10  ;;  %v13924_v10 = vld [vmem:[%s17459_s7 + $0x1f0] sm:$0xff]  ;;  %v13921_v21 = vld [vmem:[%s17459_s7 + $0x1d8] sm:$0xff] }
 0x592   : > { %3218 = vmatpush.bf16.msra.mxu3 %v13924_v10  ;;  %v13927_v10 = vld [vmem:[%s17460_s6 + $0x108] sm:$0xff] }
 0x593   : > { %v15252_v26 = vadd.f32 %v2501_v22, %v2489_v25  ;;  %v13896_v22 = vld [vmem:[%s17459_s7 + $0x110] sm:$0xff] }
 0x594   : > { %v13904_v25 = vld [vmem:[%s17459_s7 + $0x150] sm:$0xff]  ;;  %3039 = vmatpush.bf16.msrb.mxu0 %v13896_v22 }
 0x595   : > { %2505 = vadd.xlane.f32.xlu1 %v15252_v26  ;;  %3100 = vmatpush.bf16.msrb.mxu1 %v13904_v25 }
 0x596   : > { %3219 = vmatpush.bf16.msra.mxu3 %v13923_v14  ;;  %v13926_v14 = vld [vmem:[%s17460_s6 + $0x100] sm:$0xff] }
 0x598   : > { %v2490_v27 = vpop.f32.mrf.mxu2  ;;  %v2503_v28 = vpop.f32.mrf.mxu3 }
 0x599   : > { %v13920_v27 = vld [vmem:[%s17459_s7 + $0x1d0] sm:$0xff]  ;;  %v13895_v28 = vld [vmem:[%s17459_s7 + $0x108] sm:$0xff]  ;;  %3101 = vmatpush.bf16.msrb.mxu1 %v13903_v30 }
 0x59a   : > { %3220 = vmatpush.bf16.msra.mxu3 %v13922_v18  ;;  %3040 = vmatpush.bf16.msrb.mxu0 %v13895_v28 }
 0x59d   : > { %3102 = vmatpush.bf16.msrb.mxu1 %v13902_v35 }
 0x59e   : > { %3221 = vmatpush.bf16.msra.mxu3 %v13921_v21  ;;  %3041 = vmatpush.bf16.msrb.mxu0 %v13894_v33 }
 0x5a2   : > { %3222 = vmatpush.bf16.msra.mxu3 %v13920_v27 }
 0x5a6   : > { %3223 = vmatpush.bf16.msra.mxu3 %v13919_v32 }
 0x5aa   : > { %3224 = vmatpush.bf16.msra.mxu3 %v13918_v37 }
 0x608   : > { %v2506_v57 = vpop.xlane.xlu1 %2505 }
 0x609   : > { %v2507_v58 = vmul.f32 %v2506_v57, %v15123_v5  ;;  %v13939_v57 = vld [vmem:[%s17460_s6 + $0x168] sm:$0xff] }
 0x60b   : > { %v15353_v63 = vsub.f32 %v15252_v26, %v2507_v58  ;;  %v13912_v26 = vld [vmem:[%s17459_s7 + $0x190] sm:$0xff]  ;;  %v13947_v58 = vld [vmem:[%s17460_s6 + $0x1a8] sm:$0xff] }
 0x60c   : > { %3161 = vmatpush.bf16.msra.mxu2 %v13912_v26 }
 0x60d   : > { %v2509_v3 = vmul.f32 %v15353_v63, %v15353_v63 }
 0x60f   : > { %2510 = vadd.xlane.f32.xlu2 %v2509_v3  ;;  %v13953_v3 = vld [vmem:[%s17460_s6 + $0x1d8] sm:$0xff] }
 0x610   : > { %3162 = vmatpush.bf16.msra.mxu2 %v13911_v31 }
 0x614   : > { %3163 = vmatpush.bf16.msra.mxu2 %v13910_v36 }
 0x682   : > { %v2511_v38 = vpop.xlane.xlu2 %2510 }
 0x683   : > { %v2512_v39 = vmul.f32 %v2511_v38, %v15123_v5 }
 0x685   : > { %v2513_v40 = vadd.f32 1e-05, %v2512_v39 }
 0x687   : > { %14452 = vrsqrt.f32 %v2513_v40  ;;  %vm2520_vm9 = vweird.f32 %v2513_v40 }
 0x68d   : > { %v14453_v41 = vpop.eup %14452 }
 0x68e   : > { %v2515_v42 = vmul.f32 %v14453_v41, %v2513_v40  ;;  %vm2521_vm8 = vweird.f32 %v14453_v41 }
 0x68f   : > { %vm2522_vm10 = vmor %vm2520_vm9, %vm2521_vm8 }
 0x690   : > { %v2516_v43 = vmul.f32 %v14453_v41, %v2515_v42 }
 0x692   : > { %v2517_v44 = vmul.f32 0.5, %v2516_v43 }
 0x694   : > { %v2518_v45 = vsub.f32 1.5, %v2517_v44 }
 0x696   : > { %v2519_v46 = vmul.f32 %v14453_v41, %v2518_v45 }
 0x698   : > { %v2523_v47 = vsel %vm2522_vm10, %v14453_v41, %v2519_v46 }
 0x699   : > { %v15455_v48 = vmul.f32 %v2523_v47, %v15353_v63  ;;  %v13954_v63 = vld [vmem:[%s17460_s6 + $0x1e0] sm:$0xff] }
 0x69b   : > { %v15459_v34 = vpack.c.bf16 %v15455_v48, %v15455_v48 }
 0x69d   : > { %2798 = vmatmul.bf16.vlgmr.msra.gmra.mxu0 %v15459_v34  ;;  %2859 = vmatmul.bf16.vlgmr.msra.gmra.mxu1 %v15459_v34 }
 0x69e   : > { %2920 = vmatmul.bf16.vlgmr.msrb.gmra.mxu2 %v15459_v34  ;;  %2981 = vmatmul.bf16.vlgmr.msrb.gmra.mxu3 %v15459_v34 }
 0x69f   : > { %3278 = vmatpush.bf16.msra.mxu0 %v13933_v49  ;;  %3339 = vmatpush.bf16.msra.mxu1 %v13941_v50 }
 0x6a0   : > { %3400 = vmatpush.bf16.msrb.mxu2 %v13949_v29  ;;  %3461 = vmatpush.bf16.msrb.mxu3 %v13957_v51 }
 0x6a3   : > { %3279 = vmatpush.bf16.msra.mxu0 %v13932_v52  ;;  %3340 = vmatpush.bf16.msra.mxu1 %v13940_v53 }
 0x6a4   : > { %3401 = vmatpush.bf16.msrb.mxu2 %v13948_v54  ;;  %3462 = vmatpush.bf16.msrb.mxu3 %v13956_v55 }
 0x6a7   : > { %3280 = vmatpush.bf16.msra.mxu0 %v13931_v56  ;;  %3341 = vmatpush.bf16.msra.mxu1 %v13939_v57 }
 0x6a8   : > { %3402 = vmatpush.bf16.msrb.mxu2 %v13947_v58  ;;  %3463 = vmatpush.bf16.msrb.mxu3 %v13955_v59 }
 0x6ab   : > { %3281 = vmatpush.bf16.msra.mxu0 %v13930_v60  ;;  %3342 = vmatpush.bf16.msra.mxu1 %v13938_v61 }
 0x6ac   : > { %3403 = vmatpush.bf16.msrb.mxu2 %v13946_v62  ;;  %3464 = vmatpush.bf16.msrb.mxu3 %v13954_v63 }
 0x6ad   : > { %3042 = vmatmul.bf16.vlgmr.msrb.gmra.mxu0 %v15459_v34  ;;  %3103 = vmatmul.bf16.vlgmr.msrb.gmra.mxu1 %v15459_v34 }
 0x6ae   : > { %3164 = vmatmul.bf16.vlgmr.msra.gmra.mxu2 %v15459_v34  ;;  %3225 = vmatmul.bf16.vlgmr.msra.gmra.mxu3 %v15459_v34 }
 0x6af   : > { %3282 = vmatpush.bf16.msra.mxu0 %v13929_v0  ;;  %3343 = vmatpush.bf16.msra.mxu1 %v13937_v1 }
 0x6b0   : > { %3404 = vmatpush.bf16.msrb.mxu2 %v13945_v2  ;;  %3465 = vmatpush.bf16.msrb.mxu3 %v13953_v3  ;;  %v14546_v3 = vld [vmem:[%s15002_s1] sm:$0xff]  ;;  %s17466_s1 = sld [smem:[#allocation6_spill]] }
 0x6b3   : > { %3283 = vmatpush.bf16.msra.mxu0 %v13928_v4  ;;  %3344 = vmatpush.bf16.msra.mxu1 %v13936_v6 }
 0x6b4   : > { %3405 = vmatpush.bf16.msrb.mxu2 %v13944_v7  ;;  %3466 = vmatpush.bf16.msrb.mxu3 %v13952_v9 }
 0x6b7   : > { %3284 = vmatpush.bf16.msra.mxu0 %v13927_v10  ;;  %3345 = vmatpush.bf16.msra.mxu1 %v13935_v11 }
 0x6b8   : > { %3406 = vmatpush.bf16.msrb.mxu2 %v13943_v12  ;;  %3467 = vmatpush.bf16.msrb.mxu3 %v13951_v13 }
 0x6bb   : > { %3285 = vmatpush.bf16.msra.mxu0 %v13926_v14  ;;  %3346 = vmatpush.bf16.msra.mxu1 %v13934_v15 }
 0x6bc   : > { %3407 = vmatpush.bf16.msrb.mxu2 %v13942_v16  ;;  %3468 = vmatpush.bf16.msrb.mxu3 %v13950_v17 }
 0x6be   : > { %3286 = vmatmul.bf16.vlgmr.msra.gmra.mxu0 %v15459_v34  ;;  %3347 = vmatmul.bf16.vlgmr.msra.gmra.mxu1 %v15459_v34 }
 0x6bf   : > { %3408 = vmatmul.bf16.vlgmr.msrb.gmra.mxu2 %v15459_v34  ;;  %3469 = vmatmul.bf16.vlgmr.msrb.gmra.mxu3 %v15459_v34 }
 0x71a   : > { %v2799_v18 = vpop.f32.mrf.mxu0  ;;  %v2860_v19 = vpop.f32.mrf.mxu1 }
 0x71b   : > { %v3474_v41 = vpack.c.bf16 %v2799_v18, %v2799_v18  ;;  %v3475_v42 = vpack.c.bf16 %v2860_v19, %v2860_v19 }
 0x721   : > { %v2921_v8 = vpop.f32.mrf.mxu2  ;;  %v2982_v20 = vpop.f32.mrf.mxu3 }
 0x722   : > { %v2801_v21 = vpop.f32.mrf.mxu0  ;;  %v2862_v22 = vpop.f32.mrf.mxu1  ;;  %v3476_v47 = vpack.c.bf16 %v2921_v8, %v2921_v8  ;;  %v3477_v34 = vpack.c.bf16 %v2982_v20, %v2982_v20 }
 0x729   : > { %v2923_v25 = vpop.f32.mrf.mxu2  ;;  %v2984_v26 = vpop.f32.mrf.mxu3 }
 0x72a   : > { %v3043_v27 = vpop.f32.mrf.mxu0  ;;  %v3104_v28 = vpop.f32.mrf.mxu1 }
 0x72b   : > { %v3478_v30 = vpack.c.bf16 %v3043_v27, %v3043_v27  ;;  %v3479_v31 = vpack.c.bf16 %v3104_v28, %v3104_v28 }
 0x72d   : > { %v3486_v32 = vsel %vm1770_vm0, %v3478_v30, 0  ;;  %v3505_v33 = vsel %vm1770_vm0, %v3479_v31, 0 }
 0x72e   : > { %3495 = vmatpush.bf16.xpose.msrb.mxu0 %v3486_v32  ;;  %3514 = vmatpush.bf16.xpose.msrb.mxu1 %v3505_v33 }
 0x731   : > { %v3165_v35 = vpop.f32.mrf.mxu2  ;;  %v3226_v36 = vpop.f32.mrf.mxu3 }
 0x732   : > { %v3480_v37 = vpack.c.bf16 %v3165_v35, %v3165_v35  ;;  %v3481_v38 = vpack.c.bf16 %v3226_v36, %v3226_v36  ;;  %v3045_v39 = vpop.f32.mrf.mxu0  ;;  %v3106_v40 = vpop.f32.mrf.mxu1 }
 0x734   : > { %v3524_v43 = vsel %vm1770_vm0, %v3480_v37, 0  ;;  %v3543_v44 = vsel %vm1770_vm0, %v3481_v38, 0 }
 0x735   : > { %3533 = vmatpush.bf16.xpose.msra.mxu2 %v3524_v43  ;;  %3552 = vmatpush.bf16.xpose.msra.mxu3 %v3543_v44 }
 0x736   : > { %11289 = vmatmul.msk.bf16.vlgmr.msrb.gmra.mxu0 %vm1770_vm0, %v3474_v41  ;;  %11290 = vmatmul.msk.bf16.vlgmr.msrb.gmra.mxu1 %vm1770_vm0, %v3475_v42 }
 0x739   : > { %v3167_v45 = vpop.f32.mrf.mxu2  ;;  %v3228_v46 = vpop.f32.mrf.mxu3 }
 0x73b   : > { %v3287_v49 = vpop.f32.mrf.mxu0  ;;  %v3348_v50 = vpop.f32.mrf.mxu1 }
 0x73c   : > { %v3614_v29 = vpack.c.bf16 %v3287_v49, %v3287_v49  ;;  %v3615_v51 = vpack.c.bf16 %v3348_v50, %v3348_v50  ;;  %11291 = vmatmul.msk.bf16.vlgmr.msra.gmra.mxu2 %vm1770_vm0, %v3476_v47  ;;  %11292 = vmatmul.msk.bf16.vlgmr.msra.gmra.mxu3 %vm1770_vm0, %v3477_v34  ;;  %v13959_v47 = vld [vmem:[%s17424_s8 + $0x48] sm:$0xff] }
 0x73e   : > { %v3622_v52 = vsel %vm1911_vm1, %v3614_v29, 0  ;;  %v3641_v53 = vsel %vm1911_vm1, %v3615_v51, 0 }
 0x73f   : > { %3631 = vmatpush.bf16.msra.mxu0 %v3622_v52  ;;  %3650 = vmatpush.bf16.msra.mxu1 %v3641_v53 }
 0x742   : > { %v3409_v54 = vpop.f32.mrf.mxu2  ;;  %v3470_v55 = vpop.f32.mrf.mxu3 }
 0x743   : > { %v3616_v56 = vpack.c.bf16 %v3409_v54, %v3409_v54  ;;  %v3617_v57 = vpack.c.bf16 %v3470_v55, %v3470_v55  ;;  %v3289_v58 = vpop.f32.mrf.mxu0  ;;  %v3350_v59 = vpop.f32.mrf.mxu1  ;;  %3719 = vmatpush.bf16.msrb.mxu0 %v13959_v47 }
 0x745   : > { %v3660_v60 = vsel %vm1911_vm1, %v3616_v56, 0  ;;  %v3679_v61 = vsel %vm1911_vm1, %v3617_v57, 0 }
 0x746   : > { %3669 = vmatpush.bf16.msrb.mxu2 %v3660_v60  ;;  %3688 = vmatpush.bf16.msrb.mxu3 %v3679_v61 }
 0x74a   : > { %v3411_v62 = vpop.f32.mrf.mxu2  ;;  %v3472_v63 = vpop.f32.mrf.mxu3 }
 0x74b   : > { %v13958_v62 = vld [vmem:[%s17424_s8 + $0x40] sm:$0xff]  ;;  %v13963_v63 = vld [vmem:[%s17424_s8 + $0x68] sm:$0xff] }
 0x74c   : > { %3720 = vmatpush.bf16.msrb.mxu0 %v13958_v62  ;;  %3775 = vmatpush.bf16.msra.mxu2 %v13963_v63  ;;  %v13971_v62 = vld [vmem:[%s17425_s9 + $0xa4] sm:$0xf0] }
 0x7b3   : > { %v3497_v0 = vpop.f32.mrf.mxu0  ;;  %v3516_v1 = vpop.f32.mrf.mxu1 }
 0x7b4   : > { %v3558_v2 = vmul.f32 0.17677669, %v3497_v0  ;;  %v3559_v16 = vmul.f32 0.17677669, %v3516_v1  ;;  %v13965_v0 = vld [vmem:[%s17424_s8 + $0x78] sm:$0xff] }
 0x7b5   : > { %v13961_v1 = vld [vmem:[%s17424_s8 + $0x58] sm:$0xff]  ;;  %3803 = vmatpush.bf16.msra.mxu3 %v13965_v0  ;;  %v13976_v0 = vld [vmem:[%s17425_s9 + $0xd4] sm:$0xf] }
 0x7b6   : > { %v3562_v4 = vadd.f32 %v14546_v3, %v3558_v2  ;;  %v3563_v20 = vadd.f32 %v14546_v3, %v3559_v16  ;;  %3747 = vmatpush.bf16.msrb.mxu1 %v13961_v1  ;;  %v13962_v2 = vld [vmem:[%s17424_s8 + $0x60] sm:$0xff]  ;;  %v11433_v1 = vld [vmem:[%s17425_s9 + $0xd8] sm:$0xf0] }
 0x7b7   : > { %3776 = vmatpush.bf16.msra.mxu2 %v13962_v2  ;;  %v11436_v2 = vor.u32 %v13976_v0, %v11433_v1  ;;  %v14033_v0 = vld [vmem:[%s17428_s12 + $0x18] sm:$0xff]  ;;  %v14010_v1 = vld [vmem:[%s17427_s11 + $0x60] sm:$0xff] }
 0x7b8   : > { %v3566_v6 = vsel %vm1855_vm2, %v3562_v4, -inf  ;;  %v3569_v21 = vsel %vm1855_vm2, %v3563_v20, -inf }
 0x7b9   : > { %3567 = vmax.xlane.f32.xlu2 %v3566_v6 }
 0x7bb   : > { %v3499_v7 = vpop.f32.mrf.mxu0  ;;  %v3518_v9 = vpop.f32.mrf.mxu1 }
 0x7bf   : > { %v3535_v10 = vpop.f32.mrf.mxu2  ;;  %v3554_v11 = vpop.f32.mrf.mxu3 }
 0x7c0   : > { %v3560_v12 = vmul.f32 0.17677669, %v3535_v10  ;;  %v3561_v13 = vmul.f32 0.17677669, %v3554_v11 }
 0x7c2   : > { %v3565_v14 = vadd.f32 %v14546_v3, %v3561_v13  ;;  %v3564_v15 = vadd.f32 %v14546_v3, %v3560_v12  ;;  %v13964_v3 = vld [vmem:[%s17424_s8 + $0x70] sm:$0xff] }
 0x7c3   : > { %3804 = vmatpush.bf16.msra.mxu3 %v13964_v3  ;;  %v11399_v3 = vld [vmem:[%s17425_s9 + $0x90] sm:$0xf] }
 0x7c4   : > { %v3575_v17 = vsel %vm1855_vm2, %v3565_v14, -inf  ;;  %v3572_v18 = vsel %vm1855_vm2, %v3564_v15, -inf }
 0x7c5   : > { %3576 = vmax.xlane.f32.xlu1 %v3575_v17  ;;  %3573 = vmax.xlane.f32.xlu0 %v3572_v18 }
 0x7c7   : > { %v3537_v19 = vpop.f32.mrf.mxu2  ;;  %v3556_v8 = vpop.f32.mrf.mxu3 }
 0x7cd   : > { %3570 = vmax.xlane.f32.xlu0 %v3569_v21 }
 0x82c   : > { %v3568_v22 = vpop.xlane.xlu2 %3567 }
 0x82d   : > { %v3578_v25 = vsub.f32 %v3562_v4, %v3568_v22  ;;  %v13960_v4 = vld [vmem:[%s17424_s8 + $0x50] sm:$0xff] }
 0x82e   : > { %3748 = vmatpush.bf16.msrb.mxu1 %v13960_v4  ;;  %v13969_v4 = vld [vmem:[%s17425_s9 + $0x94] sm:$0xf0] }
 0x82f   : > { %v3582_v26 = vmul.f32 1.442695, %v3578_v25 }
 0x831   : > { %14454 = vpow2.f32 %v3582_v26 }
 0x837   : > { %v14455_v27 = vpop.eup %14454 }
 0x838   : > { %v3577_v28 = vpop.xlane.xlu1 %3576  ;;  %v3574_v30 = vpop.xlane.xlu0 %3573  ;;  %v3590_v31 = vsel %vm1855_vm2, %v14455_v27, 0.0 }
 0x839   : > { %v3581_v32 = vsub.f32 %v3565_v14, %v3577_v28  ;;  %v3580_v33 = vsub.f32 %v3564_v15, %v3574_v30  ;;  %3591 = vadd.xlane.f32.xlu0 %v3590_v31 }
 0x83b   : > { %v3588_v35 = vmul.f32 1.442695, %v3581_v32  ;;  %v3586_v36 = vmul.f32 1.442695, %v3580_v33 }
 0x83d   : > { %14456 = vpow2.f32 %v3588_v35 }
 0x83e   : > { %14458 = vpow2.f32 %v3586_v36 }
 0x840   : > { %v3571_v37 = vpop.xlane.xlu0 %3570 }
 0x841   : > { %v3579_v38 = vsub.f32 %v3563_v20, %v3571_v37 }
 0x843   : > { %v14457_v39 = vpop.eup %14456  ;;  %v3584_v40 = vmul.f32 1.442695, %v3579_v38  ;;  %v11447_v38 = vld [vmem:[%s17425_s9 + $0xf0] sm:$0xf] }
 0x844   : > { %v14459_v41 = vpop.eup %14458  ;;  %v3599_v42 = vsel %vm1855_vm2, %v14457_v39, 0.0 }
 0x845   : > { %14460 = vpow2.f32 %v3584_v40  ;;  %v3596_v43 = vsel %vm1855_vm2, %v14459_v41, 0.0  ;;  %3600 = vadd.xlane.f32.xlu2 %v3599_v42  ;;  %v13980_v42 = vld [vmem:[%s17425_s9 + $0xf4] sm:$0xf] }
 0x846   : > { %3597 = vadd.xlane.f32.xlu1 %v3596_v43 }
 0x84b   : > { %v14461_v44 = vpop.eup %14460 }
 0x84c   : > { %v3593_v45 = vsel %vm1855_vm2, %v14461_v44, 0.0 }
 0x84e   : > { %3594 = vadd.xlane.f32.xlu1 %v3593_v45  ;;  %v11449_v45 = vld [vmem:[%s17425_s9 + $0xf8] sm:$0xf0] }
 0x84f   : > { %v11452_v47 = vor.u32 %v13980_v42, %v11449_v45 }
 0x8ac   : > { %v3592_v46 = vpop.xlane.xlu0 %3591 }
 0x8ad   : > { %14462 = vrcp.f32 %v3592_v46  ;;  %v13977_v46 = vld [vmem:[%s17425_s9 + $0xd4] sm:$0xf0] }
 0x8b3   : > { %v14463_v34 = vpop.eup %14462 }
 0x8b4   : > { %v3606_v49 = vmul.f32 %v14463_v34, %v14455_v27  ;;  %v13978_v34 = vld [vmem:[%s17425_s9 + $0xe4] sm:$0xf] }
 0x8b6   : > { %v3610_v50 = vpack.c.bf16 %v3606_v49, %v3606_v49 }
 0x8b8   : > { %11293 = vmatmul.msk.bf16.vlgmr.msra.gmra.mxu0 %vm1855_vm2, %v3610_v50  ;;  %v3601_v29 = vpop.xlane.xlu2 %3600 }
 0x8b9   : > { %v3598_v51 = vpop.xlane.xlu1 %3597  ;;  %14464 = vrcp.f32 %v3601_v29  ;;  %11333 = vmatpush.msk.msra.mxu0 %vm15062_vm3, %v14557_v24 }
 0x8ba   : > { %14466 = vrcp.f32 %v3598_v51  ;;  %v11423_v51 = vld [vmem:[%s17425_s9 + $0xc0] sm:$0xf] }
 0x8bf   : > { %v14465_v52 = vpop.eup %14464 }
 0x8c0   : > { %v14467_v53 = vpop.eup %14466  ;;  %v3609_v54 = vmul.f32 %v14465_v52, %v14457_v39  ;;  %v13981_v39 = vld [vmem:[%s17425_s9 + $0xf4] sm:$0xf0]  ;;  %v13975_v52 = vld [vmem:[%s17425_s9 + $0xc4] sm:$0xf0] }
 0x8c1   : > { %v3608_v55 = vmul.f32 %v14467_v53, %v14459_v41  ;;  %v3595_v56 = vpop.xlane.xlu1 %3594  ;;  %v11448_v40 = vor.u32 %v13981_v39, %v11447_v38  ;;  %v13979_v41 = vld [vmem:[%s17425_s9 + $0xe4] sm:$0xf0]  ;;  %v11424_v53 = vor.u32 %v13975_v52, %v11423_v51  ;;  %v13998_v38 = vld [vmem:[%s17427_s11] sm:$0xff]  ;;  %v13988_v51 = vld [vmem:[%s17426_s10 + $0xb0] sm:$0xff] }
 0x8c2   : > { %v3613_v57 = vpack.c.bf16 %v3609_v54, %v3609_v54  ;;  %14468 = vrcp.f32 %v3595_v56  ;;  %v13996_v52 = vld [vmem:[%s17426_s10 + $0xf0] sm:$0xff] }
 0x8c3   : > { %v3612_v58 = vpack.c.bf16 %v3608_v55, %v3608_v55 }
 0x8c4   : > { %11296 = vmatmul.msk.bf16.vlgmr.msrb.gmra.mxu3 %vm1855_vm2, %v3613_v57 }
 0x8c5   : > { %11295 = vmatmul.msk.bf16.vlgmr.msrb.gmra.mxu2 %vm1855_vm2, %v3612_v58  ;;  %11339 = vmatpush.msk.msrb.mxu3 %vm15062_vm3, %v14557_v24 }
 0x8c6   : > { %11337 = vmatpush.msk.msrb.mxu2 %vm15062_vm3, %v14557_v24 }
 0x8c8   : > { %v14469_v59 = vpop.eup %14468 }
 0x8c9   : > { %v3607_v60 = vmul.f32 %v14469_v59, %v14461_v44  ;;  %v11431_v44 = vld [vmem:[%s17425_s9 + $0xd0] sm:$0xf] }
 0x8ca   : > { %v11432_v29 = vor.u32 %v13977_v46, %v11431_v44 }
 0x8cb   : > { %v3611_v61 = vpack.c.bf16 %v3607_v60, %v3607_v60 }
 0x8cd   : > { %11294 = vmatmul.msk.bf16.vlgmr.msra.gmra.mxu1 %vm1855_vm2, %v3611_v61  ;;  %v11407_v61 = vld [vmem:[%s17425_s9 + $0xa0] sm:$0xf] }
 0x8ce   : > { %11335 = vmatpush.msk.msra.mxu1 %vm15062_vm3, %v14557_v24  ;;  %v11408_v63 = vor.u32 %v13971_v62, %v11407_v61  ;;  %v13986_v61 = vld [vmem:[%s17426_s10 + $0xa0] sm:$0xff] }
 0x8cf   : > { %v13994_v62 = vld [vmem:[%s17426_s10 + $0xe0] sm:$0xff] }
 0x935   : > { %v3633_v6 = vpop.f32.mrf.mxu0 }
 0x936   : > { %v3694_v7 = vpack.c.bf16 %v3633_v6, %v3633_v6  ;;  %v11400_v6 = vor.u32 %v13969_v4, %v11399_v3  ;;  %v13993_v3 = vld [vmem:[%s17426_s10 + $0xd8] sm:$0xff]  ;;  %v14032_v4 = vld [vmem:[%s17428_s12 + $0x10] sm:$0xff] }
 0x938   : > { %11305 = vmatmul.msk.bf16.vlgmr.msrb.gmra.mxu0 %vm1770_vm0, %v3694_v7  ;;  %v13974_v7 = vld [vmem:[%s17425_s9 + $0xc4] sm:$0xf] }
 0x939   : > { %4057 = vmatpush.bf16.msrb.mxu0 %v11448_v40 }
 0x93d   : > { %v3635_v9 = vpop.f32.mrf.mxu0 }
 0x93e   : > { %v11425_v9 = vld [vmem:[%s17425_s9 + $0xc8] sm:$0xf0] }
 0x947   : > { %v3690_v10 = vpop.f32.mrf.mxu3 }
 0x948   : > { %v3671_v11 = vpop.f32.mrf.mxu2  ;;  %v3697_v12 = vpack.c.bf16 %v3690_v10, %v3690_v10  ;;  %11334 = vmatmul.msk.f32.vlgmr.msra.gmra.mxu0 %vm1855_vm2, %v3606_v49  ;;  %v11441_v49 = vld [vmem:[%s17425_s9 + $0xe8] sm:$0xf0]  ;;  %v11428_v10 = vor.u32 %v13974_v7, %v11425_v9  ;;  %v13984_v7 = vld [vmem:[%s17426_s10 + $0x90] sm:$0xff] }
 0x949   : > { %v3696_v13 = vpack.c.bf16 %v3671_v11, %v3671_v11  ;;  %v11444_v50 = vor.u32 %v13978_v34, %v11441_v49  ;;  %v11391_v11 = vld [vmem:[%s17425_s9 + $0x80] sm:$0xf]  ;;  %v13989_v49 = vld [vmem:[%s17426_s10 + $0xb8] sm:$0xff]  ;;  %v13992_v9 = vld [vmem:[%s17426_s10 + $0xd0] sm:$0xff] }
 0x94a   : > { %v3652_v14 = vpop.f32.mrf.mxu1  ;;  %11332 = vmatmul.msk.bf16.vlgmr.msra.gmra.mxu3 %vm1770_vm0, %v3697_v12  ;;  %v13967_v12 = vld [vmem:[%s17425_s9 + $0x84] sm:$0xf0] }
 0x94b   : > { %v3695_v15 = vpack.c.bf16 %v3652_v14, %v3652_v14  ;;  %11323 = vmatmul.msk.bf16.vlgmr.msra.gmra.mxu2 %vm1770_vm0, %v3696_v13  ;;  %v11392_v13 = vor.u32 %v13967_v12, %v11391_v11  ;;  %v14005_v14 = vld [vmem:[%s17427_s11 + $0x38] sm:$0xff]  ;;  %v14008_v11 = vld [vmem:[%s17427_s11 + $0x50] sm:$0xff]  ;;  %v13983_v12 = vld [vmem:[%s17426_s10 + $0x88] sm:$0xff] }
 0x94c   : > { %4183 = vmatpush.bf16.msra.mxu2 %v13989_v49  ;;  %v14065_v49 = vld [vmem:[%s17429_s13 + $0x18] sm:$0xff] }
 0x94d   : > { %11314 = vmatmul.msk.bf16.vlgmr.msrb.gmra.mxu1 %vm1770_vm0, %v3695_v15  ;;  %v13972_v15 = vld [vmem:[%s17425_s9 + $0xb4] sm:$0xf] }
 0x94e   : > { %4070 = vmatpush.bf16.msrb.mxu1 %v11452_v47  ;;  %v14037_v47 = vld [vmem:[%s17428_s12 + $0x38] sm:$0xff] }
 0x94f   : > { %v3692_v16 = vpop.f32.mrf.mxu3 }
 0x950   : > { %v3673_v17 = vpop.f32.mrf.mxu2  ;;  %v11417_v16 = vld [vmem:[%s17425_s9 + $0xb8] sm:$0xf0]  ;;  %4184 = vmatpush.bf16.msra.mxu2 %v13988_v51  ;;  %v14063_v51 = vld [vmem:[%s17429_s13 + $0x8] sm:$0xff] }
 0x951   : > { %v11420_v17 = vor.u32 %v13972_v15, %v11417_v16  ;;  %v14007_v15 = vld [vmem:[%s17427_s11 + $0x48] sm:$0xff]  ;;  %v13982_v16 = vld [vmem:[%s17426_s10 + $0x80] sm:$0xff] }
 0x952   : > { %v3654_v18 = vpop.f32.mrf.mxu1  ;;  %4071 = vmatpush.bf16.msrb.mxu1 %v11444_v50  ;;  %v13997_v50 = vld [vmem:[%s17426_s10 + $0xf8] sm:$0xff] }
 0x953   : > { %v14004_v18 = vld [vmem:[%s17427_s11 + $0x30] sm:$0xff]  ;;  %4196 = vmatpush.bf16.msra.mxu3 %v13997_v50  ;;  %v14038_v50 = vld [vmem:[%s17428_s12 + $0x40] sm:$0xff] }
 0x956   : > { %4072 = vmatpush.bf16.msrb.mxu1 %v11436_v2  ;;  %v13985_v2 = vld [vmem:[%s17426_s10 + $0x98] sm:$0xff] }
 0x957   : > { %4197 = vmatpush.bf16.msra.mxu3 %v13996_v52 }
 0x95a   : > { %11340 = vmatmul.msk.f32.vlgmr.msrb.gmra.mxu3 %vm1855_vm2, %v3609_v54  ;;  %v11415_v54 = vld [vmem:[%s17425_s9 + $0xb0] sm:$0xf]  ;;  %4073 = vmatpush.bf16.msrb.mxu1 %v11428_v10  ;;  %v14031_v10 = vld [vmem:[%s17428_s12 + $0x8] sm:$0xff] }
 0x95b   : > { %11338 = vmatmul.msk.f32.vlgmr.msrb.gmra.mxu2 %vm1855_vm2, %v3608_v55  ;;  %v13973_v55 = vld [vmem:[%s17425_s9 + $0xb4] sm:$0xf0] }
 0x95c   : > { %v11416_v56 = vor.u32 %v13973_v55, %v11415_v54  ;;  %v14035_v54 = vld [vmem:[%s17428_s12 + $0x28] sm:$0xff]  ;;  %v14012_v55 = vld [vmem:[%s17427_s11 + $0x70] sm:$0xff] }
 0x95d   : > { %11336 = vmatmul.msk.f32.vlgmr.msra.gmra.mxu1 %vm1855_vm2, %v3607_v60 }
 0x95e   : > { %4074 = vmatpush.bf16.msrb.mxu1 %v11420_v17  ;;  %v13990_v17 = vld [vmem:[%s17426_s10 + $0xc0] sm:$0xff] }
 0x9b5   : > { %v3722_v19 = vpop.f32.mrf.mxu0 }
 0x9bd   : > { %v3724_v8 = vpop.f32.mrf.mxu0 }
 0x9be   : > { %v11409_v8 = vld [vmem:[%s17425_s9 + $0xa8] sm:$0xf0] }
 0x9c5   : > { %v3854_v20 = vpop.f32.mrf.mxu0 }
 0x9c6   : > { %11517 = vst [vmem:[%s15093_s27 + $0x20] sm:$0xff] %v3854_v20 }
 0x9ca   : > { %v3750_v21 = vpop.f32.mrf.mxu1 }
 0x9cb   : > { %v3810_v22 = vadd.f32 %v3750_v21, %v3722_v19  ;;  %v13970_v19 = vld [vmem:[%s17425_s9 + $0xa4] sm:$0xf]  ;;  %v14003_v21 = vld [vmem:[%s17427_s11 + $0x28] sm:$0xff] }
 0x9cc   : > { %v11412_v20 = vor.u32 %v13970_v19, %v11409_v8  ;;  %v14029_v19 = vld [vmem:[%s17427_s11 + $0xf8] sm:$0xff]  ;;  %v14006_v8 = vld [vmem:[%s17427_s11 + $0x40] sm:$0xff] }
 0x9cd   : > { %v3806_v25 = vpop.f32.mrf.mxu3 }
 0x9ce   : > { %v3778_v26 = vpop.f32.mrf.mxu2  ;;  %4075 = vmatpush.bf16.msrb.mxu1 %v11412_v20  ;;  %v14045_v20 = vld [vmem:[%s17428_s12 + $0x78] sm:$0xff] }
 0x9cf   : > { %v3811_v27 = vadd.f32 %v3810_v22, %v3778_v26  ;;  %v13968_v22 = vld [vmem:[%s17425_s9 + $0x94] sm:$0xf] }
 0x9d1   : > { %v3812_v28 = vadd.f32 %v3811_v27, %v3806_v25  ;;  %v11401_v25 = vld [vmem:[%s17425_s9 + $0x98] sm:$0xf0]  ;;  %v14002_v27 = vld [vmem:[%s17427_s11 + $0x20] sm:$0xff] }
 0x9d2   : > { %v3752_v30 = vpop.f32.mrf.mxu1  ;;  %v11404_v26 = vor.u32 %v13968_v22, %v11401_v25  ;;  %v14028_v22 = vld [vmem:[%s17427_s11 + $0xf0] sm:$0xff]  ;;  %v14019_v25 = vld [vmem:[%s17427_s11 + $0xa8] sm:$0xff] }
 0x9d3   : > { %v3813_v31 = vadd.f32 %v3812_v28, %v15455_v48  ;;  %v11439_v48 = vld [vmem:[%s17425_s9 + $0xe0] sm:$0xf]  ;;  %v13966_v28 = vld [vmem:[%s17425_s9 + $0x84] sm:$0xf]  ;;  %v11393_v30 = vld [vmem:[%s17425_s9 + $0x88] sm:$0xf0] }
 0x9d4   : > { %v11440_v43 = vor.u32 %v13979_v41, %v11439_v48  ;;  %4076 = vmatpush.bf16.msrb.mxu1 %v11404_v26  ;;  %v14027_v26 = vld [vmem:[%s17427_s11 + $0xe8] sm:$0xff] }
 0x9d5   : > { %3814 = vadd.xlane.f32.xlu2 %v3813_v31  ;;  %v3808_v32 = vpop.f32.mrf.mxu3 }
 0x9d6   : > { %v3780_v33 = vpop.f32.mrf.mxu2  ;;  %4058 = vmatpush.bf16.msrb.mxu0 %v11440_v43  ;;  %v14001_v32 = vld [vmem:[%s17427_s11 + $0x18] sm:$0xff] }
 0x9d7   : > { %v14000_v33 = vld [vmem:[%s17427_s11 + $0x10] sm:$0xff] }
 0x9da   : > { %v3877_v35 = vpop.f32.mrf.mxu1  ;;  %4059 = vmatpush.bf16.msrb.mxu0 %v11432_v29  ;;  %v14036_v29 = vld [vmem:[%s17428_s12 + $0x30] sm:$0xff] }
 0x9db   : > { %11518 = vst [vmem:[%s15093_s27 + $0x28] sm:$0xff] %v3877_v35  ;;  %v13999_v35 = vld [vmem:[%s17427_s11 + $0x8] sm:$0xff] }
 0x9dd   : > { %v3923_v36 = vpop.f32.mrf.mxu3 }
 0x9de   : > { %v3900_v37 = vpop.f32.mrf.mxu2  ;;  %11520 = vst [vmem:[%s15093_s27 + $0x38] sm:$0xff] %v3923_v36  ;;  %4060 = vmatpush.bf16.msrb.mxu0 %v11424_v53  ;;  %v14013_v53 = vld [vmem:[%s17427_s11 + $0x78] sm:$0xff] }
 0x9df   : > { %11519 = vst [vmem:[%s15093_s27 + $0x30] sm:$0xff] %v3900_v37  ;;  %s779_s27 = scalar_lea.vmem %s17465_s29, %s14763_s3  ;;  %s16121_s29 = scalar_lea.vmem %s17466_s1, %s14763_s3 }
 0x9e2   : > { %4061 = vmatpush.bf16.msrb.mxu0 %v11416_v56  ;;  %v13987_v56 = vld [vmem:[%s17426_s10 + $0xa8] sm:$0xff] }
 0x9e3   : > { %4185 = vmatpush.bf16.msra.mxu2 %v13987_v56  ;;  %v14062_v56 = vld [vmem:[%s17429_s13] sm:$0xff] }
 0x9e6   : > { %4062 = vmatpush.bf16.msrb.mxu0 %v11408_v63 }
 0x9e7   : > { %4186 = vmatpush.bf16.msra.mxu2 %v13986_v61 }
 0x9ea   : > { %4063 = vmatpush.bf16.msrb.mxu0 %v11400_v6  ;;  %v14009_v6 = vld [vmem:[%s17427_s11 + $0x58] sm:$0xff] }
 0x9eb   : > { %4187 = vmatpush.bf16.msra.mxu2 %v13985_v2 }
 0x9ee   : > { %4064 = vmatpush.bf16.msrb.mxu0 %v11392_v13  ;;  %v13991_v13 = vld [vmem:[%s17426_s10 + $0xc8] sm:$0xff] }
 0x9ef   : > { %4188 = vmatpush.bf16.msra.mxu2 %v13984_v7  ;;  %v14076_v7 = vld [vmem:[%s17429_s13 + $0x70] sm:$0xff] }
 0x9f2   : > { %4494 = vmatpush.bf16.msra.mxu0 %v14005_v14  ;;  %v14030_v14 = vld [vmem:[%s17428_s12] sm:$0xff] }
 0x9f3   : > { %4189 = vmatpush.bf16.msra.mxu2 %v13983_v12  ;;  %v14049_v12 = vld [vmem:[%s17428_s12 + $0x98] sm:$0xff] }
 0x9f6   : > { %4495 = vmatpush.bf16.msra.mxu0 %v14004_v18  ;;  %v14021_v18 = vld [vmem:[%s17427_s11 + $0xb8] sm:$0xff] }
 0x9f7   : > { %4190 = vmatpush.bf16.msra.mxu2 %v13982_v16  ;;  %v14056_v16 = vld [vmem:[%s17428_s12 + $0xd0] sm:$0xff] }
 0x9fa   : > { %4496 = vmatpush.bf16.msra.mxu0 %v14003_v21  ;;  %v14020_v21 = vld [vmem:[%s17427_s11 + $0xb0] sm:$0xff] }
 0x9fb   : > { %4616 = vmatpush.bf16.msrb.mxu2 %v14021_v18 }
 0x9fe   : > { %4497 = vmatpush.bf16.msra.mxu0 %v14002_v27  ;;  %v14018_v27 = vld [vmem:[%s17427_s11 + $0xa0] sm:$0xff] }
 0x9ff   : > { %4617 = vmatpush.bf16.msrb.mxu2 %v14020_v21  ;;  %v14046_v21 = vld [vmem:[%s17428_s12 + $0x80] sm:$0xff] }
 0xa02   : > { %4498 = vmatpush.bf16.msra.mxu0 %v14001_v32  ;;  %v14016_v32 = vld [vmem:[%s17427_s11 + $0x90] sm:$0xff] }
 0xa03   : > { %4618 = vmatpush.bf16.msrb.mxu2 %v14019_v25  ;;  %v14085_v25 = vld [vmem:[%s17429_s13 + $0xb8] sm:$0xff] }
 0xa06   : > { %4499 = vmatpush.bf16.msra.mxu0 %v14000_v33  ;;  %v14024_v33 = vld [vmem:[%s17427_s11 + $0xd0] sm:$0xff] }
 0xa07   : > { %4619 = vmatpush.bf16.msrb.mxu2 %v14018_v27 }
 0xa0a   : > { %4500 = vmatpush.bf16.msra.mxu0 %v13999_v35  ;;  %v14044_v35 = vld [vmem:[%s17428_s12 + $0x70] sm:$0xff] }
 0xa0e   : > { %4501 = vmatpush.bf16.msra.mxu0 %v13998_v38  ;;  %v14043_v38 = vld [vmem:[%s17428_s12 + $0x68] sm:$0xff] }
 0xa48   : > { %v3815_v57 = vpop.xlane.xlu2 %3814 }
 0xa49   : > { %v3816_v58 = vmul.f32 %v3815_v57, %v15123_v5  ;;  %v13995_v57 = vld [vmem:[%s17426_s10 + $0xe8] sm:$0xff] }
 0xa4a   : > { %4198 = vmatpush.bf16.msra.mxu3 %v13995_v57  ;;  %v14053_v57 = vld [vmem:[%s17428_s12 + $0xb8] sm:$0xff] }
 0xa4b   : > { %v15686_v59 = vsub.f32 %v3813_v31, %v3816_v58  ;;  %v11396_v31 = vor.u32 %v13966_v28, %v11393_v30  ;;  %v14034_v58 = vld [vmem:[%s17428_s12 + $0x20] sm:$0xff]  ;;  %v14017_v30 = vld [vmem:[%s17427_s11 + $0x98] sm:$0xff] }
 0xa4c   : > { %v14026_v28 = vld [vmem:[%s17427_s11 + $0xe0] sm:$0xff]  ;;  %4620 = vmatpush.bf16.msrb.mxu2 %v14017_v30 }
 0xa4d   : > { %v3818_v60 = vmul.f32 %v15686_v59, %v15686_v59  ;;  %4077 = vmatpush.bf16.msrb.mxu1 %v11396_v31  ;;  %v14025_v31 = vld [vmem:[%s17427_s11 + $0xd8] sm:$0xff] }
 0xa4e   : > { %4199 = vmatpush.bf16.msra.mxu3 %v13994_v62  ;;  %v14052_v62 = vld [vmem:[%s17428_s12 + $0xb0] sm:$0xff] }
 0xa4f   : > { %3819 = vadd.xlane.f32.xlu0 %v3818_v60  ;;  %v14011_v60 = vld [vmem:[%s17427_s11 + $0x68] sm:$0xff] }
 0xa50   : > { %4621 = vmatpush.bf16.msrb.mxu2 %v14016_v32  ;;  %v14092_v32 = vld [vmem:[%s17429_s13 + $0xf0] sm:$0xff] }
 0xa51   : > { %4555 = vmatpush.bf16.msra.mxu1 %v14013_v53 }
 0xa52   : > { %4200 = vmatpush.bf16.msra.mxu3 %v13993_v3  ;;  %v14051_v3 = vld [vmem:[%s17428_s12 + $0xa8] sm:$0xff] }
 0xa55   : > { %4556 = vmatpush.bf16.msra.mxu1 %v14012_v55 }
 0xa56   : > { %4201 = vmatpush.bf16.msra.mxu3 %v13992_v9  ;;  %v14050_v9 = vld [vmem:[%s17428_s12 + $0xa0] sm:$0xff] }
 0xa59   : > { %4557 = vmatpush.bf16.msra.mxu1 %v14011_v60 }
 0xa5a   : > { %4202 = vmatpush.bf16.msra.mxu3 %v13991_v13  ;;  %v14057_v13 = vld [vmem:[%s17428_s12 + $0xd8] sm:$0xff] }
 0xa5d   : > { %4558 = vmatpush.bf16.msra.mxu1 %v14010_v1 }
 0xa5e   : > { %4203 = vmatpush.bf16.msra.mxu3 %v13990_v17  ;;  %v14074_v17 = vld [vmem:[%s17429_s13 + $0x60] sm:$0xff] }
 0xa61   : > { %4559 = vmatpush.bf16.msra.mxu1 %v14009_v6  ;;  %v14077_v6 = vld [vmem:[%s17429_s13 + $0x78] sm:$0xff] }
 0xa62   : > { %4677 = vmatpush.bf16.msrb.mxu3 %v14029_v19  ;;  %v14047_v19 = vld [vmem:[%s17428_s12 + $0x88] sm:$0xff] }
 0xa65   : > { %4560 = vmatpush.bf16.msra.mxu1 %v14008_v11 }
 0xa66   : > { %4678 = vmatpush.bf16.msrb.mxu3 %v14028_v22  ;;  %v14054_v22 = vld [vmem:[%s17428_s12 + $0xc0] sm:$0xff] }
 0xa69   : > { %4561 = vmatpush.bf16.msra.mxu1 %v14007_v15  ;;  %v14048_v15 = vld [vmem:[%s17428_s12 + $0x90] sm:$0xff] }
 0xa6a   : > { %4679 = vmatpush.bf16.msrb.mxu3 %v14027_v26  ;;  %v14093_v26 = vld [vmem:[%s17429_s13 + $0xf8] sm:$0xff] }
 0xa6d   : > { %4562 = vmatpush.bf16.msra.mxu1 %v14006_v8  ;;  %v14055_v8 = vld [vmem:[%s17428_s12 + $0xc8] sm:$0xff] }
 0xa6e   : > { %4680 = vmatpush.bf16.msrb.mxu3 %v14026_v28 }
 0xa72   : > { %4681 = vmatpush.bf16.msrb.mxu3 %v14025_v31  ;;  %v14084_v31 = vld [vmem:[%s17429_s13 + $0xb0] sm:$0xff] }
 0xa76   : > { %4682 = vmatpush.bf16.msrb.mxu3 %v14024_v33 }
 0xac2   : > { %v3820_v36 = vpop.xlane.xlu0 %3819 }
 0xac3   : > { %v3821_v37 = vmul.f32 %v3820_v36, %v15123_v5  ;;  %v14015_v36 = vld [vmem:[%s17427_s11 + $0x88] sm:$0xff] }
 0xac4   : > { %4622 = vmatpush.bf16.msrb.mxu2 %v14015_v36  ;;  %v14091_v36 = vld [vmem:[%s17429_s13 + $0xe8] sm:$0xff] }
 0xac5   : > { %v3822_v39 = vadd.f32 1e-05, %v3821_v37  ;;  %v14023_v37 = vld [vmem:[%s17427_s11 + $0xc8] sm:$0xff] }
 0xac6   : > { %4683 = vmatpush.bf16.msrb.mxu3 %v14023_v37 }
 0xac7   : > { %14470 = vrsqrt.f32 %v3822_v39  ;;  %vm3829_vm12 = vweird.f32 %v3822_v39 }
 0xacd   : > { %v14471_v48 = vpop.eup %14470 }
 0xace   : > { %v3824_v40 = vmul.f32 %v14471_v48, %v3822_v39  ;;  %vm3830_vm11 = vweird.f32 %v14471_v48  ;;  %v14014_v39 = vld [vmem:[%s17427_s11 + $0x80] sm:$0xff] }
 0xacf   : > { %vm3831_vm13 = vmor %vm3829_vm12, %vm3830_vm11  ;;  %4623 = vmatpush.bf16.msrb.mxu2 %v14014_v39  ;;  %v14082_v39 = vld [vmem:[%s17429_s13 + $0xa0] sm:$0xff] }
 0xad0   : > { %v3825_v41 = vmul.f32 %v14471_v48, %v3824_v40  ;;  %v14069_v40 = vld [vmem:[%s17429_s13 + $0x38] sm:$0xff] }
 0xad2   : > { %v3826_v42 = vmul.f32 0.5, %v3825_v41  ;;  %v14042_v41 = vld [vmem:[%s17428_s12 + $0x60] sm:$0xff] }
 0xad4   : > { %v3827_v43 = vsub.f32 1.5, %v3826_v42  ;;  %v14068_v42 = vld [vmem:[%s17429_s13 + $0x30] sm:$0xff] }
 0xad6   : > { %v3828_v44 = vmul.f32 %v14471_v48, %v3827_v43  ;;  %v14041_v43 = vld [vmem:[%s17428_s12 + $0x58] sm:$0xff] }
 0xad8   : > { %v3832_v45 = vsel %vm3831_vm13, %v14471_v48, %v3828_v44  ;;  %v14022_v48 = vld [vmem:[%s17427_s11 + $0xc0] sm:$0xff]  ;;  %v14067_v44 = vld [vmem:[%s17429_s13 + $0x28] sm:$0xff] }
 0xad9   : > { %v15770_v46 = vmul.f32 %v3832_v45, %v15686_v59  ;;  %v15814_v59 = vld [vmem:[%s779_s27] sm:$0xff]  ;;  %4684 = vmatpush.bf16.msrb.mxu3 %v14022_v48  ;;  %v14040_v45 = vld [vmem:[%s17428_s12 + $0x50] sm:$0xff] }
 0xada   : > { %v15827_v63 = vpack.c.bf16 %v15814_v59, %v15814_v59 }
 0xadb   : > { %v3976_v34 = vpack.c.bf16 %v15770_v46, %v15770_v46 }
 0xadd   : > { %4065 = vmatmul.bf16.vlgmr.msrb.gmra.mxu0 %v3976_v34  ;;  %4078 = vmatmul.bf16.vlgmr.msrb.gmra.mxu1 %v3976_v34  ;;  %v14039_v34 = vld [vmem:[%s17428_s12 + $0x48] sm:$0xff] }
 0xade   : > { %4738 = vmatpush.bf16.msrb.mxu0 %v14037_v47  ;;  %4799 = vmatpush.bf16.msrb.mxu1 %v14045_v20  ;;  %v14066_v47 = vld [vmem:[%s17429_s13 + $0x20] sm:$0xff]  ;;  %v14073_v20 = vld [vmem:[%s17429_s13 + $0x58] sm:$0xff] }
 0xae2   : > { %4739 = vmatpush.bf16.msrb.mxu0 %v14036_v29  ;;  %4800 = vmatpush.bf16.msrb.mxu1 %v14044_v35  ;;  %v14064_v29 = vld [vmem:[%s17429_s13 + $0x10] sm:$0xff]  ;;  %v14083_v35 = vld [vmem:[%s17429_s13 + $0xa8] sm:$0xff] }
 0xae6   : > { %4740 = vmatpush.bf16.msrb.mxu0 %v14035_v54  ;;  %4801 = vmatpush.bf16.msrb.mxu1 %v14043_v38  ;;  %v14072_v38 = vld [vmem:[%s17429_s13 + $0x50] sm:$0xff] }
 0xaea   : > { %4741 = vmatpush.bf16.msrb.mxu0 %v14034_v58  ;;  %4802 = vmatpush.bf16.msrb.mxu1 %v14042_v41  ;;  %v14061_v58 = vld [vmem:[%s17428_s12 + $0xf8] sm:$0xff]  ;;  %v14071_v41 = vld [vmem:[%s17429_s13 + $0x48] sm:$0xff] }
 0xaed   : > { %4502 = vmatmul.bf16.vlgmr.msra.gmra.mxu0 %v15827_v63  ;;  %4563 = vmatmul.bf16.vlgmr.msra.gmra.mxu1 %v15827_v63 }
 0xaee   : > { %4742 = vmatpush.bf16.msrb.mxu0 %v14033_v0  ;;  %4803 = vmatpush.bf16.msrb.mxu1 %v14041_v43  ;;  %v14060_v0 = vld [vmem:[%s17428_s12 + $0xf0] sm:$0xff]  ;;  %v14089_v43 = vld [vmem:[%s17429_s13 + $0xd8] sm:$0xff] }
 0xaf2   : > { %4743 = vmatpush.bf16.msrb.mxu0 %v14032_v4  ;;  %4804 = vmatpush.bf16.msrb.mxu1 %v14040_v45  ;;  %v14059_v4 = vld [vmem:[%s17428_s12 + $0xe8] sm:$0xff]  ;;  %v14080_v45 = vld [vmem:[%s17429_s13 + $0x90] sm:$0xff] }
 0xaf6   : > { %4744 = vmatpush.bf16.msrb.mxu0 %v14031_v10  ;;  %4805 = vmatpush.bf16.msrb.mxu1 %v14039_v34  ;;  %v14058_v10 = vld [vmem:[%s17428_s12 + $0xe0] sm:$0xff]  ;;  %v14088_v34 = vld [vmem:[%s17429_s13 + $0xd0] sm:$0xff] }
 0xafa   : > { %4745 = vmatpush.bf16.msrb.mxu0 %v14030_v14  ;;  %4806 = vmatpush.bf16.msrb.mxu1 %v14038_v50  ;;  %v14075_v14 = vld [vmem:[%s17429_s13 + $0x68] sm:$0xff] }
 0xafb   : > { %v14087_v50 = vld [vmem:[%s17429_s13 + $0xc8] sm:$0xff] }
 0xafd   : > { %4746 = vmatmul.bf16.vlgmr.msrb.gmra.mxu0 %v15827_v63  ;;  %4807 = vmatmul.bf16.vlgmr.msrb.gmra.mxu1 %v15827_v63 }
 0xafe   : > { %4982 = vmatpush.bf16.msra.mxu0 %v14069_v40  ;;  %5043 = vmatpush.bf16.msra.mxu1 %v14077_v6  ;;  %v14090_v40 = vld [vmem:[%s17429_s13 + $0xe0] sm:$0xff] }
 0xb02   : > { %4983 = vmatpush.bf16.msra.mxu0 %v14068_v42  ;;  %5044 = vmatpush.bf16.msra.mxu1 %v14076_v7  ;;  %v14081_v42 = vld [vmem:[%s17429_s13 + $0x98] sm:$0xff] }
 0xb06   : > { %4984 = vmatpush.bf16.msra.mxu0 %v14067_v44  ;;  %5045 = vmatpush.bf16.msra.mxu1 %v14075_v14  ;;  %v14070_v44 = vld [vmem:[%s17429_s13 + $0x40] sm:$0xff] }
 0xb0a   : > { %4985 = vmatpush.bf16.msra.mxu0 %v14066_v47  ;;  %5046 = vmatpush.bf16.msra.mxu1 %v14074_v17 }
 0xb0e   : > { %4986 = vmatpush.bf16.msra.mxu0 %v14065_v49  ;;  %5047 = vmatpush.bf16.msra.mxu1 %v14073_v20  ;;  %v14079_v49 = vld [vmem:[%s17429_s13 + $0x88] sm:$0xff] }
 0xb12   : > { %4987 = vmatpush.bf16.msra.mxu0 %v14064_v29  ;;  %5048 = vmatpush.bf16.msra.mxu1 %v14072_v38  ;;  %v14078_v29 = vld [vmem:[%s17429_s13 + $0x80] sm:$0xff] }
 0xb16   : > { %4988 = vmatpush.bf16.msra.mxu0 %v14063_v51  ;;  %5049 = vmatpush.bf16.msra.mxu1 %v14071_v41 }
 0xb1a   : > { %4989 = vmatpush.bf16.msra.mxu0 %v14062_v56  ;;  %5050 = vmatpush.bf16.msra.mxu1 %v14070_v44 }
 0xb1d   : > { %4990 = vmatmul.bf16.vlgmr.msra.gmra.mxu0 %v15827_v63  ;;  %5051 = vmatmul.bf16.vlgmr.msra.gmra.mxu1 %v15827_v63 }
 0xb5a   : > { %v4066_v52 = vpop.f32.mrf.mxu0  ;;  %v4079_v53 = vpop.f32.mrf.mxu1 }
 0xb5b   : > { %v4083_v54 = vmax.f32 %v4066_v52, 0.0  ;;  %v4084_v55 = vmax.f32 %v4079_v53, 0.0  ;;  %v14086_v52 = vld [vmem:[%s17429_s13 + $0xc0] sm:$0xff] }
 0xb5d   : > { %v4085_v60 = vpack.c.bf16 %v4083_v54, %v4083_v54  ;;  %v4086_v61 = vpack.c.bf16 %v4084_v55, %v4084_v55 }
 0xb5f   : > { %4191 = vmatmul.bf16.vlgmr.msra.gmra.mxu2 %v4085_v60  ;;  %4204 = vmatmul.bf16.vlgmr.msra.gmra.mxu3 %v4086_v61 }
 0xb60   : > { %4860 = vmatpush.bf16.msra.mxu2 %v14053_v57  ;;  %4921 = vmatpush.bf16.msra.mxu3 %v14061_v58 }
 0xb62   : > { %v4068_v1 = vpop.f32.mrf.mxu0  ;;  %v4081_v2 = vpop.f32.mrf.mxu1 }
 0xb64   : > { %4861 = vmatpush.bf16.msra.mxu2 %v14052_v62  ;;  %4922 = vmatpush.bf16.msra.mxu3 %v14060_v0 }
 0xb68   : > { %4862 = vmatpush.bf16.msra.mxu2 %v14051_v3  ;;  %4923 = vmatpush.bf16.msra.mxu3 %v14059_v4 }
 0xb6a   : > { %v4503_v11 = vpop.f32.mrf.mxu0  ;;  %v4564_v48 = vpop.f32.mrf.mxu1 }
 0xb6b   : > { %v5178_v33 = vpack.c.bf16 %v4503_v11, %v4503_v11  ;;  %v5179_v55 = vpack.c.bf16 %v4564_v48, %v4564_v48 }
 0xb6c   : > { %4863 = vmatpush.bf16.msra.mxu2 %v14050_v9  ;;  %4924 = vmatpush.bf16.msra.mxu3 %v14058_v10 }
 0xb6f   : > { %4624 = vmatmul.bf16.vlgmr.msrb.gmra.mxu2 %v15827_v63  ;;  %4685 = vmatmul.bf16.vlgmr.msrb.gmra.mxu3 %v15827_v63 }
 0xb70   : > { %4864 = vmatpush.bf16.msra.mxu2 %v14049_v12  ;;  %4925 = vmatpush.bf16.msra.mxu3 %v14057_v13  ;;  %v4235_v13 = vld [vmem:[%s16121_s29] sm:$0xff] }
 0xb72   : > { %v4505_v18 = vpop.f32.mrf.mxu0  ;;  %v4566_v47 = vpop.f32.mrf.mxu1 }
 0xb74   : > { %4865 = vmatpush.bf16.msra.mxu2 %v14048_v15  ;;  %4926 = vmatpush.bf16.msra.mxu3 %v14056_v16 }
 0xb78   : > { %4866 = vmatpush.bf16.msra.mxu2 %v14047_v19  ;;  %4927 = vmatpush.bf16.msra.mxu3 %v14055_v8 }
 0xb7a   : > { %v4747_v27 = vpop.f32.mrf.mxu0  ;;  %v4808_v51 = vpop.f32.mrf.mxu1 }
 0xb7b   : > { %v5182_v28 = vpack.c.bf16 %v4747_v27, %v4747_v27  ;;  %v5183_v53 = vpack.c.bf16 %v4808_v51, %v4808_v51 }
 0xb7c   : > { %4867 = vmatpush.bf16.msra.mxu2 %v14046_v21  ;;  %4928 = vmatpush.bf16.msra.mxu3 %v14054_v22 }
 0xb7d   : > { %v5190_v30 = vsel %vm1770_vm0, %v5182_v28, 0  ;;  %v5209_v54 = vsel %vm1770_vm0, %v5183_v53, 0 }
 0xb7e   : > { %5199 = vmatpush.bf16.xpose.msrb.mxu0 %v5190_v30  ;;  %5218 = vmatpush.bf16.xpose.msrb.mxu1 %v5209_v54 }
 0xb7f   : > { %4868 = vmatmul.bf16.vlgmr.msra.gmra.mxu2 %v15827_v63  ;;  %4929 = vmatmul.bf16.vlgmr.msra.gmra.mxu3 %v15827_v63 }
 0xb80   : > { %5104 = vmatpush.bf16.msrb.mxu2 %v14085_v25  ;;  %5165 = vmatpush.bf16.msrb.mxu3 %v14093_v26 }
 0xb82   : > { %v4749_v37 = vpop.f32.mrf.mxu0  ;;  %v4810_v56 = vpop.f32.mrf.mxu1 }
 0xb84   : > { %5105 = vmatpush.bf16.msrb.mxu2 %v14084_v31  ;;  %5166 = vmatpush.bf16.msrb.mxu3 %v14092_v32 }
 0xb85   : > { %11905 = vmatmul.msk.bf16.vlgmr.msrb.gmra.mxu0 %vm1770_vm0, %v5178_v33  ;;  %11906 = vmatmul.msk.bf16.vlgmr.msrb.gmra.mxu1 %vm1770_vm0, %v5179_v55 }
 0xb88   : > { %5106 = vmatpush.bf16.msrb.mxu2 %v14083_v35  ;;  %5167 = vmatpush.bf16.msrb.mxu3 %v14091_v36 }
 0xb8c   : > { %5107 = vmatpush.bf16.msrb.mxu2 %v14082_v39  ;;  %5168 = vmatpush.bf16.msrb.mxu3 %v14090_v40 }
 0xb90   : > { %5108 = vmatpush.bf16.msrb.mxu2 %v14081_v42  ;;  %5169 = vmatpush.bf16.msrb.mxu3 %v14089_v43 }
 0xb94   : > { %5109 = vmatpush.bf16.msrb.mxu2 %v14080_v45  ;;  %5170 = vmatpush.bf16.msrb.mxu3 %v14088_v34 }
 0xb98   : > { %5110 = vmatpush.bf16.msrb.mxu2 %v14079_v49  ;;  %5171 = vmatpush.bf16.msrb.mxu3 %v14087_v50 }
 0xb9a   : > { %v4991_v57 = vpop.f32.mrf.mxu0  ;;  %v5052_v25 = vpop.f32.mrf.mxu1 }
 0xb9b   : > { %v5318_v58 = vpack.c.bf16 %v4991_v57, %v4991_v57  ;;  %v5319_v26 = vpack.c.bf16 %v5052_v25, %v5052_v25 }
 0xb9c   : > { %5111 = vmatpush.bf16.msrb.mxu2 %v14078_v29  ;;  %5172 = vmatpush.bf16.msrb.mxu3 %v14086_v52 }
 0xb9d   : > { %v5326_v60 = vsel %vm1911_vm1, %v5318_v58, 0  ;;  %v5345_v27 = vsel %vm1911_vm1, %v5319_v26, 0 }
 0xb9e   : > { %5335 = vmatpush.bf16.msra.mxu0 %v5326_v60  ;;  %5354 = vmatpush.bf16.msra.mxu1 %v5345_v27 }
 0xb9f   : > { %5112 = vmatmul.bf16.vlgmr.msrb.gmra.mxu2 %v15827_v63  ;;  %5173 = vmatmul.bf16.vlgmr.msrb.gmra.mxu3 %v15827_v63 }
 0xba2   : > { %v4993_v0 = vpop.f32.mrf.mxu0  ;;  %v5054_v28 = vpop.f32.mrf.mxu1 }
 0xbe2   : > { %v16113_v61 = vpop.f32.mrf.mxu2  ;;  %v16115_v62 = vpop.f32.mrf.mxu3 }
 0xbe3   : > { %v4193_v58 = vadd.f32 %v16113_v61, %v15770_v46 }
 0xbe5   : > { %v16139_v60 = vadd.f32 %v16115_v62, %v4193_v58 }
 0xbea   : > { %v4194_v1 = vpop.f32.mrf.mxu2  ;;  %v4207_v2 = vpop.f32.mrf.mxu3 }
 0xbf2   : > { %v4625_v3 = vpop.f32.mrf.mxu2  ;;  %v4686_v4 = vpop.f32.mrf.mxu3 }
 0xbf3   : > { %v5180_v20 = vpack.c.bf16 %v4625_v3, %v4625_v3  ;;  %v5181_v21 = vpack.c.bf16 %v4686_v4, %v4686_v4 }
 0xbfa   : > { %v4627_v63 = vpop.f32.mrf.mxu2  ;;  %v4688_v6 = vpop.f32.mrf.mxu3 }
 0xc02   : > { %v4869_v7 = vpop.f32.mrf.mxu2  ;;  %v4930_v9 = vpop.f32.mrf.mxu3 }
 0xc03   : > { %v5184_v10 = vpack.c.bf16 %v4869_v7, %v4869_v7  ;;  %v5185_v11 = vpack.c.bf16 %v4930_v9, %v4930_v9  ;;  %v5201_v12 = vpop.f32.mrf.mxu0  ;;  %v5220_v33 = vpop.f32.mrf.mxu1 }
 0xc04   : > { %v5262_v14 = vmul.f32 0.17677669, %v5201_v12  ;;  %v5263_v49 = vmul.f32 0.17677669, %v5220_v33 }
 0xc05   : > { %v5228_v15 = vsel %vm1770_vm0, %v5184_v10, 0  ;;  %v5247_v16 = vsel %vm1770_vm0, %v5185_v11, 0 }
 0xc06   : > { %5237 = vmatpush.bf16.xpose.msra.mxu2 %v5228_v15  ;;  %5256 = vmatpush.bf16.xpose.msra.mxu3 %v5247_v16  ;;  %v5266_v17 = vadd.f32 %v5262_v14, %v4235_v13  ;;  %v5267_v54 = vadd.f32 %v5263_v49, %v4235_v13 }
 0xc08   : > { %v5270_v18 = vsel %vm1855_vm2, %v5266_v17, -inf  ;;  %v5273_v55 = vsel %vm1855_vm2, %v5267_v54, -inf }
 0xc09   : > { %5271 = vmax.xlane.f32.xlu0 %v5270_v18  ;;  %v14094_v18 = vld [vmem:[%s17430_s14] sm:$0xff] }
 0xc0a   : > { %v4871_v19 = vpop.f32.mrf.mxu2  ;;  %v4932_v8 = vpop.f32.mrf.mxu3 }
 0xc0b   : > { %v5203_v22 = vpop.f32.mrf.mxu0  ;;  %v5222_v48 = vpop.f32.mrf.mxu1 }
 0xc0c   : > { %v14098_v48 = vld [vmem:[%s17430_s14 + $0x20] sm:$0xff] }
 0xc0d   : > { %11907 = vmatmul.msk.bf16.vlgmr.msra.gmra.mxu2 %vm1770_vm0, %v5180_v20  ;;  %11908 = vmatmul.msk.bf16.vlgmr.msra.gmra.mxu3 %vm1770_vm0, %v5181_v21 }
 0xc22   : > { %v5113_v30 = vpop.f32.mrf.mxu2  ;;  %v5174_v32 = vpop.f32.mrf.mxu3 }
 0xc23   : > { %v5320_v31 = vpack.c.bf16 %v5113_v30, %v5113_v30  ;;  %v5321_v36 = vpack.c.bf16 %v5174_v32, %v5174_v32  ;;  %v14099_v30 = vld [vmem:[%s17430_s14 + $0x28] sm:$0xff]  ;;  %v14097_v32 = vld [vmem:[%s17430_s14 + $0x18] sm:$0xff] }
 0xc24   : > { %5451 = vmatpush.bf16.msrb.mxu1 %v14097_v32  ;;  %v14121_v32 = vld [vmem:[%s17431_s15 + $0x98] sm:$0xff] }
 0xc25   : > { %v5364_v35 = vsel %vm1911_vm1, %v5320_v31, 0  ;;  %v5383_v37 = vsel %vm1911_vm1, %v5321_v36, 0  ;;  %v14101_v31 = vld [vmem:[%s17430_s14 + $0x38] sm:$0xff] }
 0xc26   : > { %5373 = vmatpush.bf16.msrb.mxu2 %v5364_v35  ;;  %5392 = vmatpush.bf16.msrb.mxu3 %v5383_v37 }
 0xc2a   : > { %v5115_v38 = vpop.f32.mrf.mxu2  ;;  %v5176_v39 = vpop.f32.mrf.mxu3  ;;  %5479 = vmatpush.bf16.msra.mxu2 %v14099_v30  ;;  %5507 = vmatpush.bf16.msra.mxu3 %v14101_v31  ;;  %v14105_v30 = vld [vmem:[%s17431_s15 + $0x18] sm:$0xff] }
 0xc2b   : > { %v14113_v31 = vld [vmem:[%s17431_s15 + $0x58] sm:$0xff] }
 0xc2e   : > { %5480 = vmatpush.bf16.msra.mxu2 %v14098_v48  ;;  %v14111_v48 = vld [vmem:[%s17431_s15 + $0x48] sm:$0xff] }
 0xc7c   : > { %v5272_v42 = vpop.xlane.xlu0 %5271 }
 0xc7d   : > { %v5282_v34 = vsub.f32 %v5266_v17, %v5272_v42  ;;  %v14095_v17 = vld [vmem:[%s17430_s14 + $0x8] sm:$0xff] }
 0xc7e   : > { %5423 = vmatpush.bf16.msrb.mxu0 %v14095_v17  ;;  %v14124_v17 = vld [vmem:[%s17431_s15 + $0xb0] sm:$0xff] }
 0xc7f   : > { %v5286_v51 = vmul.f32 1.442695, %v5282_v34 }
 0xc81   : > { %14472 = vpow2.f32 %v5286_v51 }
 0xc82   : > { %5424 = vmatpush.bf16.msrb.mxu0 %v14094_v18 }
 0xc87   : > { %v14473_v56 = vpop.eup %14472 }
 0xc88   : > { %v5294_v57 = vsel %vm1855_vm2, %v14473_v56, 0.0 }
 0xc90   : > { %v5239_v40 = vpop.f32.mrf.mxu2  ;;  %v5258_v41 = vpop.f32.mrf.mxu3 }
 0xc91   : > { %v5264_v43 = vmul.f32 0.17677669, %v5239_v40  ;;  %v5265_v44 = vmul.f32 0.17677669, %v5258_v41  ;;  %v14100_v40 = vld [vmem:[%s17430_s14 + $0x30] sm:$0xff] }
 0xc92   : > { %5508 = vmatpush.bf16.msra.mxu3 %v14100_v40  ;;  %v14096_v41 = vld [vmem:[%s17430_s14 + $0x10] sm:$0xff]  ;;  %v14119_v40 = vld [vmem:[%s17431_s15 + $0x88] sm:$0xff] }
 0xc93   : > { %v5269_v45 = vadd.f32 %v5265_v44, %v4235_v13  ;;  %v5268_v47 = vadd.f32 %v5264_v43, %v4235_v13  ;;  %5452 = vmatpush.bf16.msrb.mxu1 %v14096_v41  ;;  %v14127_v41 = vld [vmem:[%s17431_s15 + $0xc8] sm:$0xff] }
 0xc95   : > { %v5279_v50 = vsel %vm1855_vm2, %v5269_v45, -inf  ;;  %v5276_v29 = vsel %vm1855_vm2, %v5268_v47, -inf }
 0xc96   : > { %5280 = vmax.xlane.f32.xlu2 %v5279_v50  ;;  %5277 = vmax.xlane.f32.xlu1 %v5276_v29 }
 0xc98   : > { %v5241_v52 = vpop.f32.mrf.mxu2  ;;  %v5260_v53 = vpop.f32.mrf.mxu3 }
 0xc9e   : > { %5274 = vmax.xlane.f32.xlu1 %v5273_v55 }
 0xca6   : > { %5295 = vadd.xlane.f32.xlu1 %v5294_v57 }
 0xcae   : > { %4209 = vadd.xlane.f32.xlu1 %v16139_v60 }
 0xd09   : > { %v5281_v0 = vpop.xlane.xlu2 %5280  ;;  %v5278_v1 = vpop.xlane.xlu1 %5277 }
 0xd0a   : > { %v5285_v2 = vsub.f32 %v5269_v45, %v5281_v0  ;;  %v5284_v3 = vsub.f32 %v5268_v47, %v5278_v1 }
 0xd0c   : > { %v5292_v4 = vmul.f32 1.442695, %v5285_v2  ;;  %v5290_v63 = vmul.f32 1.442695, %v5284_v3 }
 0xd0e   : > { %14474 = vpow2.f32 %v5292_v4 }
 0xd0f   : > { %14476 = vpow2.f32 %v5290_v63 }
 0xd11   : > { %v5275_v6 = vpop.xlane.xlu1 %5274 }
 0xd12   : > { %v5283_v7 = vsub.f32 %v5267_v54, %v5275_v6 }
 0xd14   : > { %v14475_v9 = vpop.eup %14474  ;;  %v5288_v10 = vmul.f32 1.442695, %v5283_v7 }
 0xd15   : > { %v14477_v11 = vpop.eup %14476  ;;  %v5303_v46 = vsel %vm1855_vm2, %v14475_v9, 0.0 }
 0xd16   : > { %14478 = vpow2.f32 %v5288_v10  ;;  %v5300_v61 = vsel %vm1855_vm2, %v14477_v11, 0.0  ;;  %5304 = vadd.xlane.f32.xlu0 %v5303_v46 }
 0xd17   : > { %5301 = vadd.xlane.f32.xlu2 %v5300_v61 }
 0xd19   : > { %v5296_v62 = vpop.xlane.xlu1 %5295 }
 0xd1a   : > { %14480 = vrcp.f32 %v5296_v62 }
 0xd1c   : > { %v14479_v12 = vpop.eup %14478 }
 0xd1d   : > { %v5297_v13 = vsel %vm1855_vm2, %v14479_v12, 0.0 }
 0xd1f   : > { %5298 = vadd.xlane.f32.xlu2 %v5297_v13  ;;  %v14133_v13 = vld [vmem:[%s17431_s15 + $0xf8] sm:$0xff] }
 0xd20   : > { %v14481_v14 = vpop.eup %14480 }
 0xd21   : > { %v5310_v15 = vmul.f32 %v14481_v14, %v14473_v56  ;;  %v4210_v0 = vpop.xlane.xlu1 %4209 }
 0xd22   : > { %v4211_v3 = vmul.f32 %v4210_v0, %v15123_v5  ;;  %v14146_v0 = vld [vmem:[%s17432_s16 + $0x60] sm:$0xff] }
 0xd23   : > { %v5314_v16 = vpack.c.bf16 %v5310_v15, %v5310_v15 }
 0xd24   : > { %v16203_v7 = vsub.f32 %v16139_v60, %v4211_v3  ;;  %v14117_v60 = vld [vmem:[%s17431_s15 + $0x78] sm:$0xff] }
 0xd25   : > { %11909 = vmatmul.msk.bf16.vlgmr.msra.gmra.mxu0 %vm1855_vm2, %v5314_v16  ;;  %v14116_v16 = vld [vmem:[%s17431_s15 + $0x70] sm:$0xff]  ;;  %v14137_v3 = vld [vmem:[%s17432_s16 + $0x18] sm:$0xff] }
 0xd26   : > { %11949 = vmatpush.msk.msra.mxu0 %vm15062_vm3, %v14557_v24  ;;  %v4213_v10 = vmul.f32 %v16203_v7, %v16203_v7 }
 0xd89   : > { %v5305_v19 = vpop.xlane.xlu0 %5304 }
 0xd8a   : > { %v5302_v8 = vpop.xlane.xlu2 %5301  ;;  %14482 = vrcp.f32 %v5305_v19  ;;  %v14132_v19 = vld [vmem:[%s17431_s15 + $0xf0] sm:$0xff] }
 0xd8b   : > { %14484 = vrcp.f32 %v5302_v8  ;;  %v14107_v8 = vld [vmem:[%s17431_s15 + $0x28] sm:$0xff] }
 0xd90   : > { %v14483_v20 = vpop.eup %14482 }
 0xd91   : > { %v14485_v21 = vpop.eup %14484  ;;  %v5313_v22 = vmul.f32 %v14483_v20, %v14475_v9  ;;  %v14115_v20 = vld [vmem:[%s17431_s15 + $0x68] sm:$0xff] }
 0xd92   : > { %v5312_v25 = vmul.f32 %v14485_v21, %v14477_v11  ;;  %v5299_v26 = vpop.xlane.xlu2 %5298  ;;  %v14123_v21 = vld [vmem:[%s17431_s15 + $0xa8] sm:$0xff] }
 0xd93   : > { %v5317_v27 = vpack.c.bf16 %v5313_v22, %v5313_v22  ;;  %14486 = vrcp.f32 %v5299_v26  ;;  %v14114_v26 = vld [vmem:[%s17431_s15 + $0x60] sm:$0xff] }
 0xd94   : > { %v5316_v28 = vpack.c.bf16 %v5312_v25, %v5312_v25 }
 0xd95   : > { %11912 = vmatmul.msk.bf16.vlgmr.msrb.gmra.mxu3 %vm1855_vm2, %v5317_v27  ;;  %v14122_v27 = vld [vmem:[%s17431_s15 + $0xa0] sm:$0xff] }
 0xd96   : > { %11911 = vmatmul.msk.bf16.vlgmr.msrb.gmra.mxu2 %vm1855_vm2, %v5316_v28  ;;  %11955 = vmatpush.msk.msrb.mxu3 %vm15062_vm3, %v14557_v24  ;;  %v14130_v28 = vld [vmem:[%s17431_s15 + $0xe0] sm:$0xff] }
 0xd97   : > { %11953 = vmatpush.msk.msrb.mxu2 %vm15062_vm3, %v14557_v24 }
 0xd99   : > { %v14487_v33 = vpop.eup %14486 }
 0xd9a   : > { %v5311_v35 = vmul.f32 %v14487_v33, %v14479_v12  ;;  %v14125_v12 = vld [vmem:[%s17431_s15 + $0xb8] sm:$0xff] }
 0xd9b   : > { %v14129_v33 = vld [vmem:[%s17431_s15 + $0xd8] sm:$0xff] }
 0xd9c   : > { %v5315_v36 = vpack.c.bf16 %v5311_v35, %v5311_v35 }
 0xd9e   : > { %11910 = vmatmul.msk.bf16.vlgmr.msra.gmra.mxu1 %vm1855_vm2, %v5315_v36  ;;  %v14112_v36 = vld [vmem:[%s17431_s15 + $0x50] sm:$0xff] }
 0xd9f   : > { %11951 = vmatpush.msk.msra.mxu1 %vm15062_vm3, %v14557_v24 }
 0xda2   : > { %v5337_v37 = vpop.f32.mrf.mxu0 }
 0xda3   : > { %v5398_v38 = vpack.c.bf16 %v5337_v37, %v5337_v37  ;;  %v14120_v37 = vld [vmem:[%s17431_s15 + $0x90] sm:$0xff] }
 0xda5   : > { %11921 = vmatmul.msk.bf16.vlgmr.msrb.gmra.mxu0 %vm1770_vm0, %v5398_v38  ;;  %v14128_v38 = vld [vmem:[%s17431_s15 + $0xd0] sm:$0xff] }
 0xdaa   : > { %v5339_v39 = vpop.f32.mrf.mxu0 }
 0xdab   : > { %v14103_v39 = vld [vmem:[%s17431_s15 + $0x8] sm:$0xff] }
 0xdb5   : > { %11950 = vmatmul.msk.f32.vlgmr.msra.gmra.mxu0 %vm1855_vm2, %v5310_v15  ;;  %v14108_v15 = vld [vmem:[%s17431_s15 + $0x30] sm:$0xff] }
 0xe18   : > { %v5394_v42 = vpop.f32.mrf.mxu3 }
 0xe19   : > { %v5375_v43 = vpop.f32.mrf.mxu2  ;;  %v5401_v44 = vpack.c.bf16 %v5394_v42, %v5394_v42  ;;  %v14102_v42 = vld [vmem:[%s17431_s15] sm:$0xff] }
 0xe1a   : > { %v5400_v45 = vpack.c.bf16 %v5375_v43, %v5375_v43  ;;  %v14110_v43 = vld [vmem:[%s17431_s15 + $0x40] sm:$0xff] }
 0xe1b   : > { %v5356_v47 = vpop.f32.mrf.mxu1  ;;  %11948 = vmatmul.msk.bf16.vlgmr.msra.gmra.mxu3 %vm1770_vm0, %v5401_v44  ;;  %v14118_v44 = vld [vmem:[%s17431_s15 + $0x80] sm:$0xff] }
 0xe1c   : > { %v5399_v34 = vpack.c.bf16 %v5356_v47, %v5356_v47  ;;  %11939 = vmatmul.msk.bf16.vlgmr.msra.gmra.mxu2 %vm1770_vm0, %v5400_v45  ;;  %6075 = vmatpush.bf16.msra.mxu3 %v14133_v13  ;;  %v14126_v45 = vld [vmem:[%s17431_s15 + $0xc0] sm:$0xff]  ;;  %v14141_v47 = vld [vmem:[%s17432_s16 + $0x38] sm:$0xff] }
 0xe1d   : > { %6014 = vmatpush.bf16.msra.mxu2 %v14125_v12  ;;  %v14134_v13 = vld [vmem:[%s17432_s16] sm:$0xff] }
 0xe1e   : > { %11930 = vmatmul.msk.bf16.vlgmr.msrb.gmra.mxu1 %vm1770_vm0, %v5399_v34  ;;  %v14149_v34 = vld [vmem:[%s17432_s16 + $0x78] sm:$0xff] }
 0xe1f   : > { %5953 = vmatpush.bf16.msrb.mxu1 %v14117_v60  ;;  %v14159_v60 = vld [vmem:[%s17432_s16 + $0xc8] sm:$0xff] }
 0xe20   : > { %v5396_v49 = vpop.f32.mrf.mxu3  ;;  %6076 = vmatpush.bf16.msra.mxu3 %v14132_v19 }
 0xe21   : > { %v5377_v50 = vpop.f32.mrf.mxu2  ;;  %6015 = vmatpush.bf16.msra.mxu2 %v14124_v17  ;;  %v14157_v49 = vld [vmem:[%s17432_s16 + $0xb8] sm:$0xff]  ;;  %v14158_v17 = vld [vmem:[%s17432_s16 + $0xc0] sm:$0xff] }
 0xe22   : > { %v5426_v29 = vpop.f32.mrf.mxu0  ;;  %v14165_v50 = vld [vmem:[%s17432_s16 + $0xf8] sm:$0xff] }
 0xe23   : > { %v5358_v51 = vpop.f32.mrf.mxu1  ;;  %5954 = vmatpush.bf16.msrb.mxu1 %v14116_v16  ;;  %v14150_v16 = vld [vmem:[%s17432_s16 + $0x80] sm:$0xff] }
 0xe24   : > { %v14148_v51 = vld [vmem:[%s17432_s16 + $0x70] sm:$0xff] }
 0xe25   : > { %6016 = vmatpush.bf16.msra.mxu2 %v14123_v21 }
 0xe27   : > { %5955 = vmatpush.bf16.msrb.mxu1 %v14115_v20 }
 0xe29   : > { %6017 = vmatpush.bf16.msra.mxu2 %v14122_v27 }
 0xe2a   : > { %v5428_v52 = vpop.f32.mrf.mxu0 }
 0xe2b   : > { %11956 = vmatmul.msk.f32.vlgmr.msrb.gmra.mxu3 %vm1855_vm2, %v5313_v22  ;;  %v14131_v22 = vld [vmem:[%s17431_s15 + $0xe8] sm:$0xff]  ;;  %5956 = vmatpush.bf16.msrb.mxu1 %v14114_v26  ;;  %v14156_v52 = vld [vmem:[%s17432_s16 + $0xb0] sm:$0xff] }
 0xe2c   : > { %11954 = vmatmul.msk.f32.vlgmr.msrb.gmra.mxu2 %vm1855_vm2, %v5312_v25  ;;  %v14106_v25 = vld [vmem:[%s17431_s15 + $0x20] sm:$0xff]  ;;  %6077 = vmatpush.bf16.msra.mxu3 %v14131_v22 }
 0xe2d   : > { %6018 = vmatpush.bf16.msra.mxu2 %v14121_v32 }
 0xe2e   : > { %11952 = vmatmul.msk.f32.vlgmr.msra.gmra.mxu1 %vm1855_vm2, %v5311_v35  ;;  %v14104_v35 = vld [vmem:[%s17431_s15 + $0x10] sm:$0xff] }
 0xe2f   : > { %5957 = vmatpush.bf16.msrb.mxu1 %v14113_v31 }
 0xe30   : > { %6078 = vmatpush.bf16.msra.mxu3 %v14130_v28 }
 0xe31   : > { %6019 = vmatpush.bf16.msra.mxu2 %v14120_v37 }
 0xe32   : > { %v5558_v53 = vpop.f32.mrf.mxu0 }
 0xe33   : > { %5630 = vst [vmem:[%s16197_s25] sm:$0xff] %v5558_v53  ;;  %5958 = vmatpush.bf16.msrb.mxu1 %v14112_v36  ;;  %v14164_v53 = vld [vmem:[%s17432_s16 + $0xf0] sm:$0xff] }
 0xe34   : > { %6079 = vmatpush.bf16.msra.mxu3 %v14129_v33 }
 0xe35   : > { %6020 = vmatpush.bf16.msra.mxu2 %v14119_v40 }
 0xe37   : > { %5959 = vmatpush.bf16.msrb.mxu1 %v14111_v48  ;;  %v14181_v48 = vld [vmem:[%s17433_s17 + $0x78] sm:$0xff] }
 0xe38   : > { %6080 = vmatpush.bf16.msra.mxu3 %v14128_v38 }
 0xe39   : > { %6021 = vmatpush.bf16.msra.mxu2 %v14118_v44 }
 0xe3b   : > { %5960 = vmatpush.bf16.msrb.mxu1 %v14110_v43  ;;  %v14180_v43 = vld [vmem:[%s17433_s17 + $0x70] sm:$0xff] }
 0xe3c   : > { %6081 = vmatpush.bf16.msra.mxu3 %v14127_v41  ;;  %v14189_v41 = vld [vmem:[%s17433_s17 + $0xb8] sm:$0xff] }
 0xe3d   : > { %6258 = vmatpush.bf16.msrb.mxu2 %v14157_v49  ;;  %v14179_v49 = vld [vmem:[%s17433_s17 + $0x68] sm:$0xff] }
 0xe3f   : > { %6197 = vmatpush.bf16.msra.mxu1 %v14149_v34  ;;  %v14171_v34 = vld [vmem:[%s17433_s17 + $0x28] sm:$0xff] }
 0xe40   : > { %6082 = vmatpush.bf16.msra.mxu3 %v14126_v45  ;;  %v14188_v45 = vld [vmem:[%s17433_s17 + $0xb0] sm:$0xff] }
 0xe41   : > { %6259 = vmatpush.bf16.msrb.mxu2 %v14156_v52 }
 0xe43   : > { %6198 = vmatpush.bf16.msra.mxu1 %v14148_v51  ;;  %v14195_v51 = vld [vmem:[%s17433_s17 + $0xe8] sm:$0xff] }
 0xe44   : > { %6319 = vmatpush.bf16.msrb.mxu3 %v14165_v50 }
 0xe48   : > { %6320 = vmatpush.bf16.msrb.mxu3 %v14164_v53  ;;  %v14170_v53 = vld [vmem:[%s17433_s17 + $0x20] sm:$0xff] }
 0xe9b   : > { %v5454_v54 = vpop.f32.mrf.mxu1 }
 0xe9c   : > { %v5514_v55 = vadd.f32 %v5454_v54, %v5426_v29  ;;  %v14140_v29 = vld [vmem:[%s17432_s16 + $0x30] sm:$0xff]  ;;  %v14139_v54 = vld [vmem:[%s17432_s16 + $0x28] sm:$0xff] }
 0xe9e   : > { %v5510_v56 = vpop.f32.mrf.mxu3 }
 0xe9f   : > { %v5482_v57 = vpop.f32.mrf.mxu2 }
 0xea0   : > { %v5515_v58 = vadd.f32 %v5514_v55, %v5482_v57  ;;  %v14147_v55 = vld [vmem:[%s17432_s16 + $0x68] sm:$0xff] }
 0xea1   : > { %v14163_v57 = vld [vmem:[%s17432_s16 + $0xe8] sm:$0xff]  ;;  %6199 = vmatpush.bf16.msra.mxu1 %v14147_v55  ;;  %v14186_v55 = vld [vmem:[%s17433_s17 + $0xa0] sm:$0xff] }
 0xea2   : > { %v5516_v1 = vadd.f32 %v5515_v58, %v5510_v56  ;;  %v14155_v56 = vld [vmem:[%s17432_s16 + $0xa8] sm:$0xff]  ;;  %6321 = vmatpush.bf16.msrb.mxu3 %v14163_v57  ;;  %v14138_v58 = vld [vmem:[%s17432_s16 + $0x20] sm:$0xff]  ;;  %v14169_v57 = vld [vmem:[%s17433_s17 + $0x18] sm:$0xff] }
 0xea3   : > { %v5456_v2 = vpop.f32.mrf.mxu1  ;;  %6260 = vmatpush.bf16.msrb.mxu2 %v14155_v56 }
 0xea4   : > { %v5517_v4 = vadd.f32 %v5516_v1, %v15814_v59  ;;  %v14109_v59 = vld [vmem:[%s17431_s15 + $0x38] sm:$0xff]  ;;  %v14154_v1 = vld [vmem:[%s17432_s16 + $0xa0] sm:$0xff] }
 0xea5   : > { %5892 = vmatpush.bf16.msrb.mxu0 %v14109_v59  ;;  %v14162_v2 = vld [vmem:[%s17432_s16 + $0xe0] sm:$0xff]  ;;  %6200 = vmatpush.bf16.msra.mxu1 %v14146_v0  ;;  %v14151_v59 = vld [vmem:[%s17432_s16 + $0x88] sm:$0xff]  ;;  %v14185_v0 = vld [vmem:[%s17433_s17 + $0x98] sm:$0xff] }
 0xea6   : > { %5518 = vadd.xlane.f32.xlu0 %v5517_v4  ;;  %v5512_v63 = vpop.f32.mrf.mxu3  ;;  %6322 = vmatpush.bf16.msrb.mxu3 %v14162_v2  ;;  %v14168_v2 = vld [vmem:[%s17433_s17 + $0x10] sm:$0xff] }
 0xea7   : > { %v5484_v6 = vpop.f32.mrf.mxu2  ;;  %6261 = vmatpush.bf16.msrb.mxu2 %v14154_v1  ;;  %v14153_v63 = vld [vmem:[%s17432_s16 + $0x98] sm:$0xff] }
 0xea8   : > { %v14161_v6 = vld [vmem:[%s17432_s16 + $0xd8] sm:$0xff] }
 0xea9   : > { %5893 = vmatpush.bf16.msrb.mxu0 %v14108_v15  ;;  %v14142_v15 = vld [vmem:[%s17432_s16 + $0x40] sm:$0xff]  ;;  %v14193_v1 = vld [vmem:[%s17433_s17 + $0xd8] sm:$0xff] }
 0xeaa   : > { %6323 = vmatpush.bf16.msrb.mxu3 %v14161_v6  ;;  %v14167_v6 = vld [vmem:[%s17433_s17 + $0x8] sm:$0xff] }
 0xeab   : > { %v5581_v9 = vpop.f32.mrf.mxu1  ;;  %6262 = vmatpush.bf16.msrb.mxu2 %v14153_v63  ;;  %v14192_v63 = vld [vmem:[%s17433_s17 + $0xd0] sm:$0xff] }
 0xeac   : > { %5631 = vst [vmem:[%s16197_s25 + $0x8] sm:$0xff] %v5581_v9  ;;  %v14136_v9 = vld [vmem:[%s17432_s16 + $0x10] sm:$0xff] }
 0xead   : > { %5894 = vmatpush.bf16.msrb.mxu0 %v14107_v8 }
 0xeae   : > { %4214 = vadd.xlane.f32.xlu0 %v4213_v10  ;;  %v5627_v11 = vpop.f32.mrf.mxu3  ;;  %v14144_v10 = vld [vmem:[%s17432_s16 + $0x50] sm:$0xff] }
 0xeaf   : > { %v5604_v46 = vpop.f32.mrf.mxu2  ;;  %5633 = vst [vmem:[%s16197_s25 + $0x18] sm:$0xff] %v5627_v11  ;;  %v14152_v11 = vld [vmem:[%s17432_s16 + $0x90] sm:$0xff] }
 0xeb0   : > { %5632 = vst [vmem:[%s16197_s25 + $0x10] sm:$0xff] %v5604_v46  ;;  %v14160_v46 = vld [vmem:[%s17432_s16 + $0xd0] sm:$0xff]  ;;  %6263 = vmatpush.bf16.msrb.mxu2 %v14152_v11  ;;  %v14191_v11 = vld [vmem:[%s17433_s17 + $0xc8] sm:$0xff] }
 0xeb1   : > { %5895 = vmatpush.bf16.msrb.mxu0 %v14106_v25  ;;  %6324 = vmatpush.bf16.msrb.mxu3 %v14160_v46  ;;  %v14166_v46 = vld [vmem:[%s17433_s17] sm:$0xff] }
 0xeb4   : > { %6264 = vmatpush.bf16.msrb.mxu2 %v14151_v59  ;;  %v14190_v59 = vld [vmem:[%s17433_s17 + $0xc0] sm:$0xff] }
 0xeb5   : > { %5896 = vmatpush.bf16.msrb.mxu0 %v14105_v30  ;;  %6325 = vmatpush.bf16.msrb.mxu3 %v14159_v60 }
 0xeb8   : > { %6265 = vmatpush.bf16.msrb.mxu2 %v14150_v16 }
 0xeb9   : > { %5897 = vmatpush.bf16.msrb.mxu0 %v14104_v35  ;;  %6326 = vmatpush.bf16.msrb.mxu3 %v14158_v17 }
 0xebd   : > { %5898 = vmatpush.bf16.msrb.mxu0 %v14103_v39  ;;  %v14173_v39 = vld [vmem:[%s17433_s17 + $0x38] sm:$0xff] }
 0xec1   : > { %5899 = vmatpush.bf16.msrb.mxu0 %v14102_v42  ;;  %v14172_v42 = vld [vmem:[%s17433_s17 + $0x30] sm:$0xff] }
 0xec5   : > { %6136 = vmatpush.bf16.msra.mxu0 %v14141_v47  ;;  %v14196_v47 = vld [vmem:[%s17433_s17 + $0xf0] sm:$0xff] }
 0xec9   : > { %6137 = vmatpush.bf16.msra.mxu0 %v14140_v29  ;;  %v14187_v29 = vld [vmem:[%s17433_s17 + $0xa8] sm:$0xff] }
 0xecd   : > { %6138 = vmatpush.bf16.msra.mxu0 %v14139_v54  ;;  %v14178_v54 = vld [vmem:[%s17433_s17 + $0x60] sm:$0xff] }
 0xed1   : > { %6139 = vmatpush.bf16.msra.mxu0 %v14138_v58  ;;  %v14177_v58 = vld [vmem:[%s17433_s17 + $0x58] sm:$0xff] }
 0xed5   : > { %6140 = vmatpush.bf16.msra.mxu0 %v14137_v3  ;;  %v14176_v3 = vld [vmem:[%s17433_s17 + $0x50] sm:$0xff] }
 0xed9   : > { %6141 = vmatpush.bf16.msra.mxu0 %v14136_v9  ;;  %v14175_v9 = vld [vmem:[%s17433_s17 + $0x48] sm:$0xff] }
 0xf19   : > { %v5519_v61 = vpop.xlane.xlu0 %5518 }
 0xf1a   : > { %v5520_v62 = vmul.f32 %v5519_v61, %v15123_v5  ;;  %v14135_v61 = vld [vmem:[%s17432_s16 + $0x8] sm:$0xff] }
 0xf1b   : > { %6142 = vmatpush.bf16.msra.mxu0 %v14135_v61  ;;  %v14174_v61 = vld [vmem:[%s17433_s17 + $0x40] sm:$0xff] }
 0xf1c   : > { %v16223_v14 = vsub.f32 %v5517_v4, %v5520_v62  ;;  %v14145_v4 = vld [vmem:[%s17432_s16 + $0x58] sm:$0xff]  ;;  %v14143_v62 = vld [vmem:[%s17432_s16 + $0x48] sm:$0xff] }
 0xf1d   : > { %6201 = vmatpush.bf16.msra.mxu1 %v14145_v4  ;;  %v14184_v4 = vld [vmem:[%s17433_s17 + $0x90] sm:$0xff] }
 0xf1e   : > { %v5522_v18 = vmul.f32 %v16223_v14, %v16223_v14 }
 0xf1f   : > { %6143 = vmatpush.bf16.msra.mxu0 %v14134_v13 }
 0xf20   : > { %5523 = vadd.xlane.f32.xlu2 %v5522_v18 }
 0xf21   : > { %6202 = vmatpush.bf16.msra.mxu1 %v14144_v10  ;;  %v4215_v12 = vpop.xlane.xlu0 %4214  ;;  %v14183_v10 = vld [vmem:[%s17433_s17 + $0x88] sm:$0xff] }
 0xf22   : > { %v4216_v18 = vmul.f32 %v4215_v12, %v15123_v5 }
 0xf24   : > { %v4217_v19 = vadd.f32 1e-05, %v4216_v18 }
 0xf25   : > { %6203 = vmatpush.bf16.msra.mxu1 %v14143_v62  ;;  %v14182_v62 = vld [vmem:[%s17433_s17 + $0x80] sm:$0xff] }
 0xf26   : > { %14488 = vrsqrt.f32 %v4217_v19  ;;  %vm4224_vm6 = vweird.f32 %v4217_v19 }
 0xf29   : > { %6204 = vmatpush.bf16.msra.mxu1 %v14142_v15 }
 0xf2c   : > { %v14489_v22 = vpop.eup %14488 }
 0xf2d   : > { %v4219_v27 = vmul.f32 %v14489_v22, %v4217_v19  ;;  %vm4225_vm5 = vweird.f32 %v14489_v22 }
 0xf2e   : > { %vm4226_vm7 = vmor %vm4224_vm6, %vm4225_vm5 }
 0xf2f   : > { %v4220_v31 = vmul.f32 %v14489_v22, %v4219_v27 }
 0xf31   : > { %v4221_v35 = vmul.f32 0.5, %v4220_v31 }
 0xf33   : > { %v4222_v40 = vsub.f32 1.5, %v4221_v35 }
 0xf35   : > { %v4223_v44 = vmul.f32 %v14489_v22, %v4222_v40 }
 0xf37   : > { %v4227_v50 = vsel %vm4226_vm7, %v14489_v22, %v4223_v44 }
 0xf38   : > { %v4228_v52 = vmul.f32 %v4227_v50, %v16203_v7  ;;  %v14194_v7 = vld [vmem:[%s17433_s17 + $0xe0] sm:$0xff] }
 0xf3a   : > { %v16463_v56 = vpack.c.bf16 %v4228_v52, %v4228_v52 }
 0xf93   : > { %v5524_v8 = vpop.xlane.xlu2 %5523 }
 0xf94   : > { %v5525_v20 = vmul.f32 %v5524_v8, %v15123_v5 }
 0xf96   : > { %v5526_v21 = vadd.f32 1e-05, %v5525_v20 }
 0xf98   : > { %14490 = vrsqrt.f32 %v5526_v21  ;;  %vm5533_vm15 = vweird.f32 %v5526_v21 }
 0xf9e   : > { %v14491_v25 = vpop.eup %14490 }
 0xf9f   : > { %v5528_v26 = vmul.f32 %v14491_v25, %v5526_v21  ;;  %vm5534_vm14 = vweird.f32 %v14491_v25 }
 0xfa0   : > { %vm5535_vm4 = vmor %vm5533_vm15, %vm5534_vm14 }
 0xfa1   : > { %v5529_v28 = vmul.f32 %v14491_v25, %v5528_v26 }
 0xfa3   : > { %v5530_v30 = vmul.f32 0.5, %v5529_v28 }
 0xfa5   : > { %v5531_v32 = vsub.f32 1.5, %v5530_v30 }
 0xfa7   : > { %v5532_v33 = vmul.f32 %v14491_v25, %v5531_v32 }
 0xfa9   : > { %v5536_v36 = vsel %vm5535_vm4, %v14491_v25, %v5532_v33 }
 0xfaa   : > { %v16410_v37 = vmul.f32 %v5536_v36, %v16223_v14  ;;  %v14197_v14 = vld [vmem:[%s17433_s17 + $0xf8] sm:$0xff] }
 0xfac   : > { %v5842_v38 = vpack.c.bf16 %v16410_v37, %v16410_v37 }
 0xfae   : > { %5900 = vmatmul.bf16.vlgmr.msrb.gmra.mxu0 %v5842_v38  ;;  %5961 = vmatmul.bf16.vlgmr.msrb.gmra.mxu1 %v5842_v38 }
 0xfaf   : > { %6022 = vmatmul.bf16.vlgmr.msra.gmra.mxu2 %v5842_v38  ;;  %6083 = vmatmul.bf16.vlgmr.msra.gmra.mxu3 %v5842_v38 }
 0xfb0   : > { %6380 = vmatpush.bf16.msrb.mxu0 %v14173_v39  ;;  %6441 = vmatpush.bf16.msrb.mxu1 %v14181_v48 }
 0xfb1   : > { %6502 = vmatpush.bf16.msra.mxu2 %v14189_v41  ;;  %6563 = vmatpush.bf16.msra.mxu3 %v14197_v14 }
 0xfb4   : > { %6381 = vmatpush.bf16.msrb.mxu0 %v14172_v42  ;;  %6442 = vmatpush.bf16.msrb.mxu1 %v14180_v43 }
 0xfb5   : > { %6503 = vmatpush.bf16.msra.mxu2 %v14188_v45  ;;  %6564 = vmatpush.bf16.msra.mxu3 %v14196_v47 }
 0xfb8   : > { %6382 = vmatpush.bf16.msrb.mxu0 %v14171_v34  ;;  %6443 = vmatpush.bf16.msrb.mxu1 %v14179_v49 }
 0xfb9   : > { %6504 = vmatpush.bf16.msra.mxu2 %v14187_v29  ;;  %6565 = vmatpush.bf16.msra.mxu3 %v14195_v51 }
 0xfbc   : > { %6383 = vmatpush.bf16.msrb.mxu0 %v14170_v53  ;;  %6444 = vmatpush.bf16.msrb.mxu1 %v14178_v54 }
 0xfbd   : > { %6505 = vmatpush.bf16.msra.mxu2 %v14186_v55  ;;  %6566 = vmatpush.bf16.msra.mxu3 %v14194_v7 }
 0xfbe   : > { %6144 = vmatmul.bf16.vlgmr.msra.gmra.mxu0 %v16463_v56  ;;  %6205 = vmatmul.bf16.vlgmr.msra.gmra.mxu1 %v16463_v56 }
 0xfbf   : > { %6266 = vmatmul.bf16.vlgmr.msrb.gmra.mxu2 %v16463_v56  ;;  %6327 = vmatmul.bf16.vlgmr.msrb.gmra.mxu3 %v16463_v56 }
 0xfc0   : > { %6384 = vmatpush.bf16.msrb.mxu0 %v14169_v57  ;;  %6445 = vmatpush.bf16.msrb.mxu1 %v14177_v58 }
 0xfc1   : > { %6506 = vmatpush.bf16.msra.mxu2 %v14185_v0  ;;  %6567 = vmatpush.bf16.msra.mxu3 %v14193_v1  ;;  %v4236_v1 = vld [vmem:[%s16537_s19] sm:$0xff] }
 0xfc4   : > { %6385 = vmatpush.bf16.msrb.mxu0 %v14168_v2  ;;  %6446 = vmatpush.bf16.msrb.mxu1 %v14176_v3 }
 0xfc5   : > { %6507 = vmatpush.bf16.msra.mxu2 %v14184_v4  ;;  %6568 = vmatpush.bf16.msra.mxu3 %v14192_v63 }
 0xfc8   : > { %6386 = vmatpush.bf16.msrb.mxu0 %v14167_v6  ;;  %6447 = vmatpush.bf16.msrb.mxu1 %v14175_v9 }
 0xfc9   : > { %6508 = vmatpush.bf16.msra.mxu2 %v14183_v10  ;;  %6569 = vmatpush.bf16.msra.mxu3 %v14191_v11 }
 0xfcc   : > { %6387 = vmatpush.bf16.msrb.mxu0 %v14166_v46  ;;  %6448 = vmatpush.bf16.msrb.mxu1 %v14174_v61 }
 0xfcd   : > { %6509 = vmatpush.bf16.msra.mxu2 %v14182_v62  ;;  %6570 = vmatpush.bf16.msra.mxu3 %v14190_v59 }
 0xfcf   : > { %6388 = vmatmul.bf16.vlgmr.msrb.gmra.mxu0 %v16463_v56  ;;  %6449 = vmatmul.bf16.vlgmr.msrb.gmra.mxu1 %v16463_v56 }
 0xfd0   : > { %6510 = vmatmul.bf16.vlgmr.msra.gmra.mxu2 %v16463_v56  ;;  %6571 = vmatmul.bf16.vlgmr.msra.gmra.mxu3 %v16463_v56 }
0x102b   : > { %v5901_v60 = vpop.f32.mrf.mxu0  ;;  %v5962_v12 = vpop.f32.mrf.mxu1 }
0x102c   : > { %v6576_v35 = vpack.c.bf16 %v5901_v60, %v5901_v60  ;;  %v6577_v36 = vpack.c.bf16 %v5962_v12, %v5962_v12 }
0x1032   : > { %v6023_v13 = vpop.f32.mrf.mxu2  ;;  %v6084_v15 = vpop.f32.mrf.mxu3 }
0x1033   : > { %v5903_v16 = vpop.f32.mrf.mxu0  ;;  %v5964_v17 = vpop.f32.mrf.mxu1  ;;  %v6578_v41 = vpack.c.bf16 %v6023_v13, %v6023_v13  ;;  %v6579_v14 = vpack.c.bf16 %v6084_v15, %v6084_v15 }
0x103a   : > { %v6025_v18 = vpop.f32.mrf.mxu2  ;;  %v6086_v19 = vpop.f32.mrf.mxu3 }
0x103b   : > { %v6145_v8 = vpop.f32.mrf.mxu0  ;;  %v6206_v20 = vpop.f32.mrf.mxu1 }
0x103c   : > { %v6580_v21 = vpack.c.bf16 %v6145_v8, %v6145_v8  ;;  %v6581_v22 = vpack.c.bf16 %v6206_v20, %v6206_v20 }
0x103e   : > { %v6588_v25 = vsel %vm1770_vm0, %v6580_v21, 0  ;;  %v6607_v26 = vsel %vm1770_vm0, %v6581_v22, 0 }
0x103f   : > { %6597 = vmatpush.bf16.xpose.msra.mxu0 %v6588_v25  ;;  %6616 = vmatpush.bf16.xpose.msra.mxu1 %v6607_v26 }
0x1042   : > { %v6267_v27 = vpop.f32.mrf.mxu2  ;;  %v6328_v28 = vpop.f32.mrf.mxu3 }
0x1043   : > { %v6582_v30 = vpack.c.bf16 %v6267_v27, %v6267_v27  ;;  %v6583_v31 = vpack.c.bf16 %v6328_v28, %v6328_v28  ;;  %v6147_v32 = vpop.f32.mrf.mxu0  ;;  %v6208_v33 = vpop.f32.mrf.mxu1 }
0x1045   : > { %v6626_v38 = vsel %vm1770_vm0, %v6582_v30, 0  ;;  %v6645_v39 = vsel %vm1770_vm0, %v6583_v31, 0 }
0x1046   : > { %6635 = vmatpush.bf16.xpose.msrb.mxu2 %v6626_v38  ;;  %6654 = vmatpush.bf16.xpose.msrb.mxu3 %v6645_v39 }
0x1047   : > { %12341 = vmatmul.msk.bf16.vlgmr.msra.gmra.mxu0 %vm1770_vm0, %v6576_v35  ;;  %12342 = vmatmul.msk.bf16.vlgmr.msra.gmra.mxu1 %vm1770_vm0, %v6577_v36 }
0x104a   : > { %v6269_v48 = vpop.f32.mrf.mxu2  ;;  %v6330_v40 = vpop.f32.mrf.mxu3 }
0x104c   : > { %v6389_v42 = vpop.f32.mrf.mxu0  ;;  %v6450_v43 = vpop.f32.mrf.mxu1 }
0x104d   : > { %v6716_v44 = vpack.c.bf16 %v6389_v42, %v6389_v42  ;;  %v6717_v45 = vpack.c.bf16 %v6450_v43, %v6450_v43  ;;  %12343 = vmatmul.msk.bf16.vlgmr.msrb.gmra.mxu2 %vm1770_vm0, %v6578_v41  ;;  %12344 = vmatmul.msk.bf16.vlgmr.msrb.gmra.mxu3 %vm1770_vm0, %v6579_v14  ;;  %v14199_v14 = vld [vmem:[%s17434_s18 + $0x8] sm:$0xff] }
0x104f   : > { %v6724_v47 = vsel %vm1911_vm1, %v6716_v44, 0  ;;  %v6743_v34 = vsel %vm1911_vm1, %v6717_v45, 0 }
0x1050   : > { %6733 = vmatpush.bf16.msrb.mxu0 %v6724_v47  ;;  %6752 = vmatpush.bf16.msrb.mxu1 %v6743_v34 }
0x1053   : > { %v6511_v49 = vpop.f32.mrf.mxu2  ;;  %v6572_v50 = vpop.f32.mrf.mxu3 }
0x1054   : > { %v6718_v29 = vpack.c.bf16 %v6511_v49, %v6511_v49  ;;  %v6719_v51 = vpack.c.bf16 %v6572_v50, %v6572_v50  ;;  %v6391_v52 = vpop.f32.mrf.mxu0  ;;  %v6452_v53 = vpop.f32.mrf.mxu1  ;;  %6821 = vmatpush.bf16.msra.mxu0 %v14199_v14  ;;  %v14219_v14 = vld [vmem:[%s17427_s11 + $0x168] sm:$0xff] }
0x1056   : > { %v6762_v54 = vsel %vm1911_vm1, %v6718_v29, 0  ;;  %v6781_v55 = vsel %vm1911_vm1, %v6719_v51, 0 }
0x1057   : > { %6771 = vmatpush.bf16.msra.mxu2 %v6762_v54  ;;  %6790 = vmatpush.bf16.msra.mxu3 %v6781_v55 }
0x105b   : > { %v6513_v7 = vpop.f32.mrf.mxu2  ;;  %v6574_v57 = vpop.f32.mrf.mxu3 }
0x105c   : > { %v14198_v57 = vld [vmem:[%s17434_s18] sm:$0xff] }
0x105d   : > { %6822 = vmatpush.bf16.msra.mxu0 %v14198_v57  ;;  %v14215_v57 = vld [vmem:[%s17427_s11 + $0x148] sm:$0xff] }
0x10c4   : > { %v6599_v58 = vpop.f32.mrf.mxu0  ;;  %v6618_v0 = vpop.f32.mrf.mxu1 }
0x10c5   : > { %v6660_v2 = vmul.f32 0.17677669, %v6599_v58  ;;  %v6661_v59 = vmul.f32 0.17677669, %v6618_v0  ;;  %v14203_v58 = vld [vmem:[%s17434_s18 + $0x28] sm:$0xff]  ;;  %v14205_v0 = vld [vmem:[%s17434_s18 + $0x38] sm:$0xff] }
0x10c6   : > { %6877 = vmatpush.bf16.msrb.mxu2 %v14203_v58  ;;  %6905 = vmatpush.bf16.msrb.mxu3 %v14205_v0  ;;  %v14223_v58 = vld [vmem:[%s17427_s11 + $0x188] sm:$0xff] }
0x10c7   : > { %v6664_v3 = vadd.f32 %v6660_v2, %v4236_v1  ;;  %v6665_v16 = vadd.f32 %v6661_v59, %v4236_v1  ;;  %v14202_v2 = vld [vmem:[%s17434_s18 + $0x20] sm:$0xff]  ;;  %v14231_v0 = vld [vmem:[%s17427_s11 + $0x1c8] sm:$0xff] }
0x10c9   : > { %v6668_v4 = vsel %vm1855_vm2, %v6664_v3, -inf  ;;  %v6671_v17 = vsel %vm1855_vm2, %v6665_v16, -inf }
0x10ca   : > { %6669 = vmax.xlane.f32.xlu0 %v6668_v4  ;;  %6878 = vmatpush.bf16.msrb.mxu2 %v14202_v2  ;;  %v14200_v4 = vld [vmem:[%s17434_s18 + $0x10] sm:$0xff] }
0x10cc   : > { %v6601_v63 = vpop.f32.mrf.mxu0  ;;  %v6620_v6 = vpop.f32.mrf.mxu1 }
0x10d0   : > { %v6637_v9 = vpop.f32.mrf.mxu2  ;;  %v6656_v10 = vpop.f32.mrf.mxu3 }
0x10d1   : > { %v6662_v11 = vmul.f32 0.17677669, %v6637_v9  ;;  %v6663_v46 = vmul.f32 0.17677669, %v6656_v10 }
0x10d3   : > { %v6667_v61 = vadd.f32 %v6663_v46, %v4236_v1  ;;  %v6666_v62 = vadd.f32 %v6662_v11, %v4236_v1  ;;  %v14201_v1 = vld [vmem:[%s17434_s18 + $0x18] sm:$0xff] }
0x10d4   : > { %6849 = vmatpush.bf16.msra.mxu1 %v14201_v1 }
0x10d5   : > { %v6677_v60 = vsel %vm1855_vm2, %v6667_v61, -inf  ;;  %v6674_v12 = vsel %vm1855_vm2, %v6666_v62, -inf }
0x10d6   : > { %6678 = vmax.xlane.f32.xlu2 %v6677_v60  ;;  %6675 = vmax.xlane.f32.xlu1 %v6674_v12 }
0x10d8   : > { %v6639_v13 = vpop.f32.mrf.mxu2  ;;  %v6658_v15 = vpop.f32.mrf.mxu3  ;;  %6850 = vmatpush.bf16.msra.mxu1 %v14200_v4  ;;  %v14214_v4 = vld [vmem:[%s17427_s11 + $0x140] sm:$0xff] }
0x10de   : > { %6672 = vmax.xlane.f32.xlu1 %v6671_v17 }
0x113d   : > { %v6670_v18 = vpop.xlane.xlu0 %6669 }
0x113e   : > { %v6680_v19 = vsub.f32 %v6664_v3, %v6670_v18  ;;  %v14204_v3 = vld [vmem:[%s17434_s18 + $0x30] sm:$0xff] }
0x113f   : > { %6906 = vmatpush.bf16.msrb.mxu3 %v14204_v3  ;;  %v14206_v3 = vld [vmem:[%s17427_s11 + $0x100] sm:$0xff] }
0x1140   : > { %v6684_v8 = vmul.f32 1.442695, %v6680_v19 }
0x1142   : > { %14492 = vpow2.f32 %v6684_v8 }
0x1148   : > { %v14493_v20 = vpop.eup %14492 }
0x1149   : > { %v6679_v21 = vpop.xlane.xlu2 %6678  ;;  %v6676_v22 = vpop.xlane.xlu1 %6675  ;;  %v6692_v25 = vsel %vm1855_vm2, %v14493_v20, 0.0 }
0x114a   : > { %v6683_v26 = vsub.f32 %v6667_v61, %v6679_v21  ;;  %v6682_v27 = vsub.f32 %v6666_v62, %v6676_v22  ;;  %6693 = vadd.xlane.f32.xlu1 %v6692_v25 }
0x114c   : > { %v6690_v28 = vmul.f32 1.442695, %v6683_v26  ;;  %v6688_v30 = vmul.f32 1.442695, %v6682_v27 }
0x114e   : > { %14494 = vpow2.f32 %v6690_v28 }
0x114f   : > { %14496 = vpow2.f32 %v6688_v30 }
0x1151   : > { %v6673_v31 = vpop.xlane.xlu1 %6672 }
0x1152   : > { %v6681_v32 = vsub.f32 %v6665_v16, %v6673_v31 }
0x1154   : > { %v14495_v33 = vpop.eup %14494  ;;  %v6686_v35 = vmul.f32 1.442695, %v6681_v32 }
0x1155   : > { %v14497_v36 = vpop.eup %14496  ;;  %v6701_v38 = vsel %vm1855_vm2, %v14495_v33, 0.0 }
0x1156   : > { %14498 = vpow2.f32 %v6686_v35  ;;  %v6698_v39 = vsel %vm1855_vm2, %v14497_v36, 0.0  ;;  %6702 = vadd.xlane.f32.xlu0 %v6701_v38  ;;  %v14221_v35 = vld [vmem:[%s17427_s11 + $0x178] sm:$0xff]  ;;  %v14212_v38 = vld [vmem:[%s17427_s11 + $0x130] sm:$0xff] }
0x1157   : > { %6699 = vadd.xlane.f32.xlu2 %v6698_v39  ;;  %v14220_v39 = vld [vmem:[%s17427_s11 + $0x170] sm:$0xff] }
0x115c   : > { %v14499_v48 = vpop.eup %14498 }
0x115d   : > { %v6695_v40 = vsel %vm1855_vm2, %v14499_v48, 0.0 }
0x115f   : > { %6696 = vadd.xlane.f32.xlu2 %v6695_v40  ;;  %v14236_v40 = vld [vmem:[%s17427_s11 + $0x1f0] sm:$0xff] }
0x11bd   : > { %v6694_v41 = vpop.xlane.xlu1 %6693 }
0x11be   : > { %14500 = vrcp.f32 %v6694_v41  ;;  %v14211_v41 = vld [vmem:[%s17427_s11 + $0x128] sm:$0xff] }
0x11c4   : > { %v14501_v42 = vpop.eup %14500 }
0x11c5   : > { %v6708_v43 = vmul.f32 %v14501_v42, %v14493_v20  ;;  %v14227_v42 = vld [vmem:[%s17427_s11 + $0x1a8] sm:$0xff] }
0x11c7   : > { %v6712_v44 = vpack.c.bf16 %v6708_v43, %v6708_v43 }
0x11c9   : > { %12345 = vmatmul.msk.bf16.vlgmr.msrb.gmra.mxu0 %vm1855_vm2, %v6712_v44  ;;  %v6703_v45 = vpop.xlane.xlu0 %6702  ;;  %v14210_v44 = vld [vmem:[%s17427_s11 + $0x120] sm:$0xff] }
0x11ca   : > { %v6700_v47 = vpop.xlane.xlu2 %6699  ;;  %14502 = vrcp.f32 %v6703_v45  ;;  %12385 = vmatpush.msk.msrb.mxu0 %vm15062_vm3, %v14557_v24  ;;  %v14218_v45 = vld [vmem:[%s17427_s11 + $0x160] sm:$0xff] }
0x11cb   : > { %14504 = vrcp.f32 %v6700_v47  ;;  %v14226_v47 = vld [vmem:[%s17427_s11 + $0x1a0] sm:$0xff] }
0x11d0   : > { %v14503_v34 = vpop.eup %14502 }
0x11d1   : > { %v14505_v49 = vpop.eup %14504  ;;  %v6711_v50 = vmul.f32 %v14503_v34, %v14495_v33  ;;  %v14213_v33 = vld [vmem:[%s17427_s11 + $0x138] sm:$0xff]  ;;  %v14234_v34 = vld [vmem:[%s17427_s11 + $0x1e0] sm:$0xff] }
0x11d2   : > { %v6710_v29 = vmul.f32 %v14505_v49, %v14497_v36  ;;  %v6697_v51 = vpop.xlane.xlu2 %6696  ;;  %v14237_v36 = vld [vmem:[%s17427_s11 + $0x1f8] sm:$0xff] }
0x11d3   : > { %v6715_v52 = vpack.c.bf16 %v6711_v50, %v6711_v50  ;;  %14506 = vrcp.f32 %v6697_v51  ;;  %v14209_v49 = vld [vmem:[%s17427_s11 + $0x118] sm:$0xff] }
0x11d4   : > { %v6714_v53 = vpack.c.bf16 %v6710_v29, %v6710_v29  ;;  %v14233_v51 = vld [vmem:[%s17427_s11 + $0x1d8] sm:$0xff] }
0x11d5   : > { %12348 = vmatmul.msk.bf16.vlgmr.msra.gmra.mxu3 %vm1855_vm2, %v6715_v52  ;;  %v14208_v52 = vld [vmem:[%s17427_s11 + $0x110] sm:$0xff] }
0x11d6   : > { %12347 = vmatmul.msk.bf16.vlgmr.msra.gmra.mxu2 %vm1855_vm2, %v6714_v53  ;;  %12391 = vmatpush.msk.msra.mxu3 %vm15062_vm3, %v14557_v24  ;;  %v14216_v53 = vld [vmem:[%s17427_s11 + $0x150] sm:$0xff] }
0x11d7   : > { %12389 = vmatpush.msk.msra.mxu2 %vm15062_vm3, %v14557_v24 }
0x11d9   : > { %v14507_v54 = vpop.eup %14506 }
0x11da   : > { %v6709_v55 = vmul.f32 %v14507_v54, %v14499_v48  ;;  %v14228_v48 = vld [vmem:[%s17427_s11 + $0x1b0] sm:$0xff] }
0x11db   : > { %v14224_v54 = vld [vmem:[%s17427_s11 + $0x190] sm:$0xff] }
0x11dc   : > { %v6713_v7 = vpack.c.bf16 %v6709_v55, %v6709_v55 }
0x11de   : > { %12346 = vmatmul.msk.bf16.vlgmr.msrb.gmra.mxu1 %vm1855_vm2, %v6713_v7  ;;  %v14207_v7 = vld [vmem:[%s17427_s11 + $0x108] sm:$0xff] }
0x11df   : > { %12387 = vmatpush.msk.msrb.mxu1 %vm15062_vm3, %v14557_v24 }
0x1246   : > { %v6735_v63 = vpop.f32.mrf.mxu0 }
0x1247   : > { %v6796_v6 = vpack.c.bf16 %v6735_v63, %v6735_v63  ;;  %v14222_v63 = vld [vmem:[%s17427_s11 + $0x180] sm:$0xff] }
0x1249   : > { %12357 = vmatmul.msk.bf16.vlgmr.msra.gmra.mxu0 %vm1770_vm0, %v6796_v6  ;;  %v14230_v6 = vld [vmem:[%s17427_s11 + $0x1c0] sm:$0xff] }
0x124a   : > { %7293 = vmatpush.bf16.msra.mxu0 %v14213_v33  ;;  %v14239_v33 = vld [vmem:[%s17428_s12 + $0x108] sm:$0xff] }
0x124e   : > { %v6737_v9 = vpop.f32.mrf.mxu0  ;;  %7294 = vmatpush.bf16.msra.mxu0 %v14212_v38  ;;  %v14238_v38 = vld [vmem:[%s17428_s12 + $0x100] sm:$0xff] }
0x1252   : > { %7295 = vmatpush.bf16.msra.mxu0 %v14211_v41 }
0x1256   : > { %7296 = vmatpush.bf16.msra.mxu0 %v14210_v44 }
0x1258   : > { %v6792_v10 = vpop.f32.mrf.mxu3 }
0x1259   : > { %v6773_v11 = vpop.f32.mrf.mxu2  ;;  %v6799_v46 = vpack.c.bf16 %v6792_v10, %v6792_v10  ;;  %12386 = vmatmul.msk.f32.vlgmr.msrb.gmra.mxu0 %vm1855_vm2, %v6708_v43  ;;  %v14235_v43 = vld [vmem:[%s17427_s11 + $0x1e8] sm:$0xff]  ;;  %v14245_v10 = vld [vmem:[%s17428_s12 + $0x138] sm:$0xff] }
0x125a   : > { %v6798_v61 = vpack.c.bf16 %v6773_v11, %v6773_v11  ;;  %7297 = vmatpush.bf16.msra.mxu0 %v14209_v49  ;;  %v14253_v11 = vld [vmem:[%s17428_s12 + $0x178] sm:$0xff] }
0x125b   : > { %v6754_v62 = vpop.f32.mrf.mxu1  ;;  %12384 = vmatmul.msk.bf16.vlgmr.msrb.gmra.mxu3 %vm1770_vm0, %v6799_v46  ;;  %v14261_v46 = vld [vmem:[%s17428_s12 + $0x1b8] sm:$0xff] }
0x125c   : > { %v6797_v59 = vpack.c.bf16 %v6754_v62, %v6754_v62  ;;  %12375 = vmatmul.msk.bf16.vlgmr.msrb.gmra.mxu2 %vm1770_vm0, %v6798_v61  ;;  %7476 = vmatpush.bf16.msrb.mxu3 %v14237_v36  ;;  %v14269_v62 = vld [vmem:[%s17428_s12 + $0x1f8] sm:$0xff]  ;;  %v14263_v36 = vld [vmem:[%s17428_s12 + $0x1c8] sm:$0xff] }
0x125e   : > { %12366 = vmatmul.msk.bf16.vlgmr.msra.gmra.mxu1 %vm1770_vm0, %v6797_v59  ;;  %7298 = vmatpush.bf16.msra.mxu0 %v14208_v52  ;;  %v14244_v59 = vld [vmem:[%s17428_s12 + $0x130] sm:$0xff]  ;;  %v14277_v52 = vld [vmem:[%s17429_s13 + $0x138] sm:$0xff] }
0x125f   : > { %7354 = vmatpush.bf16.msra.mxu1 %v14221_v35  ;;  %v14247_v35 = vld [vmem:[%s17428_s12 + $0x148] sm:$0xff] }
0x1260   : > { %v6794_v60 = vpop.f32.mrf.mxu3  ;;  %7477 = vmatpush.bf16.msrb.mxu3 %v14236_v40  ;;  %v14262_v40 = vld [vmem:[%s17428_s12 + $0x1c0] sm:$0xff] }
0x1261   : > { %v6775_v12 = vpop.f32.mrf.mxu2  ;;  %v14252_v60 = vld [vmem:[%s17428_s12 + $0x170] sm:$0xff] }
0x1262   : > { %7299 = vmatpush.bf16.msra.mxu0 %v14207_v7  ;;  %v14260_v12 = vld [vmem:[%s17428_s12 + $0x1b0] sm:$0xff] }
0x1263   : > { %v6756_v13 = vpop.f32.mrf.mxu1  ;;  %7355 = vmatpush.bf16.msra.mxu1 %v14220_v39  ;;  %v14246_v39 = vld [vmem:[%s17428_s12 + $0x140] sm:$0xff]  ;;  %v14276_v7 = vld [vmem:[%s17429_s13 + $0x130] sm:$0xff] }
0x1264   : > { %7478 = vmatpush.bf16.msrb.mxu3 %v14235_v43  ;;  %v14268_v13 = vld [vmem:[%s17428_s12 + $0x1f0] sm:$0xff] }
0x1266   : > { %7300 = vmatpush.bf16.msra.mxu0 %v14206_v3  ;;  %v14291_v3 = vld [vmem:[%s17429_s13 + $0x1a8] sm:$0xff] }
0x1267   : > { %7356 = vmatpush.bf16.msra.mxu1 %v14219_v14 }
0x1268   : > { %7479 = vmatpush.bf16.msrb.mxu3 %v14234_v34 }
0x126a   : > { %7537 = vmatpush.bf16.msrb.mxu0 %v14245_v10  ;;  %v14298_v10 = vld [vmem:[%s17429_s13 + $0x1e0] sm:$0xff] }
0x126b   : > { %12392 = vmatmul.msk.f32.vlgmr.msra.gmra.mxu3 %vm1855_vm2, %v6711_v50  ;;  %7357 = vmatpush.bf16.msra.mxu1 %v14218_v45  ;;  %v14217_v50 = vld [vmem:[%s17427_s11 + $0x158] sm:$0xff] }
0x126c   : > { %12390 = vmatmul.msk.f32.vlgmr.msra.gmra.mxu2 %vm1855_vm2, %v6710_v29  ;;  %v14225_v29 = vld [vmem:[%s17427_s11 + $0x198] sm:$0xff]  ;;  %7480 = vmatpush.bf16.msrb.mxu3 %v14233_v51 }
0x126e   : > { %12388 = vmatmul.msk.f32.vlgmr.msrb.gmra.mxu1 %vm1855_vm2, %v6709_v55  ;;  %v14232_v55 = vld [vmem:[%s17427_s11 + $0x1d0] sm:$0xff]  ;;  %7538 = vmatpush.bf16.msrb.mxu0 %v14244_v59 }
0x126f   : > { %7358 = vmatpush.bf16.msra.mxu1 %v14217_v50  ;;  %v14272_v59 = vld [vmem:[%s17429_s13 + $0x110] sm:$0xff] }
0x1270   : > { %7481 = vmatpush.bf16.msrb.mxu3 %v14232_v55  ;;  %v14301_v55 = vld [vmem:[%s17429_s13 + $0x1f8] sm:$0xff] }
0x1273   : > { %7359 = vmatpush.bf16.msra.mxu1 %v14216_v53  ;;  %v14285_v53 = vld [vmem:[%s17429_s13 + $0x178] sm:$0xff] }
0x1274   : > { %7482 = vmatpush.bf16.msrb.mxu3 %v14231_v0  ;;  %v14300_v0 = vld [vmem:[%s17429_s13 + $0x1f0] sm:$0xff] }
0x1277   : > { %7360 = vmatpush.bf16.msra.mxu1 %v14215_v57  ;;  %v14284_v57 = vld [vmem:[%s17429_s13 + $0x170] sm:$0xff] }
0x1278   : > { %7483 = vmatpush.bf16.msrb.mxu3 %v14230_v6  ;;  %v14282_v6 = vld [vmem:[%s17429_s13 + $0x160] sm:$0xff] }
0x127b   : > { %7361 = vmatpush.bf16.msra.mxu1 %v14214_v4  ;;  %v14299_v4 = vld [vmem:[%s17429_s13 + $0x1e8] sm:$0xff] }
0x127c   : > { %7720 = vmatpush.bf16.msra.mxu3 %v14269_v62  ;;  %v14297_v62 = vld [vmem:[%s17429_s13 + $0x1d8] sm:$0xff] }
0x127f   : > { %7598 = vmatpush.bf16.msrb.mxu1 %v14253_v11  ;;  %v14273_v11 = vld [vmem:[%s17429_s13 + $0x118] sm:$0xff] }
0x1280   : > { %7721 = vmatpush.bf16.msra.mxu3 %v14268_v13  ;;  %v14296_v13 = vld [vmem:[%s17429_s13 + $0x1d0] sm:$0xff] }
0x1283   : > { %7599 = vmatpush.bf16.msrb.mxu1 %v14252_v60  ;;  %v14280_v60 = vld [vmem:[%s17429_s13 + $0x150] sm:$0xff] }
0x12c6   : > { %v6824_v15 = vpop.f32.mrf.mxu0 }
0x12ce   : > { %v6826_v16 = vpop.f32.mrf.mxu0 }
0x12cf   : > { %v14251_v16 = vld [vmem:[%s17428_s12 + $0x168] sm:$0xff] }
0x12d0   : > { %7600 = vmatpush.bf16.msrb.mxu1 %v14251_v16  ;;  %v14279_v16 = vld [vmem:[%s17429_s13 + $0x148] sm:$0xff] }
0x12d6   : > { %v6956_v17 = vpop.f32.mrf.mxu0 }
0x12d7   : > { %7028 = vst [vmem:[%s16600_s0] sm:$0xff] %v6956_v17  ;;  %v14259_v17 = vld [vmem:[%s17428_s12 + $0x1a8] sm:$0xff] }
0x12db   : > { %v6852_v18 = vpop.f32.mrf.mxu1 }
0x12dc   : > { %v6912_v19 = vadd.f32 %v6852_v18, %v6824_v15  ;;  %v14243_v15 = vld [vmem:[%s17428_s12 + $0x128] sm:$0xff] }
0x12dd   : > { %v14267_v18 = vld [vmem:[%s17428_s12 + $0x1e8] sm:$0xff]  ;;  %7539 = vmatpush.bf16.msrb.mxu0 %v14243_v15 }
0x12de   : > { %v6908_v8 = vpop.f32.mrf.mxu3  ;;  %7722 = vmatpush.bf16.msra.mxu3 %v14267_v18  ;;  %v14271_v15 = vld [vmem:[%s17429_s13 + $0x108] sm:$0xff] }
0x12df   : > { %v6880_v20 = vpop.f32.mrf.mxu2  ;;  %v14295_v18 = vld [vmem:[%s17429_s13 + $0x1c8] sm:$0xff] }
0x12e0   : > { %v6913_v21 = vadd.f32 %v6912_v19, %v6880_v20  ;;  %v14242_v19 = vld [vmem:[%s17428_s12 + $0x120] sm:$0xff] }
0x12e1   : > { %v14258_v20 = vld [vmem:[%s17428_s12 + $0x1a0] sm:$0xff]  ;;  %7540 = vmatpush.bf16.msrb.mxu0 %v14242_v19 }
0x12e2   : > { %v6914_v22 = vadd.f32 %v6913_v21, %v6908_v8  ;;  %v14250_v8 = vld [vmem:[%s17428_s12 + $0x160] sm:$0xff] }
0x12e3   : > { %v6854_v25 = vpop.f32.mrf.mxu1  ;;  %v14266_v21 = vld [vmem:[%s17428_s12 + $0x1e0] sm:$0xff]  ;;  %7601 = vmatpush.bf16.msrb.mxu1 %v14250_v8 }
0x12e4   : > { %v16604_v26 = vadd.f32 %v6914_v22, %v16410_v37  ;;  %v14229_v37 = vld [vmem:[%s17427_s11 + $0x1b8] sm:$0xff]  ;;  %7723 = vmatpush.bf16.msra.mxu3 %v14266_v21  ;;  %v14270_v19 = vld [vmem:[%s17429_s13 + $0x100] sm:$0xff] }
0x12e5   : > { %7415 = vmatpush.bf16.msrb.mxu2 %v14229_v37  ;;  %v14241_v22 = vld [vmem:[%s17428_s12 + $0x118] sm:$0xff]  ;;  %v14255_v37 = vld [vmem:[%s17428_s12 + $0x188] sm:$0xff]  ;;  %v14278_v8 = vld [vmem:[%s17429_s13 + $0x140] sm:$0xff] }
0x12e6   : > { %6916 = vadd.xlane.f32.xlu0 %v16604_v26  ;;  %v6910_v27 = vpop.f32.mrf.mxu3  ;;  %v14249_v25 = vld [vmem:[%s17428_s12 + $0x158] sm:$0xff]  ;;  %7541 = vmatpush.bf16.msrb.mxu0 %v14241_v22  ;;  %v14294_v21 = vld [vmem:[%s17429_s13 + $0x1c0] sm:$0xff] }
0x12e7   : > { %v6882_v28 = vpop.f32.mrf.mxu2  ;;  %v14265_v27 = vld [vmem:[%s17428_s12 + $0x1d8] sm:$0xff]  ;;  %7602 = vmatpush.bf16.msrb.mxu1 %v14249_v25 }
0x12e8   : > { %7724 = vmatpush.bf16.msra.mxu3 %v14265_v27  ;;  %v14240_v28 = vld [vmem:[%s17428_s12 + $0x110] sm:$0xff] }
0x12e9   : > { %7416 = vmatpush.bf16.msrb.mxu2 %v14228_v48  ;;  %v14254_v48 = vld [vmem:[%s17428_s12 + $0x180] sm:$0xff] }
0x12ea   : > { %7542 = vmatpush.bf16.msrb.mxu0 %v14240_v28 }
0x12eb   : > { %v6979_v30 = vpop.f32.mrf.mxu1 }
0x12ec   : > { %7029 = vst [vmem:[%s16600_s0 + $0x8] sm:$0xff] %v6979_v30  ;;  %v14248_v30 = vld [vmem:[%s17428_s12 + $0x150] sm:$0xff] }
0x12ed   : > { %7417 = vmatpush.bf16.msrb.mxu2 %v14227_v42  ;;  %7603 = vmatpush.bf16.msrb.mxu1 %v14248_v30 }
0x12ee   : > { %v7025_v31 = vpop.f32.mrf.mxu3  ;;  %7543 = vmatpush.bf16.msrb.mxu0 %v14239_v33 }
0x12ef   : > { %v7002_v32 = vpop.f32.mrf.mxu2  ;;  %7031 = vst [vmem:[%s16600_s0 + $0x18] sm:$0xff] %v7025_v31  ;;  %v14256_v31 = vld [vmem:[%s17428_s12 + $0x190] sm:$0xff] }
0x12f0   : > { %7030 = vst [vmem:[%s16600_s0 + $0x10] sm:$0xff] %v7002_v32  ;;  %v14264_v32 = vld [vmem:[%s17428_s12 + $0x1d0] sm:$0xff] }
0x12f1   : > { %7418 = vmatpush.bf16.msrb.mxu2 %v14226_v47  ;;  %7725 = vmatpush.bf16.msra.mxu3 %v14264_v32 }
0x12f2   : > { %7604 = vmatpush.bf16.msrb.mxu1 %v14247_v35  ;;  %7544 = vmatpush.bf16.msrb.mxu0 %v14238_v38 }
0x12f5   : > { %7419 = vmatpush.bf16.msrb.mxu2 %v14225_v29  ;;  %7726 = vmatpush.bf16.msra.mxu3 %v14263_v36 }
0x12f6   : > { %7605 = vmatpush.bf16.msrb.mxu1 %v14246_v39 }
0x12f9   : > { %7420 = vmatpush.bf16.msrb.mxu2 %v14224_v54  ;;  %7727 = vmatpush.bf16.msra.mxu3 %v14262_v40  ;;  %v14293_v54 = vld [vmem:[%s17429_s13 + $0x1b8] sm:$0xff] }
0x12fd   : > { %7421 = vmatpush.bf16.msrb.mxu2 %v14223_v58  ;;  %v14292_v58 = vld [vmem:[%s17429_s13 + $0x1b0] sm:$0xff] }
0x1301   : > { %7422 = vmatpush.bf16.msrb.mxu2 %v14222_v63  ;;  %v14274_v63 = vld [vmem:[%s17429_s13 + $0x120] sm:$0xff] }
0x1305   : > { %7659 = vmatpush.bf16.msra.mxu2 %v14261_v46  ;;  %v14281_v46 = vld [vmem:[%s17429_s13 + $0x158] sm:$0xff] }
0x1309   : > { %7660 = vmatpush.bf16.msra.mxu2 %v14260_v12  ;;  %v14288_v12 = vld [vmem:[%s17429_s13 + $0x190] sm:$0xff] }
0x130d   : > { %7661 = vmatpush.bf16.msra.mxu2 %v14259_v17  ;;  %v14287_v17 = vld [vmem:[%s17429_s13 + $0x188] sm:$0xff] }
0x1311   : > { %7662 = vmatpush.bf16.msra.mxu2 %v14258_v20  ;;  %v14286_v20 = vld [vmem:[%s17429_s13 + $0x180] sm:$0xff] }
0x1359   : > { %v6917_v1 = vpop.xlane.xlu0 %6916 }
0x135a   : > { %v6918_v2 = vmul.f32 %v6917_v1, %v15123_v5  ;;  %v14275_v1 = vld [vmem:[%s17429_s13 + $0x128] sm:$0xff] }
0x135c   : > { %v16708_v9 = vsub.f32 %v16604_v26, %v6918_v2  ;;  %v14257_v26 = vld [vmem:[%s17428_s12 + $0x198] sm:$0xff]  ;;  %v14283_v2 = vld [vmem:[%s17429_s13 + $0x168] sm:$0xff] }
0x135d   : > { %7663 = vmatpush.bf16.msra.mxu2 %v14257_v26 }
0x135e   : > { %v6920_v61 = vmul.f32 %v16708_v9, %v16708_v9 }
0x1360   : > { %6921 = vadd.xlane.f32.xlu1 %v6920_v61  ;;  %v14289_v61 = vld [vmem:[%s17429_s13 + $0x198] sm:$0xff] }
0x1361   : > { %7664 = vmatpush.bf16.msra.mxu2 %v14256_v31 }
0x1365   : > { %7665 = vmatpush.bf16.msra.mxu2 %v14255_v37 }
0x1369   : > { %7666 = vmatpush.bf16.msra.mxu2 %v14254_v48 }
0x13d3   : > { %v6922_v41 = vpop.xlane.xlu1 %6921 }
0x13d4   : > { %v6923_v14 = vmul.f32 %v6922_v41, %v15123_v5 }
0x13d6   : > { %v6924_v42 = vadd.f32 1e-05, %v6923_v14 }
0x13d8   : > { %14508 = vrsqrt.f32 %v6924_v42  ;;  %vm6931_vm9 = vweird.f32 %v6924_v42 }
0x13de   : > { %v14509_v43 = vpop.eup %14508 }
0x13df   : > { %v6926_v44 = vmul.f32 %v14509_v43, %v6924_v42  ;;  %vm6932_vm8 = vweird.f32 %v14509_v43 }
0x13e0   : > { %vm6933_vm10 = vmor %vm6931_vm9, %vm6932_vm8 }
0x13e1   : > { %v6927_v45 = vmul.f32 %v14509_v43, %v6926_v44 }
0x13e3   : > { %v6928_v47 = vmul.f32 0.5, %v6927_v45 }
0x13e5   : > { %v6929_v34 = vsub.f32 1.5, %v6928_v47 }
0x13e7   : > { %v6930_v49 = vmul.f32 %v14509_v43, %v6929_v34 }
0x13e9   : > { %v6934_v50 = vsel %vm6933_vm10, %v14509_v43, %v6930_v49 }
0x13ea   : > { %v16810_v29 = vmul.f32 %v6934_v50, %v16708_v9  ;;  %v14290_v9 = vld [vmem:[%s17429_s13 + $0x1a0] sm:$0xff] }
0x13ec   : > { %v16814_v51 = vpack.c.bf16 %v16810_v29, %v16810_v29 }
0x13ee   : > { %7301 = vmatmul.bf16.vlgmr.msra.gmra.mxu0 %v16814_v51  ;;  %7362 = vmatmul.bf16.vlgmr.msra.gmra.mxu1 %v16814_v51 }
0x13ef   : > { %7423 = vmatmul.bf16.vlgmr.msrb.gmra.mxu2 %v16814_v51  ;;  %7484 = vmatmul.bf16.vlgmr.msrb.gmra.mxu3 %v16814_v51 }
0x13f0   : > { %7781 = vmatpush.bf16.msra.mxu0 %v14277_v52  ;;  %7842 = vmatpush.bf16.msra.mxu1 %v14285_v53 }
0x13f1   : > { %7903 = vmatpush.bf16.msrb.mxu2 %v14293_v54  ;;  %7964 = vmatpush.bf16.msrb.mxu3 %v14301_v55 }
0x13f4   : > { %7782 = vmatpush.bf16.msra.mxu0 %v14276_v7  ;;  %7843 = vmatpush.bf16.msra.mxu1 %v14284_v57 }
0x13f5   : > { %7904 = vmatpush.bf16.msrb.mxu2 %v14292_v58  ;;  %7965 = vmatpush.bf16.msrb.mxu3 %v14300_v0 }
0x13f8   : > { %7783 = vmatpush.bf16.msra.mxu0 %v14275_v1  ;;  %7844 = vmatpush.bf16.msra.mxu1 %v14283_v2 }
0x13f9   : > { %7905 = vmatpush.bf16.msrb.mxu2 %v14291_v3  ;;  %7966 = vmatpush.bf16.msrb.mxu3 %v14299_v4 }
0x13fc   : > { %7784 = vmatpush.bf16.msra.mxu0 %v14274_v63  ;;  %7845 = vmatpush.bf16.msra.mxu1 %v14282_v6 }
0x13fd   : > { %7906 = vmatpush.bf16.msrb.mxu2 %v14290_v9  ;;  %7967 = vmatpush.bf16.msrb.mxu3 %v14298_v10 }
0x13fe   : > { %7545 = vmatmul.bf16.vlgmr.msrb.gmra.mxu0 %v16814_v51  ;;  %7606 = vmatmul.bf16.vlgmr.msrb.gmra.mxu1 %v16814_v51 }
0x13ff   : > { %7667 = vmatmul.bf16.vlgmr.msra.gmra.mxu2 %v16814_v51  ;;  %7728 = vmatmul.bf16.vlgmr.msra.gmra.mxu3 %v16814_v51 }
0x1400   : > { %7785 = vmatpush.bf16.msra.mxu0 %v14273_v11  ;;  %7846 = vmatpush.bf16.msra.mxu1 %v14281_v46 }
0x1401   : > { %7907 = vmatpush.bf16.msrb.mxu2 %v14289_v61  ;;  %7968 = vmatpush.bf16.msrb.mxu3 %v14297_v62 }
0x1404   : > { %7786 = vmatpush.bf16.msra.mxu0 %v14272_v59  ;;  %7847 = vmatpush.bf16.msra.mxu1 %v14280_v60  ;;  %v14547_v59 = vld [vmem:[%s16121_s29] sm:$0xff] }
0x1405   : > { %7908 = vmatpush.bf16.msrb.mxu2 %v14288_v12  ;;  %7969 = vmatpush.bf16.msrb.mxu3 %v14296_v13 }
0x1408   : > { %7787 = vmatpush.bf16.msra.mxu0 %v14271_v15  ;;  %7848 = vmatpush.bf16.msra.mxu1 %v14279_v16 }
0x1409   : > { %7909 = vmatpush.bf16.msrb.mxu2 %v14287_v17  ;;  %7970 = vmatpush.bf16.msrb.mxu3 %v14295_v18 }
0x140c   : > { %7788 = vmatpush.bf16.msra.mxu0 %v14270_v19  ;;  %7849 = vmatpush.bf16.msra.mxu1 %v14278_v8 }
0x140d   : > { %7910 = vmatpush.bf16.msrb.mxu2 %v14286_v20  ;;  %7971 = vmatpush.bf16.msrb.mxu3 %v14294_v21 }
0x140f   : > { %7789 = vmatmul.bf16.vlgmr.msra.gmra.mxu0 %v16814_v51  ;;  %7850 = vmatmul.bf16.vlgmr.msra.gmra.mxu1 %v16814_v51 }
0x1410   : > { %7911 = vmatmul.bf16.vlgmr.msrb.gmra.mxu2 %v16814_v51  ;;  %7972 = vmatmul.bf16.vlgmr.msrb.gmra.mxu3 %v16814_v51 }
0x146b   : > { %v7302_v22 = vpop.f32.mrf.mxu0  ;;  %v7363_v25 = vpop.f32.mrf.mxu1 }
0x146c   : > { %v7977_v44 = vpack.c.bf16 %v7302_v22, %v7302_v22  ;;  %v7978_v45 = vpack.c.bf16 %v7363_v25, %v7363_v25 }
0x1472   : > { %v7424_v26 = vpop.f32.mrf.mxu2  ;;  %v7485_v27 = vpop.f32.mrf.mxu3 }
0x1473   : > { %v7304_v28 = vpop.f32.mrf.mxu0  ;;  %v7365_v30 = vpop.f32.mrf.mxu1  ;;  %v7979_v51 = vpack.c.bf16 %v7424_v26, %v7424_v26  ;;  %v7980_v52 = vpack.c.bf16 %v7485_v27, %v7485_v27 }
0x147a   : > { %v7426_v31 = vpop.f32.mrf.mxu2  ;;  %v7487_v32 = vpop.f32.mrf.mxu3 }
0x147b   : > { %v7546_v33 = vpop.f32.mrf.mxu0  ;;  %v7607_v35 = vpop.f32.mrf.mxu1 }
0x147c   : > { %v7981_v37 = vpack.c.bf16 %v7546_v33, %v7546_v33  ;;  %v7982_v36 = vpack.c.bf16 %v7607_v35, %v7607_v35 }
0x147e   : > { %v7989_v38 = vsel %vm1770_vm0, %v7981_v37, 0  ;;  %v8008_v39 = vsel %vm1770_vm0, %v7982_v36, 0 }
0x147f   : > { %7998 = vmatpush.bf16.xpose.msrb.mxu0 %v7989_v38  ;;  %8017 = vmatpush.bf16.xpose.msrb.mxu1 %v8008_v39 }
0x1482   : > { %v7668_v48 = vpop.f32.mrf.mxu2  ;;  %v7729_v40 = vpop.f32.mrf.mxu3 }
0x1483   : > { %v7983_v41 = vpack.c.bf16 %v7668_v48, %v7668_v48  ;;  %v7984_v14 = vpack.c.bf16 %v7729_v40, %v7729_v40  ;;  %v7548_v42 = vpop.f32.mrf.mxu0  ;;  %v7609_v43 = vpop.f32.mrf.mxu1 }
0x1485   : > { %v8027_v47 = vsel %vm1770_vm0, %v7983_v41, 0  ;;  %v8046_v34 = vsel %vm1770_vm0, %v7984_v14, 0 }
0x1486   : > { %8036 = vmatpush.bf16.xpose.msra.mxu2 %v8027_v47  ;;  %8055 = vmatpush.bf16.xpose.msra.mxu3 %v8046_v34 }
0x1487   : > { %12985 = vmatmul.msk.bf16.vlgmr.msrb.gmra.mxu0 %vm1770_vm0, %v7977_v44  ;;  %12986 = vmatmul.msk.bf16.vlgmr.msrb.gmra.mxu1 %vm1770_vm0, %v7978_v45 }
0x148a   : > { %v7670_v49 = vpop.f32.mrf.mxu2  ;;  %v7731_v50 = vpop.f32.mrf.mxu3 }
0x148c   : > { %v7790_v53 = vpop.f32.mrf.mxu0  ;;  %v7851_v54 = vpop.f32.mrf.mxu1 }
0x148d   : > { %v8117_v55 = vpack.c.bf16 %v7790_v53, %v7790_v53  ;;  %v8118_v7 = vpack.c.bf16 %v7851_v54, %v7851_v54  ;;  %12987 = vmatmul.msk.bf16.vlgmr.msra.gmra.mxu2 %vm1770_vm0, %v7979_v51  ;;  %12988 = vmatmul.msk.bf16.vlgmr.msra.gmra.mxu3 %vm1770_vm0, %v7980_v52  ;;  %v14303_v52 = vld [vmem:[%s17430_s14 + $0x48] sm:$0xff] }
0x148f   : > { %v8125_v57 = vsel %vm1911_vm1, %v8117_v55, 0  ;;  %v8144_v58 = vsel %vm1911_vm1, %v8118_v7, 0 }
0x1490   : > { %8134 = vmatpush.bf16.msra.mxu0 %v8125_v57  ;;  %8153 = vmatpush.bf16.msra.mxu1 %v8144_v58 }
0x1493   : > { %v7912_v0 = vpop.f32.mrf.mxu2  ;;  %v7973_v1 = vpop.f32.mrf.mxu3 }
0x1494   : > { %v8119_v2 = vpack.c.bf16 %v7912_v0, %v7912_v0  ;;  %v8120_v3 = vpack.c.bf16 %v7973_v1, %v7973_v1  ;;  %v7792_v4 = vpop.f32.mrf.mxu0  ;;  %v7853_v63 = vpop.f32.mrf.mxu1  ;;  %8222 = vmatpush.bf16.msrb.mxu0 %v14303_v52  ;;  %v14323_v52 = vld [vmem:[%s17431_s15 + $0x168] sm:$0xff] }
0x1496   : > { %v8163_v6 = vsel %vm1911_vm1, %v8119_v2, 0  ;;  %v8182_v9 = vsel %vm1911_vm1, %v8120_v3, 0 }
0x1497   : > { %8172 = vmatpush.bf16.msrb.mxu2 %v8163_v6  ;;  %8191 = vmatpush.bf16.msrb.mxu3 %v8182_v9 }
0x149b   : > { %v7914_v10 = vpop.f32.mrf.mxu2  ;;  %v7975_v11 = vpop.f32.mrf.mxu3 }
0x149c   : > { %v14302_v11 = vld [vmem:[%s17430_s14 + $0x40] sm:$0xff] }
0x149d   : > { %8223 = vmatpush.bf16.msrb.mxu0 %v14302_v11  ;;  %v14319_v11 = vld [vmem:[%s17431_s15 + $0x148] sm:$0xff] }
0x1504   : > { %v8000_v46 = vpop.f32.mrf.mxu0  ;;  %v8019_v61 = vpop.f32.mrf.mxu1 }
0x1505   : > { %v8061_v62 = vmul.f32 0.17677669, %v8000_v46  ;;  %v8062_v21 = vmul.f32 0.17677669, %v8019_v61  ;;  %v14307_v46 = vld [vmem:[%s17430_s14 + $0x68] sm:$0xff]  ;;  %v14309_v61 = vld [vmem:[%s17430_s14 + $0x78] sm:$0xff] }
0x1506   : > { %8278 = vmatpush.bf16.msra.mxu2 %v14307_v46  ;;  %8306 = vmatpush.bf16.msra.mxu3 %v14309_v61  ;;  %v14327_v46 = vld [vmem:[%s17431_s15 + $0x188] sm:$0xff] }
0x1507   : > { %v8065_v60 = vadd.f32 %v14547_v59, %v8061_v62  ;;  %v8066_v28 = vadd.f32 %v14547_v59, %v8062_v21  ;;  %v14305_v62 = vld [vmem:[%s17430_s14 + $0x58] sm:$0xff]  ;;  %v14335_v61 = vld [vmem:[%s17431_s15 + $0x1c8] sm:$0xff] }
0x1508   : > { %8250 = vmatpush.bf16.msrb.mxu1 %v14305_v62 }
0x1509   : > { %v8069_v12 = vsel %vm1855_vm2, %v8065_v60, -inf  ;;  %v8072_v30 = vsel %vm1855_vm2, %v8066_v28, -inf }
0x150a   : > { %8070 = vmax.xlane.f32.xlu1 %v8069_v12  ;;  %v14304_v12 = vld [vmem:[%s17430_s14 + $0x50] sm:$0xff] }
0x150c   : > { %v8002_v13 = vpop.f32.mrf.mxu0  ;;  %v8021_v15 = vpop.f32.mrf.mxu1  ;;  %8251 = vmatpush.bf16.msrb.mxu1 %v14304_v12  ;;  %v14318_v12 = vld [vmem:[%s17431_s15 + $0x140] sm:$0xff] }
0x1510   : > { %v8038_v16 = vpop.f32.mrf.mxu2  ;;  %v8057_v17 = vpop.f32.mrf.mxu3 }
0x1511   : > { %v8063_v18 = vmul.f32 0.17677669, %v8038_v16  ;;  %v8064_v19 = vmul.f32 0.17677669, %v8057_v17 }
0x1513   : > { %v8068_v8 = vadd.f32 %v14547_v59, %v8064_v19  ;;  %v8067_v20 = vadd.f32 %v14547_v59, %v8063_v18  ;;  %v14306_v59 = vld [vmem:[%s17430_s14 + $0x60] sm:$0xff] }
0x1514   : > { %8279 = vmatpush.bf16.msra.mxu2 %v14306_v59 }
0x1515   : > { %v8078_v22 = vsel %vm1855_vm2, %v8068_v8, -inf  ;;  %v8075_v25 = vsel %vm1855_vm2, %v8067_v20, -inf }
0x1516   : > { %8079 = vmax.xlane.f32.xlu0 %v8078_v22  ;;  %8076 = vmax.xlane.f32.xlu2 %v8075_v25 }
0x1518   : > { %v8040_v26 = vpop.f32.mrf.mxu2  ;;  %v8059_v27 = vpop.f32.mrf.mxu3 }
0x151e   : > { %8073 = vmax.xlane.f32.xlu2 %v8072_v30 }
0x157d   : > { %v8071_v31 = vpop.xlane.xlu1 %8070 }
0x157e   : > { %v8081_v32 = vsub.f32 %v8065_v60, %v8071_v31  ;;  %v14308_v60 = vld [vmem:[%s17430_s14 + $0x70] sm:$0xff] }
0x157f   : > { %8307 = vmatpush.bf16.msra.mxu3 %v14308_v60  ;;  %v14310_v60 = vld [vmem:[%s17431_s15 + $0x100] sm:$0xff] }
0x1580   : > { %v8085_v33 = vmul.f32 1.442695, %v8081_v32 }
0x1582   : > { %14510 = vpow2.f32 %v8085_v33 }
0x1588   : > { %v14511_v35 = vpop.eup %14510 }
0x1589   : > { %v8080_v37 = vpop.xlane.xlu0 %8079  ;;  %v8077_v36 = vpop.xlane.xlu2 %8076  ;;  %v8093_v38 = vsel %vm1855_vm2, %v14511_v35, 0.0 }
0x158a   : > { %v8084_v39 = vsub.f32 %v8068_v8, %v8080_v37  ;;  %v8083_v48 = vsub.f32 %v8067_v20, %v8077_v36  ;;  %8094 = vadd.xlane.f32.xlu2 %v8093_v38 }
0x158c   : > { %v8091_v40 = vmul.f32 1.442695, %v8084_v39  ;;  %v8089_v41 = vmul.f32 1.442695, %v8083_v48 }
0x158e   : > { %14512 = vpow2.f32 %v8091_v40 }
0x158f   : > { %14514 = vpow2.f32 %v8089_v41 }
0x1591   : > { %v8074_v14 = vpop.xlane.xlu2 %8073 }
0x1592   : > { %v8082_v42 = vsub.f32 %v8066_v28, %v8074_v14 }
0x1594   : > { %v14513_v43 = vpop.eup %14512  ;;  %v8087_v44 = vmul.f32 1.442695, %v8082_v42 }
0x1595   : > { %v14515_v45 = vpop.eup %14514  ;;  %v8102_v47 = vsel %vm1855_vm2, %v14513_v43, 0.0 }
0x1596   : > { %14516 = vpow2.f32 %v8087_v44  ;;  %v8099_v34 = vsel %vm1855_vm2, %v14515_v45, 0.0  ;;  %8103 = vadd.xlane.f32.xlu1 %v8102_v47  ;;  %v14325_v44 = vld [vmem:[%s17431_s15 + $0x178] sm:$0xff]  ;;  %v14316_v47 = vld [vmem:[%s17431_s15 + $0x130] sm:$0xff] }
0x1597   : > { %8100 = vadd.xlane.f32.xlu0 %v8099_v34  ;;  %v14324_v34 = vld [vmem:[%s17431_s15 + $0x170] sm:$0xff] }
0x159c   : > { %v14517_v49 = vpop.eup %14516 }
0x159d   : > { %v8096_v50 = vsel %vm1855_vm2, %v14517_v49, 0.0 }
0x159f   : > { %8097 = vadd.xlane.f32.xlu0 %v8096_v50  ;;  %v14340_v50 = vld [vmem:[%s17431_s15 + $0x1f0] sm:$0xff] }
0x15fd   : > { %v8095_v51 = vpop.xlane.xlu2 %8094 }
0x15fe   : > { %14518 = vrcp.f32 %v8095_v51  ;;  %v14315_v51 = vld [vmem:[%s17431_s15 + $0x128] sm:$0xff] }
0x1604   : > { %v14519_v53 = vpop.eup %14518 }
0x1605   : > { %v8109_v54 = vmul.f32 %v14519_v53, %v14511_v35  ;;  %v14331_v53 = vld [vmem:[%s17431_s15 + $0x1a8] sm:$0xff] }
0x1607   : > { %v8113_v55 = vpack.c.bf16 %v8109_v54, %v8109_v54 }
0x1609   : > { %12989 = vmatmul.msk.bf16.vlgmr.msra.gmra.mxu0 %vm1855_vm2, %v8113_v55  ;;  %v8104_v7 = vpop.xlane.xlu1 %8103  ;;  %v14314_v55 = vld [vmem:[%s17431_s15 + $0x120] sm:$0xff] }
0x160a   : > { %v8101_v57 = vpop.xlane.xlu0 %8100  ;;  %14520 = vrcp.f32 %v8104_v7  ;;  %13029 = vmatpush.msk.msra.mxu0 %vm15062_vm3, %v14557_v24  ;;  %v14322_v7 = vld [vmem:[%s17431_s15 + $0x160] sm:$0xff] }
0x160b   : > { %14522 = vrcp.f32 %v8101_v57  ;;  %v14330_v57 = vld [vmem:[%s17431_s15 + $0x1a0] sm:$0xff] }
0x1610   : > { %v14521_v58 = vpop.eup %14520 }
0x1611   : > { %v14523_v0 = vpop.eup %14522  ;;  %v8112_v1 = vmul.f32 %v14521_v58, %v14513_v43  ;;  %v14317_v43 = vld [vmem:[%s17431_s15 + $0x138] sm:$0xff]  ;;  %v14338_v58 = vld [vmem:[%s17431_s15 + $0x1e0] sm:$0xff] }
0x1612   : > { %v8111_v2 = vmul.f32 %v14523_v0, %v14515_v45  ;;  %v8098_v3 = vpop.xlane.xlu0 %8097  ;;  %v14341_v45 = vld [vmem:[%s17431_s15 + $0x1f8] sm:$0xff] }
0x1613   : > { %v8116_v4 = vpack.c.bf16 %v8112_v1, %v8112_v1  ;;  %14524 = vrcp.f32 %v8098_v3  ;;  %v14313_v0 = vld [vmem:[%s17431_s15 + $0x118] sm:$0xff] }
0x1614   : > { %v8115_v63 = vpack.c.bf16 %v8111_v2, %v8111_v2  ;;  %v14337_v3 = vld [vmem:[%s17431_s15 + $0x1d8] sm:$0xff] }
0x1615   : > { %12992 = vmatmul.msk.bf16.vlgmr.msrb.gmra.mxu3 %vm1855_vm2, %v8116_v4  ;;  %v14312_v4 = vld [vmem:[%s17431_s15 + $0x110] sm:$0xff] }
0x1616   : > { %12991 = vmatmul.msk.bf16.vlgmr.msrb.gmra.mxu2 %vm1855_vm2, %v8115_v63  ;;  %13035 = vmatpush.msk.msrb.mxu3 %vm15062_vm3, %v14557_v24  ;;  %v14320_v63 = vld [vmem:[%s17431_s15 + $0x150] sm:$0xff] }
0x1617   : > { %13033 = vmatpush.msk.msrb.mxu2 %vm15062_vm3, %v14557_v24 }
0x1619   : > { %v14525_v6 = vpop.eup %14524 }
0x161a   : > { %v8110_v9 = vmul.f32 %v14525_v6, %v14517_v49  ;;  %v14332_v49 = vld [vmem:[%s17431_s15 + $0x1b0] sm:$0xff] }
0x161b   : > { %v14328_v6 = vld [vmem:[%s17431_s15 + $0x190] sm:$0xff] }
0x161c   : > { %v8114_v10 = vpack.c.bf16 %v8110_v9, %v8110_v9 }
0x161e   : > { %12990 = vmatmul.msk.bf16.vlgmr.msra.gmra.mxu1 %vm1855_vm2, %v8114_v10  ;;  %v14311_v10 = vld [vmem:[%s17431_s15 + $0x108] sm:$0xff] }
0x161f   : > { %13031 = vmatpush.msk.msra.mxu1 %vm15062_vm3, %v14557_v24 }
0x1686   : > { %v8136_v13 = vpop.f32.mrf.mxu0 }
0x1687   : > { %v8197_v15 = vpack.c.bf16 %v8136_v13, %v8136_v13  ;;  %v14326_v13 = vld [vmem:[%s17431_s15 + $0x180] sm:$0xff] }
0x1689   : > { %13001 = vmatmul.msk.bf16.vlgmr.msrb.gmra.mxu0 %vm1770_vm0, %v8197_v15  ;;  %v14334_v15 = vld [vmem:[%s17431_s15 + $0x1c0] sm:$0xff] }
0x168a   : > { %8695 = vmatpush.bf16.msrb.mxu0 %v14317_v43  ;;  %v14343_v43 = vld [vmem:[%s17432_s16 + $0x108] sm:$0xff] }
0x168e   : > { %v8138_v16 = vpop.f32.mrf.mxu0  ;;  %8696 = vmatpush.bf16.msrb.mxu0 %v14316_v47  ;;  %v14342_v47 = vld [vmem:[%s17432_s16 + $0x100] sm:$0xff] }
0x1692   : > { %8697 = vmatpush.bf16.msrb.mxu0 %v14315_v51 }
0x1696   : > { %8698 = vmatpush.bf16.msrb.mxu0 %v14314_v55 }
0x1698   : > { %v8193_v17 = vpop.f32.mrf.mxu3 }
0x1699   : > { %v8174_v18 = vpop.f32.mrf.mxu2  ;;  %v8200_v19 = vpack.c.bf16 %v8193_v17, %v8193_v17  ;;  %13030 = vmatmul.msk.f32.vlgmr.msra.gmra.mxu0 %vm1855_vm2, %v8109_v54  ;;  %v14339_v54 = vld [vmem:[%s17431_s15 + $0x1e8] sm:$0xff]  ;;  %v14349_v17 = vld [vmem:[%s17432_s16 + $0x138] sm:$0xff] }
0x169a   : > { %v8199_v8 = vpack.c.bf16 %v8174_v18, %v8174_v18  ;;  %8699 = vmatpush.bf16.msrb.mxu0 %v14313_v0  ;;  %v14357_v18 = vld [vmem:[%s17432_s16 + $0x178] sm:$0xff] }
0x169b   : > { %v8155_v20 = vpop.f32.mrf.mxu1  ;;  %13028 = vmatmul.msk.bf16.vlgmr.msra.gmra.mxu3 %vm1770_vm0, %v8200_v19  ;;  %v14365_v19 = vld [vmem:[%s17432_s16 + $0x1b8] sm:$0xff] }
0x169c   : > { %v8198_v21 = vpack.c.bf16 %v8155_v20, %v8155_v20  ;;  %13019 = vmatmul.msk.bf16.vlgmr.msra.gmra.mxu2 %vm1770_vm0, %v8199_v8  ;;  %8878 = vmatpush.bf16.msra.mxu3 %v14341_v45  ;;  %v14373_v20 = vld [vmem:[%s17432_s16 + $0x1f8] sm:$0xff]  ;;  %v14367_v45 = vld [vmem:[%s17432_s16 + $0x1c8] sm:$0xff] }
0x169e   : > { %13010 = vmatmul.msk.bf16.vlgmr.msrb.gmra.mxu1 %vm1770_vm0, %v8198_v21  ;;  %8700 = vmatpush.bf16.msrb.mxu0 %v14312_v4  ;;  %v14348_v21 = vld [vmem:[%s17432_s16 + $0x130] sm:$0xff]  ;;  %v14381_v4 = vld [vmem:[%s17433_s17 + $0x138] sm:$0xff] }
0x169f   : > { %8756 = vmatpush.bf16.msrb.mxu1 %v14325_v44  ;;  %v14351_v44 = vld [vmem:[%s17432_s16 + $0x148] sm:$0xff] }
0x16a0   : > { %v8195_v22 = vpop.f32.mrf.mxu3  ;;  %8879 = vmatpush.bf16.msra.mxu3 %v14340_v50  ;;  %v14366_v50 = vld [vmem:[%s17432_s16 + $0x1c0] sm:$0xff] }
0x16a1   : > { %v8176_v25 = vpop.f32.mrf.mxu2  ;;  %v14356_v22 = vld [vmem:[%s17432_s16 + $0x170] sm:$0xff] }
0x16a2   : > { %8701 = vmatpush.bf16.msrb.mxu0 %v14311_v10  ;;  %v14364_v25 = vld [vmem:[%s17432_s16 + $0x1b0] sm:$0xff] }
0x16a3   : > { %v8157_v26 = vpop.f32.mrf.mxu1  ;;  %8757 = vmatpush.bf16.msrb.mxu1 %v14324_v34  ;;  %v14350_v34 = vld [vmem:[%s17432_s16 + $0x140] sm:$0xff]  ;;  %v14380_v10 = vld [vmem:[%s17433_s17 + $0x130] sm:$0xff] }
0x16a4   : > { %8880 = vmatpush.bf16.msra.mxu3 %v14339_v54  ;;  %v14372_v26 = vld [vmem:[%s17432_s16 + $0x1f0] sm:$0xff] }
0x16a6   : > { %8702 = vmatpush.bf16.msrb.mxu0 %v14310_v60  ;;  %v14395_v60 = vld [vmem:[%s17433_s17 + $0x1a8] sm:$0xff] }
0x16a7   : > { %8758 = vmatpush.bf16.msrb.mxu1 %v14323_v52 }
0x16a8   : > { %8881 = vmatpush.bf16.msra.mxu3 %v14338_v58 }
0x16aa   : > { %8939 = vmatpush.bf16.msra.mxu0 %v14349_v17  ;;  %v14402_v17 = vld [vmem:[%s17433_s17 + $0x1e0] sm:$0xff] }
0x16ab   : > { %13036 = vmatmul.msk.f32.vlgmr.msrb.gmra.mxu3 %vm1855_vm2, %v8112_v1  ;;  %8759 = vmatpush.bf16.msrb.mxu1 %v14322_v7  ;;  %v14321_v1 = vld [vmem:[%s17431_s15 + $0x158] sm:$0xff] }
0x16ac   : > { %13034 = vmatmul.msk.f32.vlgmr.msrb.gmra.mxu2 %vm1855_vm2, %v8111_v2  ;;  %v14329_v2 = vld [vmem:[%s17431_s15 + $0x198] sm:$0xff]  ;;  %8882 = vmatpush.bf16.msra.mxu3 %v14337_v3 }
0x16ae   : > { %13032 = vmatmul.msk.f32.vlgmr.msra.gmra.mxu1 %vm1855_vm2, %v8110_v9  ;;  %v14336_v9 = vld [vmem:[%s17431_s15 + $0x1d0] sm:$0xff]  ;;  %8940 = vmatpush.bf16.msra.mxu0 %v14348_v21 }
0x16af   : > { %8760 = vmatpush.bf16.msrb.mxu1 %v14321_v1  ;;  %v14376_v21 = vld [vmem:[%s17433_s17 + $0x110] sm:$0xff] }
0x16b0   : > { %8883 = vmatpush.bf16.msra.mxu3 %v14336_v9  ;;  %v14405_v9 = vld [vmem:[%s17433_s17 + $0x1f8] sm:$0xff] }
0x16b3   : > { %8761 = vmatpush.bf16.msrb.mxu1 %v14320_v63  ;;  %v14389_v63 = vld [vmem:[%s17433_s17 + $0x178] sm:$0xff] }
0x16b4   : > { %8884 = vmatpush.bf16.msra.mxu3 %v14335_v61  ;;  %v14404_v61 = vld [vmem:[%s17433_s17 + $0x1f0] sm:$0xff] }
0x16b7   : > { %8762 = vmatpush.bf16.msrb.mxu1 %v14319_v11  ;;  %v14388_v11 = vld [vmem:[%s17433_s17 + $0x170] sm:$0xff] }
0x16b8   : > { %8885 = vmatpush.bf16.msra.mxu3 %v14334_v15  ;;  %v14386_v15 = vld [vmem:[%s17433_s17 + $0x160] sm:$0xff] }
0x16bb   : > { %8763 = vmatpush.bf16.msrb.mxu1 %v14318_v12  ;;  %v14403_v12 = vld [vmem:[%s17433_s17 + $0x1e8] sm:$0xff] }
0x16bc   : > { %9122 = vmatpush.bf16.msrb.mxu3 %v14373_v20  ;;  %v14401_v20 = vld [vmem:[%s17433_s17 + $0x1d8] sm:$0xff] }
0x16bf   : > { %9000 = vmatpush.bf16.msra.mxu1 %v14357_v18  ;;  %v14377_v18 = vld [vmem:[%s17433_s17 + $0x118] sm:$0xff] }
0x16c0   : > { %9123 = vmatpush.bf16.msrb.mxu3 %v14372_v26  ;;  %v14400_v26 = vld [vmem:[%s17433_s17 + $0x1d0] sm:$0xff] }
0x16c3   : > { %9001 = vmatpush.bf16.msra.mxu1 %v14356_v22  ;;  %v14384_v22 = vld [vmem:[%s17433_s17 + $0x150] sm:$0xff] }
0x1706   : > { %v8225_v27 = vpop.f32.mrf.mxu0 }
0x170e   : > { %v8227_v28 = vpop.f32.mrf.mxu0 }
0x170f   : > { %v14355_v28 = vld [vmem:[%s17432_s16 + $0x168] sm:$0xff] }
0x1710   : > { %9002 = vmatpush.bf16.msra.mxu1 %v14355_v28  ;;  %v14383_v28 = vld [vmem:[%s17433_s17 + $0x148] sm:$0xff] }
0x1716   : > { %v8357_v30 = vpop.f32.mrf.mxu0 }
0x1717   : > { %13037 = vst [vmem:[%s16197_s25 + $0x20] sm:$0xff] %v8357_v30  ;;  %v14363_v30 = vld [vmem:[%s17432_s16 + $0x1a8] sm:$0xff] }
0x171b   : > { %v8253_v31 = vpop.f32.mrf.mxu1 }
0x171c   : > { %v8313_v32 = vadd.f32 %v8253_v31, %v8225_v27  ;;  %v14347_v27 = vld [vmem:[%s17432_s16 + $0x128] sm:$0xff] }
0x171d   : > { %v14371_v31 = vld [vmem:[%s17432_s16 + $0x1e8] sm:$0xff]  ;;  %8941 = vmatpush.bf16.msra.mxu0 %v14347_v27 }
0x171e   : > { %v8309_v33 = vpop.f32.mrf.mxu3  ;;  %9124 = vmatpush.bf16.msrb.mxu3 %v14371_v31  ;;  %v14375_v27 = vld [vmem:[%s17433_s17 + $0x108] sm:$0xff] }
0x171f   : > { %v8281_v35 = vpop.f32.mrf.mxu2  ;;  %v14399_v31 = vld [vmem:[%s17433_s17 + $0x1c8] sm:$0xff] }
0x1720   : > { %v8314_v37 = vadd.f32 %v8313_v32, %v8281_v35  ;;  %v14346_v32 = vld [vmem:[%s17432_s16 + $0x120] sm:$0xff] }
0x1721   : > { %v14362_v35 = vld [vmem:[%s17432_s16 + $0x1a0] sm:$0xff]  ;;  %8942 = vmatpush.bf16.msra.mxu0 %v14346_v32 }
0x1722   : > { %v8315_v36 = vadd.f32 %v8314_v37, %v8309_v33  ;;  %v14354_v33 = vld [vmem:[%s17432_s16 + $0x160] sm:$0xff] }
0x1723   : > { %v8255_v38 = vpop.f32.mrf.mxu1  ;;  %v14370_v37 = vld [vmem:[%s17432_s16 + $0x1e0] sm:$0xff]  ;;  %9003 = vmatpush.bf16.msra.mxu1 %v14354_v33 }
0x1724   : > { %v16995_v39 = vadd.f32 %v8315_v36, %v16810_v29  ;;  %v14333_v29 = vld [vmem:[%s17431_s15 + $0x1b8] sm:$0xff]  ;;  %9125 = vmatpush.bf16.msrb.mxu3 %v14370_v37  ;;  %v14374_v32 = vld [vmem:[%s17433_s17 + $0x100] sm:$0xff] }
0x1725   : > { %8817 = vmatpush.bf16.msra.mxu2 %v14333_v29  ;;  %v14345_v36 = vld [vmem:[%s17432_s16 + $0x118] sm:$0xff]  ;;  %v14359_v29 = vld [vmem:[%s17432_s16 + $0x188] sm:$0xff]  ;;  %v14382_v33 = vld [vmem:[%s17433_s17 + $0x140] sm:$0xff] }
0x1726   : > { %8317 = vadd.xlane.f32.xlu1 %v16995_v39  ;;  %v8311_v48 = vpop.f32.mrf.mxu3  ;;  %v14353_v38 = vld [vmem:[%s17432_s16 + $0x158] sm:$0xff]  ;;  %8943 = vmatpush.bf16.msra.mxu0 %v14345_v36  ;;  %v14398_v37 = vld [vmem:[%s17433_s17 + $0x1c0] sm:$0xff] }
0x1727   : > { %v8283_v40 = vpop.f32.mrf.mxu2  ;;  %v14369_v48 = vld [vmem:[%s17432_s16 + $0x1d8] sm:$0xff]  ;;  %9004 = vmatpush.bf16.msra.mxu1 %v14353_v38 }
0x1728   : > { %9126 = vmatpush.bf16.msrb.mxu3 %v14369_v48  ;;  %v14344_v40 = vld [vmem:[%s17432_s16 + $0x110] sm:$0xff] }
0x1729   : > { %8818 = vmatpush.bf16.msra.mxu2 %v14332_v49  ;;  %v14358_v49 = vld [vmem:[%s17432_s16 + $0x180] sm:$0xff] }
0x172a   : > { %8944 = vmatpush.bf16.msra.mxu0 %v14344_v40 }
0x172b   : > { %v8380_v41 = vpop.f32.mrf.mxu1 }
0x172c   : > { %13038 = vst [vmem:[%s16197_s25 + $0x28] sm:$0xff] %v8380_v41  ;;  %v14352_v41 = vld [vmem:[%s17432_s16 + $0x150] sm:$0xff] }
0x172d   : > { %8819 = vmatpush.bf16.msra.mxu2 %v14331_v53  ;;  %9005 = vmatpush.bf16.msra.mxu1 %v14352_v41 }
0x172e   : > { %v8426_v14 = vpop.f32.mrf.mxu3  ;;  %8945 = vmatpush.bf16.msra.mxu0 %v14343_v43 }
0x172f   : > { %v8403_v42 = vpop.f32.mrf.mxu2  ;;  %13040 = vst [vmem:[%s16197_s25 + $0x38] sm:$0xff] %v8426_v14  ;;  %v14360_v14 = vld [vmem:[%s17432_s16 + $0x190] sm:$0xff] }
0x1730   : > { %13039 = vst [vmem:[%s16197_s25 + $0x30] sm:$0xff] %v8403_v42  ;;  %v14368_v42 = vld [vmem:[%s17432_s16 + $0x1d0] sm:$0xff] }
0x1731   : > { %8820 = vmatpush.bf16.msra.mxu2 %v14330_v57  ;;  %9127 = vmatpush.bf16.msrb.mxu3 %v14368_v42 }
0x1732   : > { %9006 = vmatpush.bf16.msra.mxu1 %v14351_v44  ;;  %8946 = vmatpush.bf16.msra.mxu0 %v14342_v47 }
0x1735   : > { %8821 = vmatpush.bf16.msra.mxu2 %v14329_v2  ;;  %9128 = vmatpush.bf16.msrb.mxu3 %v14367_v45 }
0x1736   : > { %9007 = vmatpush.bf16.msra.mxu1 %v14350_v34 }
0x1739   : > { %8822 = vmatpush.bf16.msra.mxu2 %v14328_v6  ;;  %9129 = vmatpush.bf16.msrb.mxu3 %v14366_v50  ;;  %v14397_v6 = vld [vmem:[%s17433_s17 + $0x1b8] sm:$0xff] }
0x173d   : > { %8823 = vmatpush.bf16.msra.mxu2 %v14327_v46  ;;  %v14396_v46 = vld [vmem:[%s17433_s17 + $0x1b0] sm:$0xff] }
0x1741   : > { %8824 = vmatpush.bf16.msra.mxu2 %v14326_v13  ;;  %v14378_v13 = vld [vmem:[%s17433_s17 + $0x120] sm:$0xff] }
0x1745   : > { %9061 = vmatpush.bf16.msrb.mxu2 %v14365_v19  ;;  %v14385_v19 = vld [vmem:[%s17433_s17 + $0x158] sm:$0xff] }
0x1749   : > { %9062 = vmatpush.bf16.msrb.mxu2 %v14364_v25  ;;  %v14392_v25 = vld [vmem:[%s17433_s17 + $0x190] sm:$0xff] }
0x174d   : > { %9063 = vmatpush.bf16.msrb.mxu2 %v14363_v30  ;;  %v14391_v30 = vld [vmem:[%s17433_s17 + $0x188] sm:$0xff] }
0x1751   : > { %9064 = vmatpush.bf16.msrb.mxu2 %v14362_v35  ;;  %v14390_v35 = vld [vmem:[%s17433_s17 + $0x180] sm:$0xff] }
0x1799   : > { %v8318_v62 = vpop.xlane.xlu1 %8317 }
0x179a   : > { %v8319_v59 = vmul.f32 %v8318_v62, %v15123_v5  ;;  %v14379_v62 = vld [vmem:[%s17433_s17 + $0x128] sm:$0xff] }
0x179c   : > { %v17099_v16 = vsub.f32 %v16995_v39, %v8319_v59  ;;  %v14361_v39 = vld [vmem:[%s17432_s16 + $0x198] sm:$0xff]  ;;  %v14387_v59 = vld [vmem:[%s17433_s17 + $0x168] sm:$0xff] }
0x179d   : > { %9065 = vmatpush.bf16.msrb.mxu2 %v14361_v39 }
0x179e   : > { %v8321_v8 = vmul.f32 %v17099_v16, %v17099_v16 }
0x17a0   : > { %8322 = vadd.xlane.f32.xlu2 %v8321_v8  ;;  %v14393_v8 = vld [vmem:[%s17433_s17 + $0x198] sm:$0xff] }
0x17a1   : > { %9066 = vmatpush.bf16.msrb.mxu2 %v14360_v14 }
0x17a5   : > { %9067 = vmatpush.bf16.msrb.mxu2 %v14359_v29 }
0x17a9   : > { %9068 = vmatpush.bf16.msrb.mxu2 %v14358_v49 }
0x1813   : > { %v8323_v51 = vpop.xlane.xlu2 %8322 }
0x1814   : > { %v8324_v52 = vmul.f32 %v8323_v51, %v15123_v5 }
0x1816   : > { %v8325_v53 = vadd.f32 1e-05, %v8324_v52 }
0x1818   : > { %14526 = vrsqrt.f32 %v8325_v53  ;;  %vm8332_vm12 = vweird.f32 %v8325_v53 }
0x181e   : > { %v14527_v54 = vpop.eup %14526 }
0x181f   : > { %v8327_v55 = vmul.f32 %v14527_v54, %v8325_v53  ;;  %vm8333_vm11 = vweird.f32 %v14527_v54 }
0x1820   : > { %vm8334_vm13 = vmor %vm8332_vm12, %vm8333_vm11 }
0x1821   : > { %v8328_v7 = vmul.f32 %v14527_v54, %v8327_v55 }
0x1823   : > { %v8329_v57 = vmul.f32 0.5, %v8328_v7 }
0x1825   : > { %v8330_v58 = vsub.f32 1.5, %v8329_v57 }
0x1827   : > { %v8331_v0 = vmul.f32 %v14527_v54, %v8330_v58 }
0x1829   : > { %v8335_v1 = vsel %vm8334_vm13, %v14527_v54, %v8331_v0 }
0x182a   : > { %v17201_v2 = vmul.f32 %v8335_v1, %v17099_v16  ;;  %v14394_v16 = vld [vmem:[%s17433_s17 + $0x1a0] sm:$0xff] }
0x182c   : > { %v8646_v3 = vpack.c.bf16 %v17201_v2, %v17201_v2 }
0x182e   : > { %8703 = vmatmul.bf16.vlgmr.msrb.gmra.mxu0 %v8646_v3  ;;  %8764 = vmatmul.bf16.vlgmr.msrb.gmra.mxu1 %v8646_v3 }
0x182f   : > { %8825 = vmatmul.bf16.vlgmr.msra.gmra.mxu2 %v8646_v3  ;;  %8886 = vmatmul.bf16.vlgmr.msra.gmra.mxu3 %v8646_v3 }
0x1830   : > { %9183 = vmatpush.bf16.msrb.mxu0 %v14381_v4  ;;  %9244 = vmatpush.bf16.msrb.mxu1 %v14389_v63 }
0x1831   : > { %9305 = vmatpush.bf16.msra.mxu2 %v14397_v6  ;;  %9366 = vmatpush.bf16.msra.mxu3 %v14405_v9 }
0x1834   : > { %9184 = vmatpush.bf16.msrb.mxu0 %v14380_v10  ;;  %9245 = vmatpush.bf16.msrb.mxu1 %v14388_v11 }
0x1835   : > { %9306 = vmatpush.bf16.msra.mxu2 %v14396_v46  ;;  %9367 = vmatpush.bf16.msra.mxu3 %v14404_v61 }
0x1838   : > { %9185 = vmatpush.bf16.msrb.mxu0 %v14379_v62  ;;  %9246 = vmatpush.bf16.msrb.mxu1 %v14387_v59 }
0x1839   : > { %9307 = vmatpush.bf16.msra.mxu2 %v14395_v60  ;;  %9368 = vmatpush.bf16.msra.mxu3 %v14403_v12 }
0x183c   : > { %9186 = vmatpush.bf16.msrb.mxu0 %v14378_v13  ;;  %9247 = vmatpush.bf16.msrb.mxu1 %v14386_v15 }
0x183d   : > { %9308 = vmatpush.bf16.msra.mxu2 %v14394_v16  ;;  %9369 = vmatpush.bf16.msra.mxu3 %v14402_v17 }
0x183e   : > { %8947 = vmatmul.bf16.vlgmr.msra.gmra.mxu0 %v16463_v56  ;;  %9008 = vmatmul.bf16.vlgmr.msra.gmra.mxu1 %v16463_v56 }
0x183f   : > { %9069 = vmatmul.bf16.vlgmr.msrb.gmra.mxu2 %v16463_v56  ;;  %9130 = vmatmul.bf16.vlgmr.msrb.gmra.mxu3 %v16463_v56 }
0x1840   : > { %9187 = vmatpush.bf16.msrb.mxu0 %v14377_v18  ;;  %9248 = vmatpush.bf16.msrb.mxu1 %v14385_v19 }
0x1841   : > { %9309 = vmatpush.bf16.msra.mxu2 %v14393_v8  ;;  %9370 = vmatpush.bf16.msra.mxu3 %v14401_v20  ;;  %v14548_v20 = vld [vmem:[%s16537_s19] sm:$0xff] }
0x1844   : > { %9188 = vmatpush.bf16.msrb.mxu0 %v14376_v21  ;;  %9249 = vmatpush.bf16.msrb.mxu1 %v14384_v22 }
0x1845   : > { %9310 = vmatpush.bf16.msra.mxu2 %v14392_v25  ;;  %9371 = vmatpush.bf16.msra.mxu3 %v14400_v26 }
0x1848   : > { %9189 = vmatpush.bf16.msrb.mxu0 %v14375_v27  ;;  %9250 = vmatpush.bf16.msrb.mxu1 %v14383_v28 }
0x1849   : > { %9311 = vmatpush.bf16.msra.mxu2 %v14391_v30  ;;  %9372 = vmatpush.bf16.msra.mxu3 %v14399_v31 }
0x184c   : > { %9190 = vmatpush.bf16.msrb.mxu0 %v14374_v32  ;;  %9251 = vmatpush.bf16.msrb.mxu1 %v14382_v33 }
0x184d   : > { %9312 = vmatpush.bf16.msra.mxu2 %v14390_v35  ;;  %9373 = vmatpush.bf16.msra.mxu3 %v14398_v37 }
0x184f   : > { %9191 = vmatmul.bf16.vlgmr.msrb.gmra.mxu0 %v16463_v56  ;;  %9252 = vmatmul.bf16.vlgmr.msrb.gmra.mxu1 %v16463_v56 }
0x1850   : > { %9313 = vmatmul.bf16.vlgmr.msra.gmra.mxu2 %v16463_v56  ;;  %9374 = vmatmul.bf16.vlgmr.msra.gmra.mxu3 %v16463_v56 }
0x18ab   : > { %v8704_v36 = vpop.f32.mrf.mxu0  ;;  %v8765_v38 = vpop.f32.mrf.mxu1 }
0x18ac   : > { %v9379_v54 = vpack.c.bf16 %v8704_v36, %v8704_v36  ;;  %v9380_v55 = vpack.c.bf16 %v8765_v38, %v8765_v38 }
0x18b2   : > { %v8826_v39 = vpop.f32.mrf.mxu2  ;;  %v8887_v48 = vpop.f32.mrf.mxu3 }
0x18b3   : > { %v8706_v40 = vpop.f32.mrf.mxu0  ;;  %v8767_v41 = vpop.f32.mrf.mxu1  ;;  %v9381_v1 = vpack.c.bf16 %v8826_v39, %v8826_v39  ;;  %v9382_v3 = vpack.c.bf16 %v8887_v48, %v8887_v48 }
0x18ba   : > { %v8828_v14 = vpop.f32.mrf.mxu2  ;;  %v8889_v42 = vpop.f32.mrf.mxu3 }
0x18bb   : > { %v8948_v43 = vpop.f32.mrf.mxu0  ;;  %v9009_v44 = vpop.f32.mrf.mxu1 }
0x18bc   : > { %v9383_v29 = vpack.c.bf16 %v8948_v43, %v8948_v43  ;;  %v9384_v45 = vpack.c.bf16 %v9009_v44, %v9009_v44 }
0x18be   : > { %v9391_v47 = vsel %vm1770_vm0, %v9383_v29, 0  ;;  %v9410_v34 = vsel %vm1770_vm0, %v9384_v45, 0 }
0x18bf   : > { %9400 = vmatpush.bf16.xpose.msra.mxu0 %v9391_v47  ;;  %9419 = vmatpush.bf16.xpose.msra.mxu1 %v9410_v34 }
0x18c2   : > { %v9070_v49 = vpop.f32.mrf.mxu2  ;;  %v9131_v56 = vpop.f32.mrf.mxu3 }
0x18c3   : > { %v9385_v50 = vpack.c.bf16 %v9070_v49, %v9070_v49  ;;  %v9386_v51 = vpack.c.bf16 %v9131_v56, %v9131_v56  ;;  %v8950_v52 = vpop.f32.mrf.mxu0  ;;  %v9011_v53 = vpop.f32.mrf.mxu1 }
0x18c5   : > { %v9429_v7 = vsel %vm1770_vm0, %v9385_v50, 0  ;;  %v9448_v57 = vsel %vm1770_vm0, %v9386_v51, 0 }
0x18c6   : > { %9438 = vmatpush.bf16.xpose.msrb.mxu2 %v9429_v7  ;;  %9457 = vmatpush.bf16.xpose.msrb.mxu3 %v9448_v57 }
0x18c7   : > { %13633 = vmatmul.msk.bf16.vlgmr.msra.gmra.mxu0 %vm1770_vm0, %v9379_v54  ;;  %13634 = vmatmul.msk.bf16.vlgmr.msra.gmra.mxu1 %vm1770_vm0, %v9380_v55 }
0x18ca   : > { %v9072_v58 = vpop.f32.mrf.mxu2  ;;  %v9133_v0 = vpop.f32.mrf.mxu3 }
0x18cc   : > { %v9192_v4 = vpop.f32.mrf.mxu0  ;;  %v9253_v63 = vpop.f32.mrf.mxu1 }
0x18cd   : > { %v9519_v6 = vpack.c.bf16 %v9192_v4, %v9192_v4  ;;  %v9520_v9 = vpack.c.bf16 %v9253_v63, %v9253_v63  ;;  %13635 = vmatmul.msk.bf16.vlgmr.msrb.gmra.mxu2 %vm1770_vm0, %v9381_v1  ;;  %13636 = vmatmul.msk.bf16.vlgmr.msrb.gmra.mxu3 %vm1770_vm0, %v9382_v3  ;;  %v14407_v1 = vld [vmem:[%s17434_s18 + $0x48] sm:$0xff] }
0x18cf   : > { %v9527_v10 = vsel %vm1911_vm1, %v9519_v6, 0  ;;  %v9546_v11 = vsel %vm1911_vm1, %v9520_v9, 0 }
0x18d0   : > { %9536 = vmatpush.bf16.msrb.mxu0 %v9527_v10  ;;  %9555 = vmatpush.bf16.msrb.mxu1 %v9546_v11 }
0x18d3   : > { %v9314_v46 = vpop.f32.mrf.mxu2  ;;  %v9375_v61 = vpop.f32.mrf.mxu3 }
0x18d4   : > { %v9521_v62 = vpack.c.bf16 %v9314_v46, %v9314_v46  ;;  %v9522_v59 = vpack.c.bf16 %v9375_v61, %v9375_v61  ;;  %v9194_v60 = vpop.f32.mrf.mxu0  ;;  %v9255_v12 = vpop.f32.mrf.mxu1  ;;  %9624 = vmatpush.bf16.msra.mxu0 %v14407_v1 }
0x18d6   : > { %v9565_v13 = vsel %vm1911_vm1, %v9521_v62, 0  ;;  %v9584_v15 = vsel %vm1911_vm1, %v9522_v59, 0 }
0x18d7   : > { %9574 = vmatpush.bf16.msra.mxu2 %v9565_v13  ;;  %9593 = vmatpush.bf16.msra.mxu3 %v9584_v15 }
0x18db   : > { %v9316_v16 = vpop.f32.mrf.mxu2  ;;  %v9377_v17 = vpop.f32.mrf.mxu3 }
0x18dc   : > { %v14406_v16 = vld [vmem:[%s17434_s18 + $0x40] sm:$0xff]  ;;  %v14411_v17 = vld [vmem:[%s17434_s18 + $0x68] sm:$0xff] }
0x18dd   : > { %9625 = vmatpush.bf16.msra.mxu0 %v14406_v16  ;;  %9680 = vmatpush.bf16.msrb.mxu2 %v14411_v17 }
0x1944   : > { %v9402_v18 = vpop.f32.mrf.mxu0  ;;  %v9421_v19 = vpop.f32.mrf.mxu1 }
0x1945   : > { %v9463_v8 = vmul.f32 0.17677669, %v9402_v18  ;;  %v9464_v35 = vmul.f32 0.17677669, %v9421_v19  ;;  %v14413_v18 = vld [vmem:[%s17434_s18 + $0x78] sm:$0xff] }
0x1946   : > { %v14409_v19 = vld [vmem:[%s17434_s18 + $0x58] sm:$0xff]  ;;  %9708 = vmatpush.bf16.msrb.mxu3 %v14413_v18 }
0x1947   : > { %v9467_v21 = vadd.f32 %v14548_v20, %v9463_v8  ;;  %v9468_v48 = vadd.f32 %v14548_v20, %v9464_v35  ;;  %9652 = vmatpush.bf16.msra.mxu1 %v14409_v19  ;;  %v14410_v8 = vld [vmem:[%s17434_s18 + $0x60] sm:$0xff] }
0x1948   : > { %9681 = vmatpush.bf16.msrb.mxu2 %v14410_v8 }
0x1949   : > { %v9471_v22 = vsel %vm1855_vm2, %v9467_v21, -inf  ;;  %v9474_v40 = vsel %vm1855_vm2, %v9468_v48, -inf }
0x194a   : > { %9472 = vmax.xlane.f32.xlu2 %v9471_v22 }
0x194c   : > { %v9404_v25 = vpop.f32.mrf.mxu0  ;;  %v9423_v26 = vpop.f32.mrf.mxu1 }
0x1950   : > { %v9440_v27 = vpop.f32.mrf.mxu2  ;;  %v9459_v28 = vpop.f32.mrf.mxu3 }
0x1951   : > { %v9465_v30 = vmul.f32 0.17677669, %v9440_v27  ;;  %v9466_v31 = vmul.f32 0.17677669, %v9459_v28 }
0x1953   : > { %v9470_v32 = vadd.f32 %v14548_v20, %v9466_v31  ;;  %v9469_v33 = vadd.f32 %v14548_v20, %v9465_v30  ;;  %v14412_v20 = vld [vmem:[%s17434_s18 + $0x70] sm:$0xff] }
0x1954   : > { %9709 = vmatpush.bf16.msrb.mxu3 %v14412_v20 }
0x1955   : > { %v9480_v37 = vsel %vm1855_vm2, %v9470_v32, -inf  ;;  %v9477_v36 = vsel %vm1855_vm2, %v9469_v33, -inf }
0x1956   : > { %9481 = vmax.xlane.f32.xlu1 %v9480_v37  ;;  %9478 = vmax.xlane.f32.xlu0 %v9477_v36 }
0x1958   : > { %v9442_v38 = vpop.f32.mrf.mxu2  ;;  %v9461_v39 = vpop.f32.mrf.mxu3 }
0x195e   : > { %9475 = vmax.xlane.f32.xlu0 %v9474_v40 }
0x19bd   : > { %v9473_v41 = vpop.xlane.xlu2 %9472 }
0x19be   : > { %v9483_v14 = vsub.f32 %v9467_v21, %v9473_v41  ;;  %v14408_v21 = vld [vmem:[%s17434_s18 + $0x50] sm:$0xff] }
0x19bf   : > { %9653 = vmatpush.bf16.msra.mxu1 %v14408_v21 }
0x19c0   : > { %v9487_v42 = vmul.f32 1.442695, %v9483_v14 }
0x19c2   : > { %14528 = vpow2.f32 %v9487_v42 }
0x19c8   : > { %v14529_v43 = vpop.eup %14528 }
0x19c9   : > { %v9482_v44 = vpop.xlane.xlu1 %9481  ;;  %v9479_v29 = vpop.xlane.xlu0 %9478  ;;  %v9495_v45 = vsel %vm1855_vm2, %v14529_v43, 0.0 }
0x19ca   : > { %v9486_v47 = vsub.f32 %v9470_v32, %v9482_v44  ;;  %v9485_v34 = vsub.f32 %v9469_v33, %v9479_v29  ;;  %9496 = vadd.xlane.f32.xlu0 %v9495_v45 }
0x19cc   : > { %v9493_v49 = vmul.f32 1.442695, %v9486_v47  ;;  %v9491_v56 = vmul.f32 1.442695, %v9485_v34 }
0x19ce   : > { %14530 = vpow2.f32 %v9493_v49 }
0x19cf   : > { %14532 = vpow2.f32 %v9491_v56  ;;  %v14421_v56 = vld [vmem:[%s17468_s20 + $0x38] sm:$0xff] }
0x19d1   : > { %v9476_v50 = vpop.xlane.xlu0 %9475 }
0x19d2   : > { %v9484_v51 = vsub.f32 %v9468_v48, %v9476_v50  ;;  %v14420_v50 = vld [vmem:[%s17468_s20 + $0x30] sm:$0xff] }
0x19d4   : > { %v14531_v52 = vpop.eup %14530  ;;  %v9489_v53 = vmul.f32 1.442695, %v9484_v51 }
0x19d5   : > { %v14533_v54 = vpop.eup %14532  ;;  %v9504_v55 = vsel %vm1855_vm2, %v14531_v52, 0.0 }
0x19d6   : > { %14534 = vpow2.f32 %v9489_v53  ;;  %v9501_v7 = vsel %vm1855_vm2, %v14533_v54, 0.0  ;;  %9505 = vadd.xlane.f32.xlu2 %v9504_v55  ;;  %v14418_v55 = vld [vmem:[%s17468_s20 + $0x20] sm:$0xff] }
0x19d7   : > { %9502 = vadd.xlane.f32.xlu1 %v9501_v7  ;;  %v14417_v7 = vld [vmem:[%s17468_s20 + $0x18] sm:$0xff] }
0x19dc   : > { %v14535_v57 = vpop.eup %14534 }
0x19dd   : > { %v9498_v58 = vsel %vm1855_vm2, %v14535_v57, 0.0 }
0x19df   : > { %9499 = vadd.xlane.f32.xlu1 %v9498_v58  ;;  %v14415_v58 = vld [vmem:[%s17468_s20 + $0x8] sm:$0xff] }
0x1a3d   : > { %v9497_v0 = vpop.xlane.xlu0 %9496 }
0x1a3e   : > { %14536 = vrcp.f32 %v9497_v0  ;;  %v14414_v0 = vld [vmem:[%s17468_s20] sm:$0xff] }
0x1a44   : > { %v14537_v3 = vpop.eup %14536 }
0x1a45   : > { %v9511_v4 = vmul.f32 %v14537_v3, %v14529_v43 }
0x1a47   : > { %v9515_v63 = vpack.c.bf16 %v9511_v4, %v9511_v4 }
0x1a49   : > { %13637 = vmatmul.msk.bf16.vlgmr.msrb.gmra.mxu0 %vm1855_vm2, %v9515_v63  ;;  %v9506_v6 = vpop.xlane.xlu2 %9505 }
0x1a4a   : > { %v9503_v9 = vpop.xlane.xlu1 %9502  ;;  %14538 = vrcp.f32 %v9506_v6  ;;  %13677 = vmatpush.msk.msrb.mxu0 %vm15062_vm3, %v14557_v24 }
0x1a4b   : > { %14540 = vrcp.f32 %v9503_v9 }
0x1a50   : > { %v14539_v10 = vpop.eup %14538 }
0x1a51   : > { %v14541_v11 = vpop.eup %14540  ;;  %v9514_v46 = vmul.f32 %v14539_v10, %v14531_v52 }
0x1a52   : > { %v9513_v61 = vmul.f32 %v14541_v11, %v14533_v54  ;;  %v9500_v62 = vpop.xlane.xlu1 %9499  ;;  %v14419_v54 = vld [vmem:[%s17468_s20 + $0x28] sm:$0xff] }
0x1a53   : > { %v9518_v59 = vpack.c.bf16 %v9514_v46, %v9514_v46  ;;  %14542 = vrcp.f32 %v9500_v62 }
0x1a54   : > { %v9517_v60 = vpack.c.bf16 %v9513_v61, %v9513_v61 }
0x1a55   : > { %13640 = vmatmul.msk.bf16.vlgmr.msra.gmra.mxu3 %vm1855_vm2, %v9518_v59 }
0x1a56   : > { %13639 = vmatmul.msk.bf16.vlgmr.msra.gmra.mxu2 %vm1855_vm2, %v9517_v60  ;;  %13683 = vmatpush.msk.msra.mxu3 %vm15062_vm3, %v14557_v24 }
0x1a57   : > { %13681 = vmatpush.msk.msra.mxu2 %vm15062_vm3, %v14557_v24 }
0x1a59   : > { %v14543_v12 = vpop.eup %14542 }
0x1a5a   : > { %v9512_v13 = vmul.f32 %v14543_v12, %v14535_v57  ;;  %v14416_v57 = vld [vmem:[%s17468_s20 + $0x10] sm:$0xff] }
0x1a5c   : > { %v9516_v15 = vpack.c.bf16 %v9512_v13, %v9512_v13 }
0x1a5e   : > { %13638 = vmatmul.msk.bf16.vlgmr.msrb.gmra.mxu1 %vm1855_vm2, %v9516_v15 }
0x1a5f   : > { %13679 = vmatpush.msk.msrb.mxu1 %vm15062_vm3, %v14557_v24 }
0x1ac6   : > { %v9538_v22 = vpop.f32.mrf.mxu0 }
0x1ac7   : > { %v9599_v25 = vpack.c.bf16 %v9538_v22, %v9538_v22 }
0x1ac9   : > { %13649 = vmatmul.msk.bf16.vlgmr.msra.gmra.mxu0 %vm1770_vm0, %v9599_v25 }
0x1aca   : > { %9901 = vmatpush.bf16.msra.mxu0 %v14421_v56 }
0x1ace   : > { %v9540_v26 = vpop.f32.mrf.mxu0  ;;  %9902 = vmatpush.bf16.msra.mxu0 %v14420_v50 }
0x1ad2   : > { %9903 = vmatpush.bf16.msra.mxu0 %v14419_v54 }
0x1ad6   : > { %9904 = vmatpush.bf16.msra.mxu0 %v14418_v55 }
0x1ad8   : > { %v9595_v27 = vpop.f32.mrf.mxu3 }
0x1ad9   : > { %v9576_v28 = vpop.f32.mrf.mxu2  ;;  %v9602_v30 = vpack.c.bf16 %v9595_v27, %v9595_v27  ;;  %13678 = vmatmul.msk.f32.vlgmr.msrb.gmra.mxu0 %vm1855_vm2, %v9511_v4 }
0x1ada   : > { %v9601_v31 = vpack.c.bf16 %v9576_v28, %v9576_v28  ;;  %9905 = vmatpush.bf16.msra.mxu0 %v14417_v7 }
0x1adb   : > { %v9557_v32 = vpop.f32.mrf.mxu1  ;;  %13676 = vmatmul.msk.bf16.vlgmr.msrb.gmra.mxu3 %vm1770_vm0, %v9602_v30 }
0x1adc   : > { %v9600_v33 = vpack.c.bf16 %v9557_v32, %v9557_v32  ;;  %13667 = vmatmul.msk.bf16.vlgmr.msrb.gmra.mxu2 %vm1770_vm0, %v9601_v31 }
0x1ade   : > { %13658 = vmatmul.msk.bf16.vlgmr.msra.gmra.mxu1 %vm1770_vm0, %v9600_v33  ;;  %9906 = vmatpush.bf16.msra.mxu0 %v14416_v57 }
0x1ae0   : > { %v9597_v23 = vpop.f32.mrf.mxu3 }
0x1ae1   : > { %v9578_v24 = vpop.f32.mrf.mxu2 }
0x1ae2   : > { %9907 = vmatpush.bf16.msra.mxu0 %v14415_v58 }
0x1ae3   : > { %v9559_v35 = vpop.f32.mrf.mxu1 }
0x1ae6   : > { %9908 = vmatpush.bf16.msra.mxu0 %v14414_v0 }
0x1aeb   : > { %13684 = vmatmul.msk.f32.vlgmr.msra.gmra.mxu3 %vm1855_vm2, %v9514_v46 }
0x1aec   : > { %13682 = vmatmul.msk.f32.vlgmr.msra.gmra.mxu2 %vm1855_vm2, %v9513_v61 }
0x1aee   : > { %13680 = vmatmul.msk.f32.vlgmr.msrb.gmra.mxu1 %vm1855_vm2, %v9512_v13 }
0x1b46   : > { %v9627_v37 = vpop.f32.mrf.mxu0 }
0x1b4e   : > { %v9629_v36 = vpop.f32.mrf.mxu0 }
0x1b56   : > { %v9759_v38 = vpop.f32.mrf.mxu0 }
0x1b57   : > { %13685 = vst [vmem:[%s16600_s0 + $0x20] sm:$0xff] %v9759_v38 }
0x1b5b   : > { %v9655_v39 = vpop.f32.mrf.mxu1 }
0x1b5c   : > { %v9715_v48 = vadd.f32 %v9655_v39, %v9627_v37 }
0x1b5e   : > { %v9711_v40 = vpop.f32.mrf.mxu3 }
0x1b5f   : > { %v9683_v41 = vpop.f32.mrf.mxu2 }
0x1b60   : > { %v9716_v14 = vadd.f32 %v9715_v48, %v9683_v41 }
0x1b62   : > { %v9717_v42 = vadd.f32 %v9716_v14, %v9711_v40 }
0x1b63   : > { %v9657_v43 = vpop.f32.mrf.mxu1 }
0x1b64   : > { %v9718_v44 = vadd.f32 %v9717_v42, %v17201_v2 }
0x1b66   : > { %9719 = vadd.xlane.f32.xlu2 %v9718_v44  ;;  %v9713_v29 = vpop.f32.mrf.mxu3 }
0x1b67   : > { %v9685_v45 = vpop.f32.mrf.mxu2 }
0x1b6b   : > { %v9782_v47 = vpop.f32.mrf.mxu1 }
0x1b6c   : > { %13686 = vst [vmem:[%s16600_s0 + $0x28] sm:$0xff] %v9782_v47 }
0x1b6e   : > { %v9828_v34 = vpop.f32.mrf.mxu3 }
0x1b6f   : > { %v9805_v49 = vpop.f32.mrf.mxu2  ;;  %13688 = vst [vmem:[%s16600_s0 + $0x38] sm:$0xff] %v9828_v34 }
0x1b70   : > { %13687 = vst [vmem:[%s16600_s0 + $0x30] sm:$0xff] %v9805_v49  ;;  %s795_s0 = scalar_lea.vmem %s17469_s4, %s14763_s3 }
0x1bd9   : > { %v9720_v2 = vpop.xlane.xlu2 %9719 }
0x1bda   : > { %v9721_v51 = vmul.f32 %v9720_v2, %v15123_v5 }
0x1bdc   : > { %v9722_v52 = vsub.f32 %v9718_v44, %v9721_v51 }
0x1bde   : > { %v9723_v53 = vmul.f32 %v9722_v52, %v9722_v52 }
0x1be0   : > { %9724 = vadd.xlane.f32.xlu0 %v9723_v53 }
0x1c53   : > { %v9725_v1 = vpop.xlane.xlu0 %9724 }
0x1c54   : > { %v9726_v3 = vmul.f32 %v9725_v1, %v15123_v5 }
0x1c56   : > { %v9727_v4 = vadd.f32 1e-05, %v9726_v3 }
0x1c58   : > { %14544 = vrsqrt.f32 %v9727_v4  ;;  %vm9734_vm1 = vweird.f32 %v9727_v4 }
0x1c5e   : > { %v14545_v63 = vpop.eup %14544 }
0x1c5f   : > { %v9729_v6 = vmul.f32 %v14545_v63, %v9727_v4  ;;  %vm9735_vm0 = vweird.f32 %v14545_v63 }
0x1c60   : > { %vm9736_vm2 = vmor %vm9734_vm1, %vm9735_vm0 }
0x1c61   : > { %v9730_v9 = vmul.f32 %v14545_v63, %v9729_v6 }
0x1c63   : > { %v9731_v10 = vmul.f32 0.5, %v9730_v9 }
0x1c65   : > { %v9732_v11 = vsub.f32 1.5, %v9731_v10 }
0x1c67   : > { %v9733_v46 = vmul.f32 %v14545_v63, %v9732_v11 }
0x1c69   : > { %v9737_v61 = vsel %vm9736_vm2, %v14545_v63, %v9733_v46 }
0x1c6a   : > { %v9738_v62 = vmul.f32 %v9737_v61, %v9722_v52 }
0x1c6c   : > { %v9836_v59 = vpack.c.bf16 %v9738_v62, %v9738_v62 }
0x1c6e   : > { %9909 = vmatmul.bf16.vlgmr.msra.gmra.mxu0 %v9836_v59 }
0x1ceb   : > { %v9910_v5 = vpop.f32.mrf.mxu0 }
0x1cec   : > { %9914 = vst [vmem:[%s795_s0] sm:$0xff] %v9910_v5 }
0x1cf3   : > { %v9912_v60 = vpop.f32.mrf.mxu0 }
0x1cf4 PF: > { %s17470_s25 = sld [smem:[#allocation2_spill]] }
0x1cfa   : > { %s34_s4 = sadd.s32 1, %s17470_s25  }
0x1cfb   : > { %p31_p4 = scmp.ge.s32.totalorder %s34_s4, 4  }
0x1cfd   :  { %33 = sbr.rel (!%p31_p4) target bundleno = 12 (0xc), region = 195 }

</bundles_post_ra>
